<compile_context>
chip_gen: v7x
topology: tpu7x:2x2x1
jax: 0.10.0
libtpu: 0.0.40
codegen_flags: <defaults>
</compile_context>

<pallas_src>
import functools

import jax
import jax.numpy as jnp
from jax import lax
from jax.experimental import pallas as pl
from jax.experimental.pallas import tpu as pltpu


def _round_up(x, m):
    return (x + m - 1) // m * m


# ----------------------------------------------------------------------------- #
# Fused per-batch kernel: first/last embeddings + L decoder layers + final head
# ----------------------------------------------------------------------------- #
def _make_decoder_kernel(*, N, Np, H, D, L, compute_dtype):
    HD = H * D
    cdt = compute_dtype

    def kernel(x_ref, bias_ref,
               wfir_ref, bfir_ref, wlas_ref, blas_ref,
               wqkv_ref, wo_ref, bo_ref, w1_ref, b1_ref, w2_ref, b2_ref,
               wfin_ref, bfin_ref,
               o_ref,
               att_s):
        # ---- this batch's (padded) sequence --------------------------------
        x = x_ref[0]                                          # (Np, E) f32

        # ---- embedding_first_node / embedding_last_node (2 rows only) ------
        emb_f = (jnp.dot(x[0:1, :].astype(cdt), wfir_ref[...],
                         preferred_element_type=jnp.float32) + bfir_ref[...])
        emb_l = (jnp.dot(x[N - 1:N, :].astype(cdt), wlas_ref[...],
                         preferred_element_type=jnp.float32) + blas_ref[...])
        row = lax.broadcasted_iota(jnp.int32, (Np, 1), 0)
        is_f = (row == 0).astype(jnp.float32)
        is_l = (row == N - 1).astype(jnp.float32)
        x = (1.0 - is_f - is_l) * x + is_f * emb_f + is_l * emb_l

        # key-position mask for padded rows (loop-invariant)
        key_pad = lax.broadcasted_iota(jnp.int32, (Np, Np), 1) >= N

        # ---- decoder layers (fori_loop; dynamic layer indexing of weights) --
        def layer_body(l, x):
            # packed QKV projection: one (Np, E) @ (E, 3*HD) matmul (value)
            qkv = jnp.dot(x.astype(cdt), wqkv_ref[l],
                          preferred_element_type=jnp.float32)   # (Np, 3HD)
            # per-head attention; head outputs assembled in VMEM scratch so the
            # multi-head combine is a single contiguous (Np, HD) @ (HD, E) dot
            for h in range(H):
                c = h * D
                q = qkv[:, c:c + D]                             # (Np, D)
                k = qkv[:, HD + c:HD + c + D]                   # (Np, D)
                v = qkv[:, 2 * HD + c:2 * HD + c + D]           # (Np, D)
                # 1/sqrt(D) is pre-folded into the Q columns of wqkv
                s = lax.dot_general(q.astype(cdt), k.astype(cdt),
                                    (((1,), (1,)), ((), ())),
                                    preferred_element_type=jnp.float32)
                s = jnp.where(key_pad, -1e30, s)                # mask pad keys
                s = s - jnp.max(s, axis=-1, keepdims=True)
                e = jnp.exp(s)
                a = e * pl.reciprocal(jnp.sum(e, axis=-1, keepdims=True),
                                      approx=True)
                att_s[:, c:c + D] = jnp.dot(a.astype(cdt), v.astype(cdt),
                                            preferred_element_type=jnp.float32)
            mh = (jnp.dot(att_s[...].astype(cdt), wo_ref[l],
                          preferred_element_type=jnp.float32) + bo_ref[l])
            out1 = x + mh
            h1 = jnp.maximum(
                jnp.dot(out1.astype(cdt), w1_ref[l],
                        preferred_element_type=jnp.float32) + b1_ref[l], 0.0)
            ff = (jnp.dot(h1.astype(cdt), w2_ref[l],
                          preferred_element_type=jnp.float32) + b2_ref[l])
            return out1 + ff

        x = lax.fori_loop(0, L, layer_body, x)

        # ---- final head: one contraction, lane-dense (1, Np) store ----------
        logit = lax.dot_general(wfin_ref[...], x.astype(cdt),
                                (((1,), (1,)), ((), ())),
                                preferred_element_type=jnp.float32)   # (1, Np)
        logit = logit + bfin_ref[...] + bias_ref[0]
        pos = lax.broadcasted_iota(jnp.int32, (1, Np), 1)
        dead = (pos == 0) | (pos >= N - 1)          # endpoints + padded columns
        logit = jnp.where(dead, -jnp.inf, logit)
        m = jnp.max(logit, axis=-1, keepdims=True)
        e = jnp.exp(logit - m)
        p = e * pl.reciprocal(jnp.sum(e, axis=-1, keepdims=True), approx=True)
        p = jnp.where(p <= 1e-5, p + 1e-7, p)
        o_ref[0] = p

    return kernel


# ----------------------------------------------------------------------------- #
# Parameter init (deterministic, synthetic; layer weights stacked over L)
# ----------------------------------------------------------------------------- #
def init_params(key, *, embedding_dim, head_num, qkv_dim, ff_hidden_dim,
                decoder_layer_num):
    E, H, D, F, L = embedding_dim, head_num, qkv_dim, ff_hidden_dim, decoder_layer_num
    HD = H * D

    def lin(k, fan_in, shape):
        return jax.random.normal(k, shape, jnp.float32) / jnp.sqrt(fan_in)

    keys = jax.random.split(key, 13)
    params = {
        "w_first": lin(keys[0], E, (E, E)),
        "b_first": lin(keys[1], E, (1, E)),
        "w_last":  lin(keys[2], E, (E, E)),
        "b_last":  lin(keys[3], E, (1, E)),
        "w_final": lin(keys[4], E, (1, E)),     # stored as a row -> lane-dense head
        "b_final": lin(keys[5], E, (1, 1)),
        # per-layer weights stacked along a leading L axis; QKV packed (E, 3*HD)
        "wqkv": lin(keys[6],  E,  (L, E, 3 * HD)),
        "wo":   lin(keys[7],  HD, (L, HD, E)),
        "bo":   lin(keys[8],  HD, (L, 1, E)),
        "w1":   lin(keys[9],  E,  (L, E, F)),
        "b1":   lin(keys[10], E,  (L, 1, F)),
        "w2":   lin(keys[11], F,  (L, F, E)),
        "b2":   lin(keys[12], F,  (L, 1, E)),
    }
    # NOTE: the torch module's self.k_1 linear is never used in forward(); omitted.
    return params


# ----------------------------------------------------------------------------- #
# TSP_Decoder.forward — fully jittable; one batch-gridded pallas_call
# ----------------------------------------------------------------------------- #
@functools.partial(jax.jit,
                   static_argnames=("head_num", "qkv_dim", "compute_dtype"))
def tsp_decoder_forward(params, data, selected_node_list, attention_bias, *,
                        head_num, qkv_dim, compute_dtype=jnp.float32):
    data = data.astype(jnp.float32)
    B, P, E = data.shape
    sel = selected_node_list.astype(jnp.int32)
    S = sel.shape[1]
    new_len = P - S
    assert new_len >= 1, "need at least one unselected node"
    N = new_len + 2
    Np = _round_up(N, 128)        # sublane-aligned rows AND lane-dense output
    H, D = head_num, qkv_dim
    HD = H * D
    L = params["wqkv"].shape[0]
    F = params["w1"].shape[-1]
    cdt = compute_dtype

    batch_idx = jnp.arange(B)

    # ---- unselected-node bookkeeping (jittable; matches torch _get_new_data) --
    mask_sel = jnp.zeros((B, P), jnp.bool_).at[batch_idx[:, None], sel].set(True)
    keys = jnp.where(mask_sel, P, jnp.arange(P, dtype=jnp.int32)[None, :])
    unselect = jnp.sort(keys, axis=1)[:, :new_len].astype(jnp.int32)   # ascending

    left = jnp.take_along_axis(data, unselect[:, :, None], axis=1)     # (B,new_len,E)
    first = data[batch_idx, sel[:, 0]]                                 # (B, E)
    last = data[batch_idx, sel[:, -1]]                                 # (B, E)

    # per-batch sequence [first, unselected..., last], zero-padded to Np rows
    x0 = jnp.concatenate([first[:, None, :], left, last[:, None, :]], axis=1)
    x0 = jnp.pad(x0, ((0, 0), (0, Np - N), (0, 0)))                    # (B, Np, E)

    # attention bias of the current (= last selected) node at unselected columns
    bias_cur = attention_bias.astype(jnp.float32)[batch_idx, sel[:, -1]]   # (B, P)
    bias_unsel = jnp.take_along_axis(bias_cur, unselect, axis=1)           # (B,new_len)
    bias_row = jnp.zeros((B, 1, Np), jnp.float32).at[:, 0, 1:N - 1].set(bias_unsel)

    # ---- weight prep: fold 1/sqrt(D) into Q columns; cast matmul operands -----
    qscale = jnp.concatenate([jnp.full((HD,), float(D) ** -0.5, jnp.float32),
                              jnp.ones((2 * HD,), jnp.float32)])
    wqkv = (params["wqkv"] * qscale).astype(cdt)
    w_first = params["w_first"].astype(cdt)
    w_last = params["w_last"].astype(cdt)
    w_final = params["w_final"].astype(cdt)
    wo = params["wo"].astype(cdt)
    w1 = params["w1"].astype(cdt)
    w2 = params["w2"].astype(cdt)

    # ---- BlockSpecs: activations tiled over batch, weights VMEM-resident ------
    def resident(shape):
        nd = len(shape)
        return pl.BlockSpec(tuple(shape), lambda b, _nd=nd: (0,) * _nd)

    in_specs = [
        pl.BlockSpec((1, Np, E), lambda b: (b, 0, 0)),      # x tile
        pl.BlockSpec((1, 1, Np), lambda b: (b, 0, 0)),      # bias row
        resident(w_first.shape), resident(params["b_first"].shape),
        resident(w_last.shape), resident(params["b_last"].shape),
        resident(wqkv.shape), resident(wo.shape), resident(params["bo"].shape),
        resident(w1.shape), resident(params["b1"].shape),
        resident(w2.shape), resident(params["b2"].shape),
        resident(w_final.shape), resident(params["b_final"].shape),
    ]
    out_specs = pl.BlockSpec((1, 1, Np), lambda b: (b, 0, 0))

    # ---- explicit scoped-VMEM budget (weights + tiles + intermediates) --------
    wbytes = jnp.dtype(cdt).itemsize
    w_elems = (wqkv.size + wo.size + w1.size + w2.size +
               w_first.size + w_last.size + w_final.size)
    b_elems = (params["bo"].size + params["b1"].size + params["b2"].size +
               params["b_first"].size + params["b_last"].size +
               params["b_final"].size)
    weight_bytes = w_elems * wbytes + b_elems * 4
    tile_bytes = (Np * E + 2 * Np) * 4
    interm_bytes = (Np * (3 * HD + HD + F + 4 * E) + 2 * Np * Np + Np * HD) * 4
    est = 2 * weight_bytes + 4 * tile_bytes + interm_bytes
    vmem_limit = int(min(max(2 * est, 32 * 2 ** 20), 100 * 2 ** 20))

    kernel = _make_decoder_kernel(N=N, Np=Np, H=H, D=D, L=L, compute_dtype=cdt)
    probs = pl.pallas_call(
        kernel,
        out_shape=jax.ShapeDtypeStruct((B, 1, Np), jnp.float32),
        grid_spec=pltpu.PrefetchScalarGridSpec(
            num_scalar_prefetch=0,
            grid=(B,),
            in_specs=in_specs,
            out_specs=out_specs,
            scratch_shapes=[pltpu.VMEM((Np, HD), jnp.float32)]),
        compiler_params=pltpu.CompilerParams(
            dimension_semantics=("parallel",),
            vmem_limit_bytes=vmem_limit),
    )(x0, bias_row,
      w_first, params["b_first"], w_last, params["b_last"],
      wqkv, wo, params["bo"], w1, params["b1"], w2, params["b2"],
      w_final, params["b_final"])

    # ---- scatter back to problem-size layout (jittable glue) ------------------
    props = probs[:, 0, 1:N - 1]                                       # (B, new_len)
    new_props = jnp.zeros((B, P), jnp.float32)
    new_props = new_props.at[batch_idx[:, None], sel].set(-2.0)
    new_props = new_props.at[batch_idx[:, None], unselect].set(props)
    return new_props


# ----------------------------------------------------------------------------- #
if __name__ == "__main__":
    model_params = dict(embedding_dim=32, head_num=4, qkv_dim=8,
                        ff_hidden_dim=64, decoder_layer_num=2)
    B, P, S = 2, 10, 4     # -> N = P - S + 2 = 8 real positions (padded to 128)

    key = jax.random.PRNGKey(0)
    k_data, k_bias, k_params = jax.random.split(key, 3)

    data = jax.random.normal(k_data, (B, P, model_params["embedding_dim"]),
                             dtype=jnp.float32)
    attention_bias = 0.1 * jax.random.normal(k_bias, (B, P, P), dtype=jnp.float32)
    selected_node_list = jnp.array([[0, 3, 5, 9], [2, 7, 1, 4]], dtype=jnp.int32)

    params = init_params(k_params, **model_params)

    out = tsp_decoder_forward(params, data, selected_node_list, attention_bias,
                              head_num=model_params["head_num"],
                              qkv_dim=model_params["qkv_dim"])
    jax.block_until_ready(out)
    assert out.shape == (B, P)
    assert bool(jnp.all(jnp.isfinite(out)))
    print("KERNEL_OK")
</pallas_src>

<mosaic_0001>
module attributes {stable_mosaic.version = 11 : i64} {
  func.func @kernel(%arg0: i32, %arg1: memref<1x128x32xf32, #tpu.memory_space<vmem>>, %arg2: memref<1x1x128xf32, #tpu.memory_space<vmem>>, %arg3: memref<32x32xf32, #tpu.memory_space<vmem>>, %arg4: memref<1x32xf32, #tpu.memory_space<vmem>>, %arg5: memref<32x32xf32, #tpu.memory_space<vmem>>, %arg6: memref<1x32xf32, #tpu.memory_space<vmem>>, %arg7: memref<2x32x96xf32, #tpu.memory_space<vmem>>, %arg8: memref<2x32x32xf32, #tpu.memory_space<vmem>>, %arg9: memref<2x1x32xf32, #tpu.memory_space<vmem>>, %arg10: memref<2x32x64xf32, #tpu.memory_space<vmem>>, %arg11: memref<2x1x64xf32, #tpu.memory_space<vmem>>, %arg12: memref<2x64x32xf32, #tpu.memory_space<vmem>>, %arg13: memref<2x1x32xf32, #tpu.memory_space<vmem>>, %arg14: memref<1x32xf32, #tpu.memory_space<vmem>>, %arg15: memref<1x1xf32, #tpu.memory_space<vmem>>, %arg16: memref<1x1x128xf32, #tpu.memory_space<vmem>>, %arg17: memref<128x32xf32, #tpu.memory_space<vmem>>) attributes {dimension_semantics = [#tpu.dimension_semantics<parallel>], iteration_bounds = array<i64: 2>, scalar_prefetch = 0 : i64, scratch_operands = 1 : i64, tpu.core_type = #tpu.core_type<tc>, window_params = [{transform_indices = @transform_0, window_bounds = array<i64: 1, 128, 32>}, {transform_indices = @transform_1, window_bounds = array<i64: 1, 1, 128>}, {pipeline_mode = #tpu.pipeline_mode<synchronous>, transform_indices = @transform_2, window_bounds = array<i64: 32, 32>}, {pipeline_mode = #tpu.pipeline_mode<synchronous>, transform_indices = @transform_3, window_bounds = array<i64: 1, 32>}, {pipeline_mode = #tpu.pipeline_mode<synchronous>, transform_indices = @transform_4, window_bounds = array<i64: 32, 32>}, {pipeline_mode = #tpu.pipeline_mode<synchronous>, transform_indices = @transform_5, window_bounds = array<i64: 1, 32>}, {pipeline_mode = #tpu.pipeline_mode<synchronous>, transform_indices = @transform_6, window_bounds = array<i64: 2, 32, 96>}, {pipeline_mode = #tpu.pipeline_mode<synchronous>, transform_indices = @transform_7, window_bounds = array<i64: 2, 32, 32>}, {pipeline_mode = #tpu.pipeline_mode<synchronous>, transform_indices = @transform_8, window_bounds = array<i64: 2, 1, 32>}, {pipeline_mode = #tpu.pipeline_mode<synchronous>, transform_indices = @transform_9, window_bounds = array<i64: 2, 32, 64>}, {pipeline_mode = #tpu.pipeline_mode<synchronous>, transform_indices = @transform_10, window_bounds = array<i64: 2, 1, 64>}, {pipeline_mode = #tpu.pipeline_mode<synchronous>, transform_indices = @transform_11, window_bounds = array<i64: 2, 64, 32>}, {pipeline_mode = #tpu.pipeline_mode<synchronous>, transform_indices = @transform_12, window_bounds = array<i64: 2, 1, 32>}, {pipeline_mode = #tpu.pipeline_mode<synchronous>, transform_indices = @transform_13, window_bounds = array<i64: 1, 32>}, {pipeline_mode = #tpu.pipeline_mode<synchronous>, transform_indices = @transform_14, window_bounds = array<i64: 1, 1>}, {transform_indices = @transform_15, window_bounds = array<i64: 1, 1, 128>}]} {
    %c0 = arith.constant 0 : index
    %c0_0 = arith.constant 0 : index
    %c0_1 = arith.constant 0 : index
    %0 = vector.load %arg1[%c0, %c0_0, %c0_1] : memref<1x128x32xf32, #tpu.memory_space<vmem>>, vector<1x128x32xf32>
    %1 = vector.shape_cast %0 : vector<1x128x32xf32> to vector<128x32xf32>
    %2 = vector.extract_strided_slice %1 {offsets = [0, 0], sizes = [1, 32], strides = [1, 1]} : vector<128x32xf32> to vector<1x32xf32>
    %c0_2 = arith.constant 0 : index
    %c0_3 = arith.constant 0 : index
    %3 = vector.load %arg3[%c0_2, %c0_3] : memref<32x32xf32, #tpu.memory_space<vmem>>, vector<32x32xf32>
    %cst = arith.constant dense<0.000000e+00> : vector<1x32xf32>
    %4 = tpu.matmul %2, %3, %cst {dimension_numbers = #tpu.dot_dimension_numbers<[1], [0], [0], [1], [0, 0, 1, 1], [], []>} : vector<1x32xf32>, vector<32x32xf32>, vector<1x32xf32> -> vector<1x32xf32>
    %c0_4 = arith.constant 0 : index
    %c0_5 = arith.constant 0 : index
    %5 = vector.load %arg4[%c0_4, %c0_5] : memref<1x32xf32, #tpu.memory_space<vmem>>, vector<1x32xf32>
    %6 = arith.addf %4, %5 : vector<1x32xf32>
    %7 = vector.extract_strided_slice %1 {offsets = [7, 0], sizes = [1, 32], strides = [1, 1]} : vector<128x32xf32> to vector<1x32xf32>
    %c0_6 = arith.constant 0 : index
    %c0_7 = arith.constant 0 : index
    %8 = vector.load %arg5[%c0_6, %c0_7] : memref<32x32xf32, #tpu.memory_space<vmem>>, vector<32x32xf32>
    %cst_8 = arith.constant dense<0.000000e+00> : vector<1x32xf32>
    %9 = tpu.matmul %7, %8, %cst_8 {dimension_numbers = #tpu.dot_dimension_numbers<[1], [0], [0], [1], [0, 0, 1, 1], [], []>} : vector<1x32xf32>, vector<32x32xf32>, vector<1x32xf32> -> vector<1x32xf32>
    %c0_9 = arith.constant 0 : index
    %c0_10 = arith.constant 0 : index
    %10 = vector.load %arg6[%c0_9, %c0_10] : memref<1x32xf32, #tpu.memory_space<vmem>>, vector<1x32xf32>
    %11 = arith.addf %9, %10 : vector<1x32xf32>
    %12 = tpu.iota {dimensions = array<i32: 0>} : vector<128x1xi32>
    %c0_i32 = arith.constant 0 : i32
    %13 = vector.broadcast %c0_i32 : i32 to vector<128x1xi32>
    %14 = arith.cmpi eq, %12, %13 : vector<128x1xi32>
    %15 = arith.extui %14 : vector<128x1xi1> to vector<128x1xi32>
    %16 = arith.sitofp %15 : vector<128x1xi32> to vector<128x1xf32>
    %c7_i32 = arith.constant 7 : i32
    %17 = vector.broadcast %c7_i32 : i32 to vector<128x1xi32>
    %18 = arith.cmpi eq, %12, %17 : vector<128x1xi32>
    %19 = arith.extui %18 : vector<128x1xi1> to vector<128x1xi32>
    %20 = arith.sitofp %19 : vector<128x1xi32> to vector<128x1xf32>
    %cst_11 = arith.constant 1.000000e+00 : f32
    %21 = vector.broadcast %cst_11 : f32 to vector<128x1xf32>
    %22 = arith.subf %21, %16 : vector<128x1xf32>
    %23 = arith.subf %22, %20 : vector<128x1xf32>
    %24 = vector.broadcast %23 : vector<128x1xf32> to vector<128x32xf32>
    %25 = arith.mulf %24, %1 : vector<128x32xf32>
    %26 = vector.broadcast %16 : vector<128x1xf32> to vector<128x32xf32>
    %27 = vector.broadcast %6 : vector<1x32xf32> to vector<128x32xf32>
    %28 = arith.mulf %26, %27 : vector<128x32xf32>
    %29 = arith.addf %25, %28 : vector<128x32xf32>
    %30 = vector.broadcast %20 : vector<128x1xf32> to vector<128x32xf32>
    %31 = vector.broadcast %11 : vector<1x32xf32> to vector<128x32xf32>
    %32 = arith.mulf %30, %31 : vector<128x32xf32>
    %33 = arith.addf %29, %32 : vector<128x32xf32>
    %34 = tpu.iota {dimensions = array<i32: 1>} : vector<128x128xi32>
    %c8_i32 = arith.constant 8 : i32
    %35 = vector.broadcast %c8_i32 : i32 to vector<128x128xi32>
    %36 = arith.cmpi sge, %34, %35 : vector<128x128xi32>
    %c0_i32_12 = arith.constant 0 : i32
    %c2_i32 = arith.constant 2 : i32
    %37 = arith.addi %c0_i32_12, %c2_i32 : i32
    %c1_i32 = arith.constant 1 : i32
    %38 = scf.for %arg18 = %c0_i32_12 to %37 step %c1_i32 iter_args(%arg19 = %33) -> (vector<128x32xf32>)  : i32 {
      %73 = arith.index_cast %arg18 : i32 to index
      %c0_32 = arith.constant 0 : index
      %c0_33 = arith.constant 0 : index
      %74 = vector.load %arg7[%73, %c0_32, %c0_33] : memref<2x32x96xf32, #tpu.memory_space<vmem>>, vector<1x32x96xf32>
      %75 = vector.shape_cast %74 : vector<1x32x96xf32> to vector<32x96xf32>
      %cst_34 = arith.constant dense<0.000000e+00> : vector<128x96xf32>
      %76 = tpu.matmul %arg19, %75, %cst_34 {dimension_numbers = #tpu.dot_dimension_numbers<[1], [0], [0], [1], [0, 0, 1, 1], [], []>} : vector<128x32xf32>, vector<32x96xf32>, vector<128x96xf32> -> vector<128x96xf32>
      %77 = vector.extract_strided_slice %76 {offsets = [0, 0], sizes = [128, 8], strides = [1, 1]} : vector<128x96xf32> to vector<128x8xf32>
      %78 = vector.extract_strided_slice %76 {offsets = [0, 32], sizes = [128, 8], strides = [1, 1]} : vector<128x96xf32> to vector<128x8xf32>
      %79 = vector.extract_strided_slice %76 {offsets = [0, 64], sizes = [128, 8], strides = [1, 1]} : vector<128x96xf32> to vector<128x8xf32>
      %cst_35 = arith.constant dense<0.000000e+00> : vector<128x128xf32>
      %80 = tpu.matmul %77, %78, %cst_35 {dimension_numbers = #tpu.dot_dimension_numbers<[1], [1], [0], [0], [0, 0, 1, 0], [], []>} : vector<128x8xf32>, vector<128x8xf32>, vector<128x128xf32> -> vector<128x128xf32>
      %cst_36 = arith.constant -1.000000e+30 : f32
      %81 = vector.broadcast %cst_36 : f32 to vector<128x128xf32>
      %82 = arith.select %36, %81, %80 : vector<128x128xi1>, vector<128x128xf32>
      %cst_37 = arith.constant dense<0xFF800000> : vector<128xf32>
      %83 = vector.multi_reduction <maximumf>, %82, %cst_37 [1] : vector<128x128xf32> to vector<128xf32>
      %84 = vector.shape_cast %83 : vector<128xf32> to vector<128x1xf32>
      %85 = vector.broadcast %84 : vector<128x1xf32> to vector<128x128xf32>
      %86 = arith.subf %82, %85 : vector<128x128xf32>
      %87 = math.exp %86 : vector<128x128xf32>
      %cst_38 = arith.constant dense<0.000000e+00> : vector<128xf32>
      %88 = vector.multi_reduction <add>, %87, %cst_38 [1] : vector<128x128xf32> to vector<128xf32>
      %89 = vector.shape_cast %88 : vector<128xf32> to vector<128x1xf32>
      %90 = tpu.reciprocal %89 {approx = true} : vector<128x1xf32> -> vector<128x1xf32>
      %91 = vector.broadcast %90 : vector<128x1xf32> to vector<128x128xf32>
      %92 = arith.mulf %87, %91 : vector<128x128xf32>
      %cst_39 = arith.constant dense<0.000000e+00> : vector<128x8xf32>
      %93 = tpu.matmul %92, %79, %cst_39 {dimension_numbers = #tpu.dot_dimension_numbers<[1], [0], [0], [1], [0, 0, 1, 1], [], []>} : vector<128x128xf32>, vector<128x8xf32>, vector<128x8xf32> -> vector<128x8xf32>
      %c0_40 = arith.constant 0 : index
      %c0_41 = arith.constant 0 : index
      %94 = vector.load %arg17[%c0_40, %c0_41] : memref<128x32xf32, #tpu.memory_space<vmem>>, vector<128x8xf32>
      tpu.vector_store %arg17[%c0_40, %c0_41], %93 {strides = array<i32>} : memref<128x32xf32, #tpu.memory_space<vmem>>, vector<128x8xf32>,
      %95 = vector.extract_strided_slice %76 {offsets = [0, 8], sizes = [128, 8], strides = [1, 1]} : vector<128x96xf32> to vector<128x8xf32>
      %96 = vector.extract_strided_slice %76 {offsets = [0, 40], sizes = [128, 8], strides = [1, 1]} : vector<128x96xf32> to vector<128x8xf32>
      %97 = vector.extract_strided_slice %76 {offsets = [0, 72], sizes = [128, 8], strides = [1, 1]} : vector<128x96xf32> to vector<128x8xf32>
      %cst_42 = arith.constant dense<0.000000e+00> : vector<128x128xf32>
      %98 = tpu.matmul %95, %96, %cst_42 {dimension_numbers = #tpu.dot_dimension_numbers<[1], [1], [0], [0], [0, 0, 1, 0], [], []>} : vector<128x8xf32>, vector<128x8xf32>, vector<128x128xf32> -> vector<128x128xf32>
      %cst_43 = arith.constant -1.000000e+30 : f32
      %99 = vector.broadcast %cst_43 : f32 to vector<128x128xf32>
      %100 = arith.select %36, %99, %98 : vector<128x128xi1>, vector<128x128xf32>
      %cst_44 = arith.constant dense<0xFF800000> : vector<128xf32>
      %101 = vector.multi_reduction <maximumf>, %100, %cst_44 [1] : vector<128x128xf32> to vector<128xf32>
      %102 = vector.shape_cast %101 : vector<128xf32> to vector<128x1xf32>
      %103 = vector.broadcast %102 : vector<128x1xf32> to vector<128x128xf32>
      %104 = arith.subf %100, %103 : vector<128x128xf32>
      %105 = math.exp %104 : vector<128x128xf32>
      %cst_45 = arith.constant dense<0.000000e+00> : vector<128xf32>
      %106 = vector.multi_reduction <add>, %105, %cst_45 [1] : vector<128x128xf32> to vector<128xf32>
      %107 = vector.shape_cast %106 : vector<128xf32> to vector<128x1xf32>
      %108 = tpu.reciprocal %107 {approx = true} : vector<128x1xf32> -> vector<128x1xf32>
      %109 = vector.broadcast %108 : vector<128x1xf32> to vector<128x128xf32>
      %110 = arith.mulf %105, %109 : vector<128x128xf32>
      %cst_46 = arith.constant dense<0.000000e+00> : vector<128x8xf32>
      %111 = tpu.matmul %110, %97, %cst_46 {dimension_numbers = #tpu.dot_dimension_numbers<[1], [0], [0], [1], [0, 0, 1, 1], [], []>} : vector<128x128xf32>, vector<128x8xf32>, vector<128x8xf32> -> vector<128x8xf32>
      %c0_47 = arith.constant 0 : index
      %c8 = arith.constant 8 : index
      %112 = vector.load %arg17[%c0_47, %c8] : memref<128x32xf32, #tpu.memory_space<vmem>>, vector<128x8xf32>
      tpu.vector_store %arg17[%c0_47, %c8], %111 {strides = array<i32>} : memref<128x32xf32, #tpu.memory_space<vmem>>, vector<128x8xf32>,
      %113 = vector.extract_strided_slice %76 {offsets = [0, 16], sizes = [128, 8], strides = [1, 1]} : vector<128x96xf32> to vector<128x8xf32>
      %114 = vector.extract_strided_slice %76 {offsets = [0, 48], sizes = [128, 8], strides = [1, 1]} : vector<128x96xf32> to vector<128x8xf32>
      %115 = vector.extract_strided_slice %76 {offsets = [0, 80], sizes = [128, 8], strides = [1, 1]} : vector<128x96xf32> to vector<128x8xf32>
      %cst_48 = arith.constant dense<0.000000e+00> : vector<128x128xf32>
      %116 = tpu.matmul %113, %114, %cst_48 {dimension_numbers = #tpu.dot_dimension_numbers<[1], [1], [0], [0], [0, 0, 1, 0], [], []>} : vector<128x8xf32>, vector<128x8xf32>, vector<128x128xf32> -> vector<128x128xf32>
      %cst_49 = arith.constant -1.000000e+30 : f32
      %117 = vector.broadcast %cst_49 : f32 to vector<128x128xf32>
      %118 = arith.select %36, %117, %116 : vector<128x128xi1>, vector<128x128xf32>
      %cst_50 = arith.constant dense<0xFF800000> : vector<128xf32>
      %119 = vector.multi_reduction <maximumf>, %118, %cst_50 [1] : vector<128x128xf32> to vector<128xf32>
      %120 = vector.shape_cast %119 : vector<128xf32> to vector<128x1xf32>
      %121 = vector.broadcast %120 : vector<128x1xf32> to vector<128x128xf32>
      %122 = arith.subf %118, %121 : vector<128x128xf32>
      %123 = math.exp %122 : vector<128x128xf32>
      %cst_51 = arith.constant dense<0.000000e+00> : vector<128xf32>
      %124 = vector.multi_reduction <add>, %123, %cst_51 [1] : vector<128x128xf32> to vector<128xf32>
      %125 = vector.shape_cast %124 : vector<128xf32> to vector<128x1xf32>
      %126 = tpu.reciprocal %125 {approx = true} : vector<128x1xf32> -> vector<128x1xf32>
      %127 = vector.broadcast %126 : vector<128x1xf32> to vector<128x128xf32>
      %128 = arith.mulf %123, %127 : vector<128x128xf32>
      %cst_52 = arith.constant dense<0.000000e+00> : vector<128x8xf32>
      %129 = tpu.matmul %128, %115, %cst_52 {dimension_numbers = #tpu.dot_dimension_numbers<[1], [0], [0], [1], [0, 0, 1, 1], [], []>} : vector<128x128xf32>, vector<128x8xf32>, vector<128x8xf32> -> vector<128x8xf32>
      %c0_53 = arith.constant 0 : index
      %c16 = arith.constant 16 : index
      %130 = vector.load %arg17[%c0_53, %c16] : memref<128x32xf32, #tpu.memory_space<vmem>>, vector<128x8xf32>
      tpu.vector_store %arg17[%c0_53, %c16], %129 {strides = array<i32>} : memref<128x32xf32, #tpu.memory_space<vmem>>, vector<128x8xf32>,
      %131 = vector.extract_strided_slice %76 {offsets = [0, 24], sizes = [128, 8], strides = [1, 1]} : vector<128x96xf32> to vector<128x8xf32>
      %132 = vector.extract_strided_slice %76 {offsets = [0, 56], sizes = [128, 8], strides = [1, 1]} : vector<128x96xf32> to vector<128x8xf32>
      %133 = vector.extract_strided_slice %76 {offsets = [0, 88], sizes = [128, 8], strides = [1, 1]} : vector<128x96xf32> to vector<128x8xf32>
      %cst_54 = arith.constant dense<0.000000e+00> : vector<128x128xf32>
      %134 = tpu.matmul %131, %132, %cst_54 {dimension_numbers = #tpu.dot_dimension_numbers<[1], [1], [0], [0], [0, 0, 1, 0], [], []>} : vector<128x8xf32>, vector<128x8xf32>, vector<128x128xf32> -> vector<128x128xf32>
      %cst_55 = arith.constant -1.000000e+30 : f32
      %135 = vector.broadcast %cst_55 : f32 to vector<128x128xf32>
      %136 = arith.select %36, %135, %134 : vector<128x128xi1>, vector<128x128xf32>
      %cst_56 = arith.constant dense<0xFF800000> : vector<128xf32>
      %137 = vector.multi_reduction <maximumf>, %136, %cst_56 [1] : vector<128x128xf32> to vector<128xf32>
      %138 = vector.shape_cast %137 : vector<128xf32> to vector<128x1xf32>
      %139 = vector.broadcast %138 : vector<128x1xf32> to vector<128x128xf32>
      %140 = arith.subf %136, %139 : vector<128x128xf32>
      %141 = math.exp %140 : vector<128x128xf32>
      %cst_57 = arith.constant dense<0.000000e+00> : vector<128xf32>
      %142 = vector.multi_reduction <add>, %141, %cst_57 [1] : vector<128x128xf32> to vector<128xf32>
      %143 = vector.shape_cast %142 : vector<128xf32> to vector<128x1xf32>
      %144 = tpu.reciprocal %143 {approx = true} : vector<128x1xf32> -> vector<128x1xf32>
      %145 = vector.broadcast %144 : vector<128x1xf32> to vector<128x128xf32>
      %146 = arith.mulf %141, %145 : vector<128x128xf32>
      %cst_58 = arith.constant dense<0.000000e+00> : vector<128x8xf32>
      %147 = tpu.matmul %146, %133, %cst_58 {dimension_numbers = #tpu.dot_dimension_numbers<[1], [0], [0], [1], [0, 0, 1, 1], [], []>} : vector<128x128xf32>, vector<128x8xf32>, vector<128x8xf32> -> vector<128x8xf32>
      %c0_59 = arith.constant 0 : index
      %c24 = arith.constant 24 : index
      %148 = vector.load %arg17[%c0_59, %c24] : memref<128x32xf32, #tpu.memory_space<vmem>>, vector<128x8xf32>
      tpu.vector_store %arg17[%c0_59, %c24], %147 {strides = array<i32>} : memref<128x32xf32, #tpu.memory_space<vmem>>, vector<128x8xf32>,
      %c0_60 = arith.constant 0 : index
      %c0_61 = arith.constant 0 : index
      %149 = vector.load %arg17[%c0_60, %c0_61] : memref<128x32xf32, #tpu.memory_space<vmem>>, vector<128x32xf32>
      %150 = arith.index_cast %arg18 : i32 to index
      %c0_62 = arith.constant 0 : index
      %c0_63 = arith.constant 0 : index
      %151 = vector.load %arg8[%150, %c0_62, %c0_63] : memref<2x32x32xf32, #tpu.memory_space<vmem>>, vector<1x32x32xf32>
      %152 = vector.shape_cast %151 : vector<1x32x32xf32> to vector<32x32xf32>
      %cst_64 = arith.constant dense<0.000000e+00> : vector<128x32xf32>
      %153 = tpu.matmul %149, %152, %cst_64 {dimension_numbers = #tpu.dot_dimension_numbers<[1], [0], [0], [1], [0, 0, 1, 1], [], []>} : vector<128x32xf32>, vector<32x32xf32>, vector<128x32xf32> -> vector<128x32xf32>
      %154 = arith.index_cast %arg18 : i32 to index
      %c0_65 = arith.constant 0 : index
      %c0_66 = arith.constant 0 : index
      %155 = vector.load %arg9[%154, %c0_65, %c0_66] : memref<2x1x32xf32, #tpu.memory_space<vmem>>, vector<1x1x32xf32>
      %156 = vector.shape_cast %155 : vector<1x1x32xf32> to vector<1x32xf32>
      %157 = vector.broadcast %156 : vector<1x32xf32> to vector<128x32xf32>
      %158 = arith.addf %153, %157 : vector<128x32xf32>
      %159 = arith.addf %arg19, %158 : vector<128x32xf32>
      %160 = arith.index_cast %arg18 : i32 to index
      %c0_67 = arith.constant 0 : index
      %c0_68 = arith.constant 0 : index
      %161 = vector.load %arg10[%160, %c0_67, %c0_68] : memref<2x32x64xf32, #tpu.memory_space<vmem>>, vector<1x32x64xf32>
      %162 = vector.shape_cast %161 : vector<1x32x64xf32> to vector<32x64xf32>
      %cst_69 = arith.constant dense<0.000000e+00> : vector<128x64xf32>
      %163 = tpu.matmul %159, %162, %cst_69 {dimension_numbers = #tpu.dot_dimension_numbers<[1], [0], [0], [1], [0, 0, 1, 1], [], []>} : vector<128x32xf32>, vector<32x64xf32>, vector<128x64xf32> -> vector<128x64xf32>
      %164 = arith.index_cast %arg18 : i32 to index
      %c0_70 = arith.constant 0 : index
      %c0_71 = arith.constant 0 : index
      %165 = vector.load %arg11[%164, %c0_70, %c0_71] : memref<2x1x64xf32, #tpu.memory_space<vmem>>, vector<1x1x64xf32>
      %166 = vector.shape_cast %165 : vector<1x1x64xf32> to vector<1x64xf32>
      %167 = vector.broadcast %166 : vector<1x64xf32> to vector<128x64xf32>
      %168 = arith.addf %163, %167 : vector<128x64xf32>
      %cst_72 = arith.constant 0.000000e+00 : f32
      %169 = vector.broadcast %cst_72 : f32 to vector<128x64xf32>
      %170 = arith.maximumf %168, %169 : vector<128x64xf32>
      %171 = arith.index_cast %arg18 : i32 to index
      %c0_73 = arith.constant 0 : index
      %c0_74 = arith.constant 0 : index
      %172 = vector.load %arg12[%171, %c0_73, %c0_74] : memref<2x64x32xf32, #tpu.memory_space<vmem>>, vector<1x64x32xf32>
      %173 = vector.shape_cast %172 : vector<1x64x32xf32> to vector<64x32xf32>
      %cst_75 = arith.constant dense<0.000000e+00> : vector<128x32xf32>
      %174 = tpu.matmul %170, %173, %cst_75 {dimension_numbers = #tpu.dot_dimension_numbers<[1], [0], [0], [1], [0, 0, 1, 1], [], []>} : vector<128x64xf32>, vector<64x32xf32>, vector<128x32xf32> -> vector<128x32xf32>
      %175 = arith.index_cast %arg18 : i32 to index
      %c0_76 = arith.constant 0 : index
      %c0_77 = arith.constant 0 : index
      %176 = vector.load %arg13[%175, %c0_76, %c0_77] : memref<2x1x32xf32, #tpu.memory_space<vmem>>, vector<1x1x32xf32>
      %177 = vector.shape_cast %176 : vector<1x1x32xf32> to vector<1x32xf32>
      %178 = vector.broadcast %177 : vector<1x32xf32> to vector<128x32xf32>
      %179 = arith.addf %174, %178 : vector<128x32xf32>
      %180 = arith.addf %159, %179 : vector<128x32xf32>
      scf.yield %180 : vector<128x32xf32>
    }
    %c2_i32_13 = arith.constant 2 : i32
    %c0_14 = arith.constant 0 : index
    %c0_15 = arith.constant 0 : index
    %39 = vector.load %arg14[%c0_14, %c0_15] : memref<1x32xf32, #tpu.memory_space<vmem>>, vector<1x32xf32>
    %cst_16 = arith.constant dense<0.000000e+00> : vector<1x128xf32>
    %40 = tpu.matmul %39, %38, %cst_16 {dimension_numbers = #tpu.dot_dimension_numbers<[1], [1], [0], [0], [0, 0, 1, 0], [], []>} : vector<1x32xf32>, vector<128x32xf32>, vector<1x128xf32> -> vector<1x128xf32>
    %c0_17 = arith.constant 0 : index
    %c0_18 = arith.constant 0 : index
    %41 = vector.load %arg15[%c0_17, %c0_18] : memref<1x1xf32, #tpu.memory_space<vmem>>, vector<1x1xf32>
    %42 = vector.broadcast %41 : vector<1x1xf32> to vector<1x128xf32>
    %43 = arith.addf %40, %42 : vector<1x128xf32>
    %c0_19 = arith.constant 0 : index
    %c0_20 = arith.constant 0 : index
    %c0_21 = arith.constant 0 : index
    %44 = vector.load %arg2[%c0_19, %c0_20, %c0_21] : memref<1x1x128xf32, #tpu.memory_space<vmem>>, vector<1x1x128xf32>
    %45 = vector.shape_cast %44 : vector<1x1x128xf32> to vector<1x128xf32>
    %46 = arith.addf %43, %45 : vector<1x128xf32>
    %47 = tpu.iota {dimensions = array<i32: 1>} : vector<1x128xi32>
    %c0_i32_22 = arith.constant 0 : i32
    %48 = vector.broadcast %c0_i32_22 : i32 to vector<1x128xi32>
    %49 = arith.cmpi eq, %47, %48 : vector<1x128xi32>
    %c7_i32_23 = arith.constant 7 : i32
    %50 = vector.broadcast %c7_i32_23 : i32 to vector<1x128xi32>
    %51 = arith.cmpi sge, %47, %50 : vector<1x128xi32>
    %52 = arith.ori %49, %51 : vector<1x128xi1>
    %cst_24 = arith.constant 0xFF800000 : f32
    %53 = vector.broadcast %cst_24 : f32 to vector<1x128xf32>
    %54 = arith.select %52, %53, %46 : vector<1x128xi1>, vector<1x128xf32>
    %cst_25 = arith.constant dense<0xFF800000> : vector<1xf32>
    %55 = vector.multi_reduction <maximumf>, %54, %cst_25 [1] : vector<1x128xf32> to vector<1xf32>
    %56 = vector.shape_cast %55 : vector<1xf32> to vector<1x1xf32>
    %57 = vector.broadcast %56 : vector<1x1xf32> to vector<1x128xf32>
    %58 = arith.subf %54, %57 : vector<1x128xf32>
    %59 = math.exp %58 : vector<1x128xf32>
    %cst_26 = arith.constant dense<0.000000e+00> : vector<1xf32>
    %60 = vector.multi_reduction <add>, %59, %cst_26 [1] : vector<1x128xf32> to vector<1xf32>
    %61 = vector.shape_cast %60 : vector<1xf32> to vector<1x1xf32>
    %62 = tpu.reciprocal %61 {approx = true} : vector<1x1xf32> -> vector<1x1xf32>
    %63 = vector.broadcast %62 : vector<1x1xf32> to vector<1x128xf32>
    %64 = arith.mulf %59, %63 : vector<1x128xf32>
    %cst_27 = arith.constant 9.99999974E-6 : f32
    %65 = vector.broadcast %cst_27 : f32 to vector<1x128xf32>
    %66 = arith.cmpf ole, %64, %65 : vector<1x128xf32>
    %cst_28 = arith.constant 1.000000e-07 : f32
    %67 = vector.broadcast %cst_28 : f32 to vector<1x128xf32>
    %68 = arith.addf %64, %67 : vector<1x128xf32>
    %69 = arith.select %66, %68, %64 : vector<1x128xi1>, vector<1x128xf32>
    %c0_29 = arith.constant 0 : index
    %c0_30 = arith.constant 0 : index
    %c0_31 = arith.constant 0 : index
    %70 = vector.load %arg16[%c0_29, %c0_30, %c0_31] : memref<1x1x128xf32, #tpu.memory_space<vmem>>, vector<1x1x128xf32>
    %71 = vector.shape_cast %70 : vector<1x1x128xf32> to vector<1x128xf32>
    %72 = vector.shape_cast %69 : vector<1x128xf32> to vector<1x1x128xf32>
    tpu.vector_store %arg16[%c0_29, %c0_30, %c0_31], %72 {strides = array<i32>} : memref<1x1x128xf32, #tpu.memory_space<vmem>>, vector<1x1x128xf32>,
    return
  }
  func.func @transform_0(%arg0: i32) -> (i32, i32, i32) {
    %c0_i32 = arith.constant 0 : i32
    %c0_i32_0 = arith.constant 0 : i32
    %c0_i32_1 = arith.constant 0 : i32
    return %arg0, %c0_i32, %c0_i32_0 : i32, i32, i32
  }
  func.func @transform_1(%arg0: i32) -> (i32, i32, i32) {
    %c0_i32 = arith.constant 0 : i32
    %c0_i32_0 = arith.constant 0 : i32
    %c0_i32_1 = arith.constant 0 : i32
    return %arg0, %c0_i32, %c0_i32_0 : i32, i32, i32
  }
  func.func @transform_2(%arg0: i32) -> (i32, i32) {
    %c0_i32 = arith.constant 0 : i32
    %c0_i32_0 = arith.constant 0 : i32
    %c0_i32_1 = arith.constant 0 : i32
    return %c0_i32, %c0_i32_0 : i32, i32
  }
  func.func @transform_3(%arg0: i32) -> (i32, i32) {
    %c0_i32 = arith.constant 0 : i32
    %c0_i32_0 = arith.constant 0 : i32
    %c0_i32_1 = arith.constant 0 : i32
    return %c0_i32, %c0_i32_0 : i32, i32
  }
  func.func @transform_4(%arg0: i32) -> (i32, i32) {
    %c0_i32 = arith.constant 0 : i32
    %c0_i32_0 = arith.constant 0 : i32
    %c0_i32_1 = arith.constant 0 : i32
    return %c0_i32, %c0_i32_0 : i32, i32
  }
  func.func @transform_5(%arg0: i32) -> (i32, i32) {
    %c0_i32 = arith.constant 0 : i32
    %c0_i32_0 = arith.constant 0 : i32
    %c0_i32_1 = arith.constant 0 : i32
    return %c0_i32, %c0_i32_0 : i32, i32
  }
  func.func @transform_6(%arg0: i32) -> (i32, i32, i32) {
    %c0_i32 = arith.constant 0 : i32
    %c0_i32_0 = arith.constant 0 : i32
    %c0_i32_1 = arith.constant 0 : i32
    %c0_i32_2 = arith.constant 0 : i32
    return %c0_i32, %c0_i32_0, %c0_i32_1 : i32, i32, i32
  }
  func.func @transform_7(%arg0: i32) -> (i32, i32, i32) {
    %c0_i32 = arith.constant 0 : i32
    %c0_i32_0 = arith.constant 0 : i32
    %c0_i32_1 = arith.constant 0 : i32
    %c0_i32_2 = arith.constant 0 : i32
    return %c0_i32, %c0_i32_0, %c0_i32_1 : i32, i32, i32
  }
  func.func @transform_8(%arg0: i32) -> (i32, i32, i32) {
    %c0_i32 = arith.constant 0 : i32
    %c0_i32_0 = arith.constant 0 : i32
    %c0_i32_1 = arith.constant 0 : i32
    %c0_i32_2 = arith.constant 0 : i32
    return %c0_i32, %c0_i32_0, %c0_i32_1 : i32, i32, i32
  }
  func.func @transform_9(%arg0: i32) -> (i32, i32, i32) {
    %c0_i32 = arith.constant 0 : i32
    %c0_i32_0 = arith.constant 0 : i32
    %c0_i32_1 = arith.constant 0 : i32
    %c0_i32_2 = arith.constant 0 : i32
    return %c0_i32, %c0_i32_0, %c0_i32_1 : i32, i32, i32
  }
  func.func @transform_10(%arg0: i32) -> (i32, i32, i32) {
    %c0_i32 = arith.constant 0 : i32
    %c0_i32_0 = arith.constant 0 : i32
    %c0_i32_1 = arith.constant 0 : i32
    %c0_i32_2 = arith.constant 0 : i32
    return %c0_i32, %c0_i32_0, %c0_i32_1 : i32, i32, i32
  }
  func.func @transform_11(%arg0: i32) -> (i32, i32, i32) {
    %c0_i32 = arith.constant 0 : i32
    %c0_i32_0 = arith.constant 0 : i32
    %c0_i32_1 = arith.constant 0 : i32
    %c0_i32_2 = arith.constant 0 : i32
    return %c0_i32, %c0_i32_0, %c0_i32_1 : i32, i32, i32
  }
  func.func @transform_12(%arg0: i32) -> (i32, i32, i32) {
    %c0_i32 = arith.constant 0 : i32
    %c0_i32_0 = arith.constant 0 : i32
    %c0_i32_1 = arith.constant 0 : i32
    %c0_i32_2 = arith.constant 0 : i32
    return %c0_i32, %c0_i32_0, %c0_i32_1 : i32, i32, i32
  }
  func.func @transform_13(%arg0: i32) -> (i32, i32) {
    %c0_i32 = arith.constant 0 : i32
    %c0_i32_0 = arith.constant 0 : i32
    %c0_i32_1 = arith.constant 0 : i32
    return %c0_i32, %c0_i32_0 : i32, i32
  }
  func.func @transform_14(%arg0: i32) -> (i32, i32) {
    %c0_i32 = arith.constant 0 : i32
    %c0_i32_0 = arith.constant 0 : i32
    %c0_i32_1 = arith.constant 0 : i32
    return %c0_i32, %c0_i32_0 : i32, i32
  }
  func.func @transform_15(%arg0: i32) -> (i32, i32, i32) {
    %c0_i32 = arith.constant 0 : i32
    %c0_i32_0 = arith.constant 0 : i32
    %c0_i32_1 = arith.constant 0 : i32
    return %arg0, %c0_i32, %c0_i32_0 : i32, i32, i32
  }
}

</mosaic_0001>

<bundles_post_ra>
// kernel: tsp_decoder_forward.1
= control target key start
LH: loop header
LB: loop body
LE: loop exit
PB: predicated region body
PF: predicated region fallthrough
CT: control target
= control target key end

     0   :  { %s7491_s20 = smov 0   ;;  %s9290_s0 = inlined_call_operand.vmem [shape: f32[2,128,32], index: 0, kind: input, shape index: {}]   ;;  %s9291_s1 = inlined_call_operand.vmem [shape: f32[2,1,128], index: 1, kind: input, shape index: {}]   ;;  %s9292_s2 = inlined_call_operand.vmem [shape: f32[32,32], index: 2, kind: input, shape index: {}]   ;;  %s9293_s3 = inlined_call_operand.vmem [shape: f32[1,32], index: 3, kind: input, shape index: {}]   ;;  %s9294_s4 = inlined_call_operand.vmem [shape: f32[32,32], index: 4, kind: input, shape index: {}]   ;;  %s9295_s5 = inlined_call_operand.vmem [shape: f32[1,32], index: 5, kind: input, shape index: {}]   ;;  %s9296_s6 = inlined_call_operand.vmem [shape: f32[2,32,96], index: 6, kind: input, shape index: {}]   ;;  %s9297_s7 = inlined_call_operand.vmem [shape: f32[2,32,32], index: 7, kind: input, shape index: {}]   ;;  %s9298_s8 = inlined_call_operand.vmem [shape: f32[2,1,32], index: 8, kind: input, shape index: {}]   ;;  %s9299_s9 = inlined_call_operand.vmem [shape: f32[2,32,64], index: 9, kind: input, shape index: {}]   ;;  %s9300_s10 = inlined_call_operand.vmem [shape: f32[2,1,64], index: 10, kind: input, shape index: {}]   ;;  %s9301_s11 = inlined_call_operand.vmem [shape: f32[2,64,32], index: 11, kind: input, shape index: {}]   ;;  %s9302_s12 = inlined_call_operand.vmem [shape: f32[2,1,32], index: 12, kind: input, shape index: {}]   ;;  %s9303_s13 = inlined_call_operand.vmem [shape: f32[1,32], index: 13, kind: input, shape index: {}]   ;;  %s9304_s14 = inlined_call_operand.<no memory space> [shape: f32[1,1], index: 14, kind: input, shape index: {}]   ;;  %s9305_s15 = inlined_call_operand.vmem [shape: f32[2,1,128], index: 15, kind: output, shape index: {}]  }
   0x1   :  { %v20_v0 = vstv %s9304_s14 }
   0x2   :  { %21 = vst [vmem:[#allocation3] sm:$0x1] %v20_v0 }
   0x3 LB: > { %s4847_s21 = sadd.s32 4294967295, %s7320_s20   ;;  %p4851_p0 = scmp.ge.s32.totalorder %s7320_s20, 1  ;;  %s7320_s20 = sphi %s7491_s20, %s27_s20  }
   0x4   : > { %p447_p1 = scmp.lt.s32.totalorder %s7320_s20, 3 }
   0x6   : > { %p448_p2 = pnand %p4851_p0, %p447_p1 }
   0x8   : > { %451 = sbr.rel (%p448_p2) target bundleno = 4775 (0x12a7), region = 80 }
   0xf   : > { %v523_v1 = vld [vmem:[%s9292_s2] sm:$0xff]  ;;  %v524_v2 = vld [vmem:[%s9292_s2 + $0x8] sm:$0xff]  ;;  %v9307_v4 = vmov 0.0|0.0   ;;  %v525_v7 = vld [vmem:[%s9292_s2 + $0x10] sm:$0xff]  ;;  %p496_p3 = scmp.lt.s32.totalorder %s4847_s21, 1  ;;  %vm7391_vm0 = vmmov 0   ;;  %v680_v17 = vlaneseq }
  0x10   : > { %v602_v3 = vld [vmem:[%s9294_s4] sm:$0xff]  ;;  %6083 = vmatprep.subr.bf16.mxu0 %v9307_v4  ;;  %v6084_v5 = vpack.c.bf16 %v524_v2, %v523_v1  ;;  %6089 = vmatprep.subr.bf16.mxu1 %v9307_v4  ;;  %v603_v6 = vld [vmem:[%s9294_s4 + $0x8] sm:$0xff]  ;;  %v526_v8 = vld [vmem:[%s9292_s2 + $0x18] sm:$0xff]  ;;  %v9306_v12 = vmov 0.0   ;;  %vm528_vm1 = vcmask 261120  }
  0x11   : > { %v6090_v9 = vpack.c.bf16 %v603_v6, %v602_v3  ;;  %v604_v10 = vld [vmem:[%s9294_s4 + $0x10] sm:$0xff]  ;;  %v605_v11 = vld [vmem:[%s9294_s4 + $0x18] sm:$0xff]  ;;  %5450 = vmatprep.mubr.msk.f32.mxu0 %vm7391_vm0, %v9306_v12  ;;  %5461 = vmatprep.mubr.msk.f32.mxu1 %vm7391_vm0, %v9306_v12  ;;  %v6087_v13 = vpack.c.bf16 %v526_v8, %v525_v7  ;;  %s9415_s21 = smov (!%p496_p3, %s4847_s21), 1  ;;  %v7550_v18 = vand.u32 127, %v680_v17  ;;  %v681_v19 = vshrl.u32 %v680_v17, 7 }
  0x12   : > { %6085 = vmatpush3.bf16.msra.mxu0 %v6084_v5  ;;  %v6093_v14 = vpack.c.bf16 %v605_v11, %v604_v10  ;;  %s5074_s14 = sshll.u32 %s9415_s21, 7  ;;  %s503_s26 = scalar_lea.vmem %s9291_s1, %s9415_s21  ;;  %v527_v21 = vld [vmem:[%s9293_s3] sm:$0x1] }
  0x13   : > { %6091 = vmatpush3.bf16.msra.mxu1 %v6090_v9  ;;  %6086 = vmatprep.subr.bf16.mxu0 %v9307_v4  ;;  %s7541_s29 = scalar_lea.vmem %s9290_s0, %s5074_s14  ;;  %s506_s17 = scalar_lea.vmem %s9305_s15, %s9415_s21  ;;  %vm915_vm2 = vcmp.ge.s32.totalorder %v7550_v18, 8  ;;  %vm697_vm3 = vcmp.eq.s32.totalorder %v681_v19, 0  ;;  %vm745_vm4 = vcmp.eq.s32.totalorder %v681_v19, 7  ;;  %v7557_v23 = vsub.s32 0, %v681_v19  ;;  %v606_v24 = vld [vmem:[%s9295_s5] sm:$0x1] }
  0x14   : > { %6092 = vmatprep.subr.bf16.mxu1 %v9307_v4  ;;  %v507_v15 = vld [vmem:[%s7541_s29] sm:$0xff]  ;;  %v4856_v20 = vsel %vm697_vm3, 1.0, %v9306_v12  ;;  %v4857_v25 = vsel %vm745_vm4, 1.0, %v9306_v12  ;;  %v508_v33 = vld [vmem:[%s7541_s29 + $0x8] sm:$0xff]  ;;  %v509_v34 = vld [vmem:[%s7541_s29 + $0x10] sm:$0xff]  ;;  %s7612_s14 = smov 0  }
  0x15   : > { %v607_v16 = vrot.slane %v507_v15, 7  ;;  %v793_v22 = vsub.f32 1.0, %v4856_v20  ;;  %9326 = vst [vmem:[#allocation4_spill] sm:$0xff] %v7557_v23  ;;  %v510_v35 = vld [vmem:[%s7541_s29 + $0x18] sm:$0xff]  ;;  %v511_v37 = vld [vmem:[%s7541_s29 + $0x20] sm:$0xff]  ;;  %v512_v38 = vld [vmem:[%s7541_s29 + $0x28] sm:$0xff] }
  0x16   : > { %6088 = vmatpush3.bf16.msra.mxu0 %v6087_v13  ;;  %v513_v39 = vld [vmem:[%s7541_s29 + $0x30] sm:$0xff]  ;;  %v514_v41 = vld [vmem:[%s7541_s29 + $0x38] sm:$0xff]  ;;  %v515_v42 = vld [vmem:[%s7541_s29 + $0x40] sm:$0xff] }
  0x17   : > { %6094 = vmatpush3.bf16.msra.mxu1 %v6093_v14  ;;  %v809_v31 = vsub.f32 %v793_v22, %v4857_v25  ;;  %v516_v43 = vld [vmem:[%s7541_s29 + $0x48] sm:$0xff]  ;;  %v517_v45 = vld [vmem:[%s7541_s29 + $0x50] sm:$0xff]  ;;  %v518_v46 = vld [vmem:[%s7541_s29 + $0x58] sm:$0xff] }
  0x18   : > { %v519_v47 = vld [vmem:[%s7541_s29 + $0x60] sm:$0xff]  ;;  %v520_v52 = vld [vmem:[%s7541_s29 + $0x68] sm:$0xff]  ;;  %v521_v53 = vld [vmem:[%s7541_s29 + $0x70] sm:$0xff] }
  0x19   : > { %5451 = vmatmul.mubr.msk.f32.vlgmr.msra.gmra.mrb[0].mxu0 %vm528_vm1, %v507_v15  ;;  %v825_v49 = vmul.f32 %v809_v31, %v507_v15  ;;  %v522_v54 = vld [vmem:[%s7541_s29 + $0x78] sm:$0xff] }
  0x1a   : > { %5462 = vmatmul.mubr.msk.f32.vlgmr.msra.gmra.mrb[0].mxu1 %vm528_vm1, %v607_v16 }
  0xec   : > { %v598_v26 = vpop.f32.mrb[0].mxu0 }
  0xed   : > { %v599_v27 = vadd.f32 %v598_v26, %v527_v21  ;;  %v5452_v28 = vpop.f32.mrb[1].mxu0  ;;  %v676_v29 = vpop.f32.mrb[0].mxu1 }
  0xee   : > { %v677_v30 = vadd.f32 %v676_v29, %v606_v24  ;;  %v5463_v32 = vpop.f32.mrb[1].mxu1 }
  0xef   : > { %v844_v36 = vrot.slane %v599_v27, %v7557_v23 }
  0xf0   : > { %v880_v40 = vrot.slane %v677_v30, %v7557_v23 }
  0xf1   : > { %v846_v44 = vmul.f32 0.0, %v844_v36  ;;  %v845_v48 = vmul.f32 %v4856_v20, %v844_v36 }
  0xf2   : > { %v881_v50 = vmul.f32 %v4857_v25, %v880_v40  ;;  %v882_v51 = vmul.f32 0.0, %v880_v40 }
  0xf3   : > { %v862_v55 = vadd.f32 %v846_v44, %v508_v33  ;;  %v863_v56 = vadd.f32 %v846_v44, %v509_v34  ;;  %v864_v57 = vadd.f32 %v846_v44, %v510_v35  ;;  %v865_v58 = vadd.f32 %v846_v44, %v511_v37 }
  0xf4   : > { %v866_v59 = vadd.f32 %v846_v44, %v512_v38  ;;  %v867_v60 = vadd.f32 %v846_v44, %v513_v39  ;;  %v868_v61 = vadd.f32 %v846_v44, %v514_v41  ;;  %v869_v62 = vadd.f32 %v846_v44, %v515_v42 }
  0xf5   : > { %v870_v63 = vadd.f32 %v846_v44, %v516_v43  ;;  %v871_v0 = vadd.f32 %v846_v44, %v517_v45  ;;  %v872_v1 = vadd.f32 %v846_v44, %v518_v46  ;;  %v873_v2 = vadd.f32 %v846_v44, %v519_v47 }
  0xf6   : > { %v874_v3 = vadd.f32 %v846_v44, %v520_v52  ;;  %v875_v5 = vadd.f32 %v846_v44, %v521_v53  ;;  %v876_v6 = vadd.f32 %v846_v44, %v522_v54  ;;  %v861_v7 = vadd.f32 %v845_v48, %v825_v49 }
  0xf7   : > { %v898_v8 = vadd.f32 %v882_v51, %v862_v55   ;;  %v899_v9 = vadd.f32 %v882_v51, %v863_v56   ;;  %v900_v10 = vadd.f32 %v882_v51, %v864_v57   ;;  %v901_v11 = vadd.f32 %v882_v51, %v865_v58  }
  0xf8   : > { %v897_v13 = vadd.f32 %v881_v50, %v861_v7   ;;  %v902_v14 = vadd.f32 %v882_v51, %v866_v59   ;;  %v903_v15 = vadd.f32 %v882_v51, %v867_v60   ;;  %v904_v16 = vadd.f32 %v882_v51, %v868_v61  }
  0xf9   : > { %v905_v17 = vadd.f32 %v882_v51, %v869_v62   ;;  %v906_v19 = vadd.f32 %v882_v51, %v870_v63   ;;  %v907_v20 = vadd.f32 %v882_v51, %v871_v0   ;;  %v908_v21 = vadd.f32 %v882_v51, %v872_v1  }
  0xfa   : > { %v909_v22 = vadd.f32 %v882_v51, %v873_v2   ;;  %v910_v24 = vadd.f32 %v882_v51, %v874_v3   ;;  %v911_v25 = vadd.f32 %v882_v51, %v875_v5   ;;  %v912_v26 = vadd.f32 %v882_v51, %v876_v6  }
  0xfb LB: >> { %9327 = vst [vmem:[#allocation5_spill] sm:$0xff] %v7324_v26  ;;  %9328 = vst [vmem:[#allocation6_spill] sm:$0xff] %v7328_v25  ;;  %s7666_s24 = sshll.u32 %s7388_s14, 5  ;;  %5472 = vmatprep.mubr.msk.f32.mxu0 %vm528_vm1, %v7384_v13  ;;  %vm1185_vm5 = vcmask 64512   ;;  %s7393_s29 = smov 96   ;;  %vm2454_vm7 = vcmask 130112   ;;  %s7388_s14 = sphi %s7612_s14, %s921_s14   ;;  %v7384_v13 = vphi %v897_v13, %v9408_v13   ;;  %v7380_v8 = vphi %v898_v8, %v9407_v8   ;;  %v7376_v9 = vphi %v899_v9, %v9406_v9   ;;  %v7372_v10 = vphi %v900_v10, %v9405_v10   ;;  %v7368_v11 = vphi %v901_v11, %v9404_v11   ;;  %v7364_v14 = vphi %v902_v14, %v9403_v14   ;;  %v7360_v15 = vphi %v903_v15, %v9402_v15   ;;  %v7356_v16 = vphi %v904_v16, %v9401_v16   ;;  %v7352_v17 = vphi %v905_v17, %v9400_v17   ;;  %v7348_v19 = vphi %v906_v19, %v9399_v19   ;;  %v7344_v20 = vphi %v907_v20, %v9398_v20   ;;  %v7340_v21 = vphi %v908_v21, %v9397_v21   ;;  %v7336_v22 = vphi %v909_v22, %v9396_v22   ;;  %v7332_v24 = vphi %v910_v24, %v9395_v24   ;;  %v7328_v25 = vphi %v911_v25, %v9394_v25   ;;  %v7324_v26 = vphi %v912_v26, %v9393_v26  }
  0xfc   : >> { %9329 = vst [vmem:[#allocation7_spill] sm:$0xff] %v7332_v24  ;;  %9330 = vst [vmem:[#allocation8_spill] sm:$0xff] %v7336_v22  ;;  %s939_s28 = scalar_lea.vmem %s9296_s6, %s7666_s24  ;;  %s7394_s30 = smov 64   ;;  %vm3161_vm8 = vcmask 195712   ;;  %vm3868_vm9 = vcmask 261312   ;;  %vm4363_vm10 = vcmask 523264  }
  0xfd   : >> { %9331 = vst [vmem:[#allocation9_spill] sm:$0xff] %v7340_v21  ;;  %9332 = vst [vmem:[#allocation10_spill] sm:$0xff] %v7344_v20  ;;  %v940_v27 = vld [vmem:[%s939_s28] sm:$0xff]  ;;  %v941_v28 = vld [vmem:[%s939_s28 + $0x8] sm:$0xff]  ;;  %s7395_s16 = smov 88   ;;  %s7396_s18 = smov 120  }
  0xfe   : >> { %9333 = vst [vmem:[#allocation11_spill] sm:$0xff] %v7348_v19  ;;  %9334 = vst [vmem:[#allocation12_spill] sm:$0xff] %v7352_v17  ;;  %v6095_v29 = vpack.c.bf16 %v941_v28, %v940_v27  ;;  %v942_v30 = vld [vmem:[%s939_s28 + $0x10] sm:$0xff]  ;;  %v943_v31 = vld [vmem:[%s939_s28 + $0x18] sm:$0xff]  ;;  %s7397_s19 = smov 56   ;;  %s7398_s22 = smov 80  }
  0xff   : >> { %9335 = vst [vmem:[#allocation13_spill] sm:$0xff] %v7356_v16  ;;  %9336 = vst [vmem:[#allocation14_spill] sm:$0xff] %v7360_v15  ;;  %v6099_v32 = vpack.c.bf16 %v943_v31, %v942_v30  ;;  %s7399_s23 = smov 112   ;;  %s7400_s25 = smov 48  }
 0x100   : >> { %9337 = vst [vmem:[#allocation15_spill] sm:$0xff] %v7364_v14  ;;  %9338 = vst [vmem:[#allocation16_spill] sm:$0xff] %v7368_v11  ;;  %6096 = vmatprep.subr.bf16.mxu0 %v6095_v29  ;;  %s7401_s27 = smov 72   ;;  %s7402_s28 = smov 104  }
 0x101   : >> { %9339 = vst [vmem:[#allocation17_spill] sm:$0xff] %v7372_v10  ;;  %9340 = vst [vmem:[#allocation18_spill] sm:$0xff] %v7376_v9  ;;  %6098 = vmatpush3.bf16.msra.mxu0 %v6095_v29 }
 0x102   : >> { %9341 = vst [vmem:[#allocation19_spill] sm:$0xff] %v7380_v8  ;;  %9342 = vst [vmem:[#allocation20_spill] sm:$0xff] %v7384_v13  ;;  %6100 = vmatprep.subr.bf16.mxu0 %v6099_v32 }
 0x103   : >> { %vm7796_vm6 = vmpackc.low %vm1185_vm5, %vm1185_vm5 }
 0x105   : >> { %6102 = vmatpush3.bf16.msra.mxu0 %v6099_v32 }
 0x108   : >> { %5473 = vmatmul.mubr.msk.f32.vlgmr.msra.gmra.mrb[0].mxu0 %vm528_vm1, %v7380_v8 }
 0x109   : >> { %5475 = vmatprep.mubr.msk.f32.mxu0 %vm528_vm1, %v7376_v9 }
 0x10c   : >> { %5476 = vmatmul.mubr.msk.f32.gmra.mrb[2].mxu0 %vm528_vm1, %v7372_v10 }
 0x10d   : >> { %5478 = vmatprep.mubr.msk.f32.mxu0 %vm528_vm1, %v7368_v11 }
 0x110   : >> { %5479 = vmatmul.mubr.msk.f32.gmra.mrb[4].mxu0 %vm528_vm1, %v7364_v14 }
 0x111   : >> { %5481 = vmatprep.mubr.msk.f32.mxu0 %vm528_vm1, %v7360_v15 }
 0x114   : >> { %5482 = vmatmul.mubr.msk.f32.gmra.mrb[6].mxu0 %vm528_vm1, %v7356_v16 }
 0x115   : >> { %5484 = vmatprep.mubr.msk.f32.mxu0 %vm528_vm1, %v7352_v17 }
 0x118   : >> { %5485 = vmatmul.mubr.msk.f32.gmra.mrb[8].mxu0 %vm528_vm1, %v7348_v19 }
 0x119   : >> { %5487 = vmatprep.mubr.msk.f32.mxu0 %vm528_vm1, %v7344_v20 }
 0x11c   : >> { %5488 = vmatmul.mubr.msk.f32.gmra.mrb[10].mxu0 %vm528_vm1, %v7340_v21 }
 0x11d   : >> { %5490 = vmatprep.mubr.msk.f32.mxu0 %vm528_vm1, %v7336_v22 }
 0x120   : >> { %5491 = vmatmul.mubr.msk.f32.gmra.mrb[12].mxu0 %vm528_vm1, %v7332_v24 }
 0x121   : >> { %5493 = vmatprep.mubr.msk.f32.mxu0 %vm528_vm1, %v7328_v25 }
 0x124   : >> { %5494 = vmatmul.mubr.msk.f32.gmra.mrb[14].mxu0 %vm528_vm1, %v7324_v26 }
 0x1db   : >> { %v7704_v33 = vpop.f32.mrb[0].mxu0 }
 0x1dc   : >> { %v7706_v34 = vpop.f32.mrb[1].mxu0 }
 0x1dd   : >> { %5528 = vmatprep.mubr.msk.f32.mxu1 %vm1185_vm5, %v7706_v34  ;;  %v7712_v35 = vpack.i.bf16 %v7704_v33, %v7706_v34 }
 0x1df   : >> { %6666 = vrot.lane.b32.xlu0 %v7712_v35, %s7393_s29  ;;  %v7716_v36 = vpop.f32.mrb[2].mxu0 }
 0x1e0   : >> { %v7718_v37 = vpop.f32.mrb[3].mxu0 }
 0x1e1   : >> { %v7722_v38 = vpack.i.bf16 %v7716_v36, %v7718_v37 }
 0x1e3   : >> { %6671 = vrot.lane.b32.xlu0 %v7722_v38, %s7393_s29  ;;  %v7726_v39 = vpop.f32.mrb[4].mxu0 }
 0x1e4   : >> { %v7728_v40 = vpop.f32.mrb[5].mxu0 }
 0x1e5   : >> { %v7732_v41 = vpack.i.bf16 %v7726_v39, %v7728_v40 }
 0x1e7   : >> { %v7734_v42 = vpop.f32.mrb[6].mxu0  ;;  %6676 = vrot.lane.b32.xlu1 %v7732_v41, %s7393_s29 }
 0x1e8   : >> { %v7738_v43 = vpop.f32.mrb[7].mxu0 }
 0x1e9   : >> { %v7742_v44 = vpack.i.bf16 %v7734_v42, %v7738_v43 }
 0x1eb   : >> { %v7744_v45 = vpop.f32.mrb[8].mxu0  ;;  %6681 = vrot.lane.b32.xlu1 %v7742_v44, %s7393_s29 }
 0x1ec   : >> { %v7748_v46 = vpop.f32.mrb[9].mxu0 }
 0x1ed   : >> { %v7752_v47 = vpack.i.bf16 %v7744_v45, %v7748_v46 }
 0x1ef   : >> { %v7754_v48 = vpop.f32.mrb[10].mxu0  ;;  %6686 = vrot.lane.b32.xlu0 %v7752_v47, %s7393_s29 }
 0x1f0   : >> { %v7758_v49 = vpop.f32.mrb[11].mxu0 }
 0x1f1   : >> { %v7762_v50 = vpack.i.bf16 %v7754_v48, %v7758_v49 }
 0x1f3   : >> { %v7764_v51 = vpop.f32.mrb[12].mxu0  ;;  %6691 = vrot.lane.b32.xlu1 %v7762_v50, %s7393_s29 }
 0x1f4   : >> { %v7768_v52 = vpop.f32.mrb[13].mxu0 }
 0x1f5   : >> { %v7772_v53 = vpack.i.bf16 %v7764_v51, %v7768_v52 }
 0x1f7   : >> { %6696 = vrot.lane.b32.xlu0 %v7772_v53, %s7393_s29  ;;  %v7776_v54 = vpop.f32.mrb[14].mxu0 }
 0x1f8   : >> { %v7778_v55 = vpop.f32.mrb[15].mxu0 }
 0x1f9   : >> { %v7782_v56 = vpack.i.bf16 %v7776_v54, %v7778_v55 }
 0x1fb   : >> { %6711 = vrot.lane.b32.xlu0 %v7722_v38, %s7394_s30  ;;  %6701 = vrot.lane.b32.xlu1 %v7782_v56, %s7393_s29  ;;  %s7403_s29 = smov 40  }
 0x1ff   : >> { %6721 = vrot.lane.b32.xlu0 %v7742_v44, %s7394_s30  ;;  %6706 = vrot.lane.b32.xlu1 %v7712_v35, %s7394_s30 }
 0x203   : >> { %6716 = vrot.lane.b32.xlu1 %v7732_v41, %s7394_s30  ;;  %6731 = vrot.lane.b32.xlu0 %v7762_v50, %s7394_s30 }
 0x207   : >> { %6726 = vrot.lane.b32.xlu1 %v7752_v47, %s7394_s30 }
 0x20b   : >> { %6736 = vrot.lane.b32.xlu1 %v7772_v53, %s7394_s30 }
 0x20f   : >> { %6741 = vrot.lane.b32.xlu1 %v7782_v56, %s7394_s30  ;;  %s7404_s30 = smov 8  }
 0x251   : >> { %v6667_v57 = vpop.permute.xlu0 %6666 }
 0x252   : >> { %v6669_v58 = vunpack.i.h.bf16 %v6667_v57  ;;  %v6668_v59 = vunpack.i.l.bf16 %v6667_v57 }
 0x254   : >> { %v6103_v61 = vpack.c.bf16 %v6669_v58, %v6668_v59 }
 0x255   : >> { %v6672_v62 = vpop.permute.xlu0 %6671 }
 0x256   : >> { %6105 = vmatprep.subr.msk.bf16.mxu1 %vm7796_vm6, %v6103_v61  ;;  %v6674_v63 = vunpack.i.h.bf16 %v6672_v62  ;;  %v6673_v0 = vunpack.i.l.bf16 %v6672_v62 }
 0x257   : >> { %6108 = vmatpush3.bf16.xpose.msk.msra.mxu1 %vm7796_vm6, %v6103_v61 }
 0x258   : >> { %v6109_v1 = vpack.c.bf16 %v6674_v63, %v6673_v0 }
 0x259   : >> { %v6677_v2 = vpop.permute.xlu1 %6676 }
 0x25a   : >> { %6111 = vmatprep.subr.msk.bf16.mxu1 %vm7796_vm6, %v6109_v1  ;;  %v6679_v3 = vunpack.i.h.bf16 %v6677_v2  ;;  %v6678_v5 = vunpack.i.l.bf16 %v6677_v2 }
 0x25c   : >> { %v6115_v6 = vpack.c.bf16 %v6679_v3, %v6678_v5 }
 0x25d   : >> { %v6682_v7 = vpop.permute.xlu1 %6681 }
 0x25e   : >> { %v6684_v27 = vunpack.i.h.bf16 %v6682_v7  ;;  %v6683_v28 = vunpack.i.l.bf16 %v6682_v7 }
 0x25f   : >> { %6114 = vmatpush3.bf16.xpose.msk.msra.mxu1 %vm7796_vm6, %v6109_v1 }
 0x260   : >> { %6117 = vmatprep.subr.msk.bf16.mxu1 %vm7796_vm6, %v6115_v6  ;;  %v6121_v30 = vpack.c.bf16 %v6684_v27, %v6683_v28 }
 0x261   : >> { %v6687_v29 = vpop.permute.xlu0 %6686 }
 0x262   : >> { %v6689_v32 = vunpack.i.h.bf16 %v6687_v29  ;;  %v6688_v57 = vunpack.i.l.bf16 %v6687_v29 }
 0x264   : >> { %v6127_v59 = vpack.c.bf16 %v6689_v32, %v6688_v57 }
 0x265   : >> { %v6692_v31 = vpop.permute.xlu1 %6691 }
 0x266   : >> { %v6694_v63 = vunpack.i.h.bf16 %v6692_v31  ;;  %v6693_v0 = vunpack.i.l.bf16 %v6692_v31 }
 0x267   : >> { %6120 = vmatpush3.bf16.xpose.msk.msra.mxu1 %vm7796_vm6, %v6115_v6 }
 0x268   : >> { %6123 = vmatprep.subr.msk.bf16.mxu1 %vm7796_vm6, %v6121_v30  ;;  %v6133_v7 = vpack.c.bf16 %v6694_v63, %v6693_v0 }
 0x269   : >> { %v6697_v58 = vpop.permute.xlu0 %6696 }
 0x26a   : >> { %v6698_v31 = vunpack.i.l.bf16 %v6697_v58 }
 0x26d   : >> { %v6702_v61 = vpop.permute.xlu1 %6701  ;;  %v6712_v62 = vpop.permute.xlu0 %6711 }
 0x26e   : >> { %v6714_v2 = vunpack.i.h.bf16 %v6712_v62  ;;  %v6713_v3 = vunpack.i.l.bf16 %v6712_v62 }
 0x26f   : >> { %6126 = vmatpush3.bf16.xpose.msk.msra.mxu1 %vm7796_vm6, %v6121_v30  ;;  %v6699_v30 = vunpack.i.h.bf16 %v6697_v58  ;;  %v6704_v58 = vunpack.i.h.bf16 %v6702_v61 }
 0x270   : >> { %6129 = vmatprep.subr.msk.bf16.mxu1 %vm7796_vm6, %v6127_v59  ;;  %v6155_v57 = vpack.c.bf16 %v6714_v2, %v6713_v3 }
 0x271   : >> { %v6707_v1 = vpop.permute.xlu1 %6706  ;;  %v6722_v12 = vpop.permute.xlu0 %6721 }
 0x272   : >> { %v6709_v5 = vunpack.i.h.bf16 %v6707_v1  ;;  %v6708_v6 = vunpack.i.l.bf16 %v6707_v1  ;;  %v6724_v62 = vunpack.i.h.bf16 %v6722_v12  ;;  %v6723_v1 = vunpack.i.l.bf16 %v6722_v12 }
 0x274   : >> { %v6151_v27 = vpack.c.bf16 %v6709_v5, %v6708_v6  ;;  %v6139_v5 = vpack.c.bf16 %v6699_v30, %v6698_v31  ;;  %v6163_v3 = vpack.c.bf16 %v6724_v62, %v6723_v1 }
 0x275   : >> { %v6717_v28 = vpop.permute.xlu1 %6716 }
 0x276   : >> { %v6719_v29 = vunpack.i.h.bf16 %v6717_v28  ;;  %v6718_v32 = vunpack.i.l.bf16 %v6717_v28  ;;  %6152 = vmatprep.subr.bf16.mxu0 %v6151_v27  ;;  %v6732_v28 = vpop.permute.xlu0 %6731 }
 0x277   : >> { %6132 = vmatpush3.bf16.xpose.msk.msra.mxu1 %vm7796_vm6, %v6127_v59  ;;  %6154 = vmatpush3.bf16.msra.mxu0 %v6151_v27  ;;  %v6703_v59 = vunpack.i.l.bf16 %v6702_v61  ;;  %v6734_v12 = vunpack.i.h.bf16 %v6732_v28  ;;  %v6733_v27 = vunpack.i.l.bf16 %v6732_v28 }
 0x278   : >> { %6156 = vmatprep.subr.bf16.mxu0 %v6155_v57  ;;  %6135 = vmatprep.subr.msk.bf16.mxu1 %vm7796_vm6, %v6133_v7  ;;  %v6159_v63 = vpack.c.bf16 %v6719_v29, %v6718_v32 }
 0x279   : >> { %v6727_v0 = vpop.permute.xlu1 %6726  ;;  %v6171_v62 = vpack.c.bf16 %v6734_v12, %v6733_v27 }
 0x27a   : >> { %v6729_v6 = vunpack.i.h.bf16 %v6727_v0  ;;  %v6728_v2 = vunpack.i.l.bf16 %v6727_v0 }
 0x27b   : >> { %6158 = vmatpush3.bf16.msra.mxu0 %v6155_v57  ;;  %v6145_v57 = vpack.c.bf16 %v6704_v58, %v6703_v59 }
 0x27c   : >> { %6160 = vmatprep.subr.bf16.mxu0 %v6159_v63  ;;  %v6167_v29 = vpack.c.bf16 %v6729_v6, %v6728_v2 }
 0x27d   : >> { %v6737_v32 = vpop.permute.xlu1 %6736 }
 0x27e   : >> { %v6739_v30 = vunpack.i.h.bf16 %v6737_v32  ;;  %v6738_v31 = vunpack.i.l.bf16 %v6737_v32 }
 0x27f   : >> { %6138 = vmatpush3.bf16.xpose.msk.msra.mxu1 %vm7796_vm6, %v6133_v7  ;;  %6162 = vmatpush3.bf16.msra.mxu0 %v6159_v63 }
 0x280   : >> { %6164 = vmatprep.subr.bf16.mxu0 %v6163_v3  ;;  %6141 = vmatprep.subr.msk.bf16.mxu1 %vm7796_vm6, %v6139_v5  ;;  %v6175_v63 = vpack.c.bf16 %v6739_v30, %v6738_v31 }
 0x281   : >> { %v6742_v7 = vpop.permute.xlu1 %6741 }
 0x282   : >> { %v6744_v61 = vunpack.i.h.bf16 %v6742_v7  ;;  %v6743_v1 = vunpack.i.l.bf16 %v6742_v7 }
 0x283   : >> { %6166 = vmatpush3.bf16.msra.mxu0 %v6163_v3 }
 0x284   : >> { %6168 = vmatprep.subr.bf16.mxu0 %v6167_v29  ;;  %v6179_v0 = vpack.c.bf16 %v6744_v61, %v6743_v1 }
 0x287   : >> { %6144 = vmatpush3.bf16.xpose.msk.msra.mxu1 %vm7796_vm6, %v6139_v5  ;;  %6170 = vmatpush3.bf16.msra.mxu0 %v6167_v29 }
 0x288   : >> { %6172 = vmatprep.subr.bf16.mxu0 %v6171_v62  ;;  %6147 = vmatprep.subr.msk.bf16.mxu1 %vm7796_vm6, %v6145_v57 }
 0x28b   : >> { %6174 = vmatpush3.bf16.msra.mxu0 %v6171_v62 }
 0x28c   : >> { %6176 = vmatprep.subr.bf16.mxu0 %v6175_v63 }
 0x28f   : >> { %6150 = vmatpush3.bf16.xpose.msk.msra.mxu1 %vm7796_vm6, %v6145_v57  ;;  %6178 = vmatpush3.bf16.msra.mxu0 %v6175_v63 }
 0x290   : >> { %6180 = vmatprep.subr.bf16.mxu0 %v6179_v0 }
 0x293   : >> { %6182 = vmatpush3.bf16.msra.mxu0 %v6179_v0 }
 0x296   : >> { %5529 = vmatmul.mubr.msk.f32.vlgmr.msra.gmra.mrb[0].mxu1 %vm1185_vm5, %v7704_v33 }
 0x297   : >> { %5531 = vmatprep.mubr.msk.f32.mxu1 %vm1185_vm5, %v7718_v37 }
 0x29a   : >> { %5532 = vmatmul.mubr.msk.f32.gmra.mrb[2].mxu1 %vm1185_vm5, %v7716_v36 }
 0x29b   : >> { %5534 = vmatprep.mubr.msk.f32.mxu1 %vm1185_vm5, %v7728_v40 }
 0x29e   : >> { %5535 = vmatmul.mubr.msk.f32.gmra.mrb[4].mxu1 %vm1185_vm5, %v7726_v39 }
 0x29f   : >> { %5537 = vmatprep.mubr.msk.f32.mxu1 %vm1185_vm5, %v7738_v43 }
 0x2a2   : >> { %5538 = vmatmul.mubr.msk.f32.gmra.mrb[6].mxu1 %vm1185_vm5, %v7734_v42 }
 0x2a3   : >> { %5540 = vmatprep.mubr.msk.f32.mxu1 %vm1185_vm5, %v7748_v46 }
 0x2a6   : >> { %5541 = vmatmul.mubr.msk.f32.gmra.mrb[8].mxu1 %vm1185_vm5, %v7744_v45 }
 0x2a7   : >> { %5543 = vmatprep.mubr.msk.f32.mxu1 %vm1185_vm5, %v7758_v49 }
 0x2aa   : >> { %5544 = vmatmul.mubr.msk.f32.gmra.mrb[10].mxu1 %vm1185_vm5, %v7754_v48 }
 0x2ab   : >> { %5546 = vmatprep.mubr.msk.f32.mxu1 %vm1185_vm5, %v7768_v52 }
 0x2ae   : >> { %5547 = vmatmul.mubr.msk.f32.gmra.mrb[12].mxu1 %vm1185_vm5, %v7764_v51 }
 0x2af   : >> { %5549 = vmatprep.mubr.msk.f32.mxu1 %vm1185_vm5, %v7778_v55 }
 0x2b2   : >> { %5550 = vmatmul.mubr.msk.f32.gmra.mrb[14].mxu1 %vm1185_vm5, %v7776_v54 }
 0x369   : >> { %v5530_v5 = vpop.f32.mrb[0].mxu1 }
 0x36a   : >> { %v1316_v6 = vpop.f32.mrb[1].mxu1  ;;  %v1396_v2 = vsel %vm915_vm2, -1e+30, %v5530_v5 }
 0x36b   : >> { %1413 = vmax.xlane.f32.xlu1 %v1396_v2  ;;  %v1395_v3 = vsel %vm915_vm2, -1e+30, %v1316_v6 }
 0x36c   : >> { %1411 = vmax.xlane.f32.xlu0 %v1395_v3 }
 0x36d   : >> { %v5533_v28 = vpop.f32.mrb[2].mxu1 }
 0x36e   : >> { %v1326_v58 = vpop.f32.mrb[3].mxu1  ;;  %v1398_v63 = vsel %vm915_vm2, -1e+30, %v5533_v28 }
 0x36f   : >> { %v1397_v0 = vsel %vm915_vm2, -1e+30, %v1326_v58 }
 0x371   : >> { %v5536_v59 = vpop.f32.mrb[4].mxu1 }
 0x372   : >> { %v1336_v12 = vpop.f32.mrb[5].mxu1  ;;  %v1400_v6 = vsel %vm915_vm2, -1e+30, %v5536_v59 }
 0x373   : >> { %v1399_v5 = vsel %vm915_vm2, -1e+30, %v1336_v12 }
 0x375   : >> { %v5539_v27 = vpop.f32.mrb[6].mxu1 }
 0x376   : >> { %v1346_v29 = vpop.f32.mrb[7].mxu1  ;;  %v7889_v28 = vsel %vm915_vm2, -1e+30, %v5539_v27 }
 0x377   : >> { %v7884_v4 = vsel %vm915_vm2, -1e+30, %v1346_v29 }
 0x379   : >> { %v5542_v32 = vpop.f32.mrb[8].mxu1 }
 0x37a   : >> { %v1356_v57 = vpop.f32.mrb[9].mxu1  ;;  %v7899_v59 = vsel %vm915_vm2, -1e+30, %v5542_v32 }
 0x37b   : >> { %v7894_v58 = vsel %vm915_vm2, -1e+30, %v1356_v57 }
 0x37c   : >> { %6751 = vrot.lane.b32.xlu1 %v7722_v38, %s7395_s16 }
 0x37d   : >> { %v5545_v30 = vpop.f32.mrb[10].mxu1 }
 0x37e   : >> { %v1366_v31 = vpop.f32.mrb[11].mxu1  ;;  %v7909_v27 = vsel %vm915_vm2, -1e+30, %v5545_v30 }
 0x37f   : >> { %v7904_v12 = vsel %vm915_vm2, -1e+30, %v1366_v31 }
 0x380   : >> { %6756 = vrot.lane.b32.xlu1 %v7732_v41, %s7395_s16 }
 0x381   : >> { %v5548_v62 = vpop.f32.mrb[12].mxu1 }
 0x382   : >> { %6746 = vrot.lane.b32.xlu0 %v7712_v35, %s7395_s16  ;;  %v1376_v7 = vpop.f32.mrb[13].mxu1  ;;  %v7919_v32 = vsel %vm915_vm2, -1e+30, %v5548_v62 }
 0x383   : >> { %v7914_v29 = vsel %vm915_vm2, -1e+30, %v1376_v7 }
 0x384   : >> { %6761 = vrot.lane.b32.xlu1 %v7742_v44, %s7395_s16 }
 0x385   : >> { %v5551_v61 = vpop.f32.mrb[14].mxu1 }
 0x386   : >> { %v1386_v1 = vpop.f32.mrb[15].mxu1  ;;  %v7929_v30 = vsel %vm915_vm2, -1e+30, %v5551_v61 }
 0x387   : >> { %v7924_v57 = vsel %vm915_vm2, -1e+30, %v1386_v1 }
 0x3a1   : >> { %1417 = vmax.xlane.f32.xlu0 %v1398_v63 }
 0x3a5   : >> { %1415 = vmax.xlane.f32.xlu0 %v1397_v0 }
 0x3a8   : >> { %1419 = vmax.xlane.f32.xlu1 %v1399_v5 }
 0x3a9   : >> { %1421 = vmax.xlane.f32.xlu0 %v1400_v6 }
 0x3ac   : >> { %1423 = vmax.xlane.f32.xlu1 %v7884_v4 }
 0x3ad   : >> { %1425 = vmax.xlane.f32.xlu0 %v7889_v28 }
 0x3b0   : >> { %1427 = vmax.xlane.f32.xlu1 %v7894_v58 }
 0x3b1   : >> { %1429 = vmax.xlane.f32.xlu0 %v7899_v59 }
 0x3b4   : >> { %1431 = vmax.xlane.f32.xlu1 %v7904_v12 }
 0x3b5   : >> { %1433 = vmax.xlane.f32.xlu0 %v7909_v27 }
 0x3b8   : >> { %1435 = vmax.xlane.f32.xlu1 %v7914_v29 }
 0x3b9   : >> { %1437 = vmax.xlane.f32.xlu0 %v7919_v32 }
 0x3bc   : >> { %1439 = vmax.xlane.f32.xlu1 %v7924_v57 }
 0x3bd   : >> { %1441 = vmax.xlane.f32.xlu0 %v7929_v30 }
 0x3cd   : >> { %6771 = vrot.lane.b32.xlu1 %v7762_v50, %s7395_s16 }
 0x3d1   : >> { %6776 = vrot.lane.b32.xlu1 %v7772_v53, %s7395_s16 }
 0x3f8   : >> { %v1414_v31 = vpop.xlane.xlu1 %1413 }
 0x3f9   : >> { %v1444_v62 = vsub.f32 %v1396_v2, %v1414_v31  ;;  %v1412_v7 = vpop.xlane.xlu0 %1411 }
 0x3fa   : >> { %v1443_v23 = vsub.f32 %v1395_v3, %v1412_v7 }
 0x3fb   : >> { %v1461_v1 = vmul.f32 1.442695, %v1444_v62 }
 0x3fc   : >> { %v1459_v26 = vmul.f32 1.442695, %v1443_v23  ;;  %v7949_v23 = vpop.permute.xlu1 %6751 }
 0x3fd   : >> { %6985 = vpow2.f32 %v1461_v1  ;;  %v6747_v25 = vpop.permute.xlu0 %6746 }
 0x3fe   : >> { %6987 = vpow2.f32 %v1459_v26  ;;  %v6749_v24 = vunpack.i.h.bf16 %v6747_v25  ;;  %v6748_v61 = vunpack.i.l.bf16 %v6747_v25 }
 0x400   : >> { %v7936_v22 = vpack.c.bf16 %v6749_v24, %v6748_v61  ;;  %v7951_v25 = vpop.permute.xlu1 %6756 }
 0x402   : >> { %6185 = vmatprep.subr.msk.bf16.mxu0 %vm7796_vm6, %v7936_v22 }
 0x404   : >> { %v7953_v2 = vpop.permute.xlu1 %6761 }
 0x407   : >> { %v7941_v21 = vpop.eup %6985 }
 0x408   : >> { %v7943_v20 = vpop.eup %6987  ;;  %1493 = vadd.xlane.f32.xlu0 %v7941_v21 }
 0x409   : >> { %1491 = vadd.xlane.f32.xlu1 %v7943_v20 }
 0x41e   : >> { %6766 = vrot.lane.b32.xlu0 %v7752_v47, %s7395_s16 }
 0x42e   : >> { %v1418_v24 = vpop.xlane.xlu0 %1417 }
 0x42f   : >> { %v1446_v26 = vsub.f32 %v1398_v63, %v1418_v24 }
 0x431   : >> { %v1465_v3 = vmul.f32 1.442695, %v1446_v26 }
 0x432   : >> { %v1416_v31 = vpop.xlane.xlu0 %1415 }
 0x433   : >> { %6989 = vpow2.f32 %v1465_v3  ;;  %v1445_v62 = vsub.f32 %v1397_v0, %v1416_v31 }
 0x435   : >> { %v1463_v7 = vmul.f32 1.442695, %v1445_v62  ;;  %v1420_v1 = vpop.xlane.xlu1 %1419 }
 0x436   : >> { %v1422_v61 = vpop.xlane.xlu0 %1421  ;;  %v1447_v19 = vsub.f32 %v1399_v5, %v1420_v1 }
 0x437   : >> { %6991 = vpow2.f32 %v1463_v7  ;;  %v1448_v17 = vsub.f32 %v1400_v6, %v1422_v61 }
 0x438   : >> { %v1467_v14 = vmul.f32 1.442695, %v1447_v19 }
 0x439   : >> { %v1469_v16 = vmul.f32 1.442695, %v1448_v17  ;;  %v1424_v10 = vpop.xlane.xlu1 %1423 }
 0x43a   : >> { %v1426_v15 = vpop.xlane.xlu0 %1425  ;;  %v1449_v0 = vsub.f32 %v7884_v4, %v1424_v10 }
 0x43b   : >> { %6993 = vpow2.f32 %v1469_v16  ;;  %v1450_v11 = vsub.f32 %v7889_v28, %v1426_v15 }
 0x43c   : >> { %6995 = vpow2.f32 %v1467_v14  ;;  %v1471_v17 = vmul.f32 1.442695, %v1449_v0 }
 0x43d   : >> { %v7956_v63 = vpop.eup %6989  ;;  %v1473_v24 = vmul.f32 1.442695, %v1450_v11  ;;  %v1428_v5 = vpop.xlane.xlu1 %1427 }
 0x43e   : >> { %1497 = vadd.xlane.f32.xlu1 %v7956_v63  ;;  %v1430_v26 = vpop.xlane.xlu0 %1429  ;;  %v1451_v14 = vsub.f32 %v7894_v58, %v1428_v5 }
 0x43f   : >> { %6997 = vpow2.f32 %v1473_v24  ;;  %v1452_v16 = vsub.f32 %v7899_v59, %v1430_v26 }
 0x440   : >> { %6999 = vpow2.f32 %v1471_v17  ;;  %v1475_v6 = vmul.f32 1.442695, %v1451_v14 }
 0x441   : >> { %v7960_v3 = vpop.eup %6991  ;;  %v1477_v4 = vmul.f32 1.442695, %v1452_v16  ;;  %v1432_v10 = vpop.xlane.xlu1 %1431 }
 0x442   : >> { %1495 = vadd.xlane.f32.xlu0 %v7960_v3  ;;  %v1434_v19 = vpop.xlane.xlu0 %1433  ;;  %v1453_v28 = vsub.f32 %v7904_v12, %v1432_v10 }
 0x443   : >> { %7001 = vpow2.f32 %v1477_v4 }
 0x444   : >> { %7003 = vpow2.f32 %v1475_v6  ;;  %v1479_v7 = vmul.f32 1.442695, %v1453_v28 }
 0x445   : >> { %v7964_v15 = vpop.eup %6993  ;;  %v1436_v62 = vpop.xlane.xlu1 %1435 }
 0x446   : >> { %1501 = vadd.xlane.f32.xlu0 %v7964_v15  ;;  %v7968_v11 = vpop.eup %6995  ;;  %v1438_v31 = vpop.xlane.xlu0 %1437  ;;  %7005 = vpow2.f32 %v1479_v7  ;;  %v1455_v12 = vsub.f32 %v7914_v29, %v1436_v62  ;;  %v1454_v29 = vsub.f32 %v7909_v27, %v1434_v19 }
 0x447   : >> { %v1456_v58 = vsub.f32 %v7919_v32, %v1438_v31 }
 0x448   : >> { %v1483_v26 = vmul.f32 1.442695, %v1455_v12  ;;  %v1481_v10 = vmul.f32 1.442695, %v1454_v29 }
 0x449   : >> { %v7972_v59 = vpop.eup %6997  ;;  %v1485_v61 = vmul.f32 1.442695, %v1456_v58  ;;  %v1440_v0 = vpop.xlane.xlu1 %1439 }
 0x44a   : >> { %1499 = vadd.xlane.f32.xlu0 %v7968_v11  ;;  %v7978_v1 = vpop.eup %6999  ;;  %v1457_v32 = vsub.f32 %v7924_v57, %v1440_v0  ;;  %v1442_v4 = vpop.xlane.xlu0 %1441  ;;  %v6754_v0 = vunpack.i.h.bf16 %v7949_v23 }
 0x44b   : >> { %7007 = vpow2.f32 %v1485_v61  ;;  %v1458_v57 = vsub.f32 %v7929_v30, %v1442_v4  ;;  %v6763_v4 = vunpack.i.l.bf16 %v7953_v2 }
 0x44c   : >> { %7009 = vpow2.f32 %v1483_v26  ;;  %v1487_v17 = vmul.f32 1.442695, %v1457_v32  ;;  %v6753_v26 = vunpack.i.l.bf16 %v7949_v23 }
 0x44d   : >> { %v7982_v24 = vpop.eup %7001  ;;  %v1489_v28 = vmul.f32 1.442695, %v1458_v57  ;;  %v6772_v30 = vpop.permute.xlu1 %6771 }
 0x44e   : >> { %1505 = vadd.xlane.f32.xlu0 %v7972_v59  ;;  %v7986_v5 = vpop.eup %7003  ;;  %7011 = vpow2.f32 %v1487_v17  ;;  %v6189_v29 = vpack.c.bf16 %v6754_v0, %v6753_v26 }
 0x44f   : >> { %6781 = vrot.lane.b32.xlu1 %v7782_v56, %s7395_s16  ;;  %7013 = vpow2.f32 %v1481_v10  ;;  %s7405_s16 = smov 16  }
 0x450   : >> { %v7989_v16 = vpop.eup %7005  ;;  %7015 = vpow2.f32 %v1489_v28 }
 0x451   : >> { %v6777_v62 = vpop.permute.xlu1 %6776 }
 0x452   : >> { %1503 = vadd.xlane.f32.xlu0 %v7978_v1  ;;  %v6778_v0 = vunpack.i.l.bf16 %v6777_v62 }
 0x455   : >> { %v7993_v14 = vpop.eup %7007 }
 0x456   : >> { %1509 = vadd.xlane.f32.xlu0 %v7982_v24  ;;  %v7997_v6 = vpop.eup %7009 }
 0x458   : >> { %v8000_v31 = vpop.eup %7011 }
 0x459   : >> { %v8003_v27 = vpop.eup %7013 }
 0x45a   : >> { %1507 = vadd.xlane.f32.xlu0 %v7986_v5  ;;  %v8006_v19 = vpop.eup %7015 }
 0x45e   : >> { %1511 = vadd.xlane.f32.xlu0 %v7989_v16 }
 0x462   : >> { %1517 = vadd.xlane.f32.xlu0 %v7993_v14 }
 0x466   : >> { %1515 = vadd.xlane.f32.xlu0 %v7997_v6 }
 0x46a   : >> { %1519 = vadd.xlane.f32.xlu0 %v8000_v31 }
 0x473   : >> { %1513 = vadd.xlane.f32.xlu1 %v8003_v27 }
 0x477   : >> { %1521 = vadd.xlane.f32.xlu1 %v8006_v19 }
 0x480   : >> { %1764 = vrot.lane.b32.xlu0 %v7706_v34, %s7396_s18 }
 0x484   : >> { %1776 = vrot.lane.b32.xlu0 %v7738_v43, %s7396_s18 }
 0x488   : >> { %1766 = vrot.lane.b32.xlu1 %v7704_v33, %s7396_s18  ;;  %1780 = vrot.lane.b32.xlu0 %v7748_v46, %s7396_s18 }
 0x48c   : >> { %1768 = vrot.lane.b32.xlu1 %v7718_v37, %s7396_s18  ;;  %1784 = vrot.lane.b32.xlu0 %v7758_v49, %s7396_s18 }
 0x490   : >> { %1770 = vrot.lane.b32.xlu1 %v7716_v36, %s7396_s18  ;;  %1788 = vrot.lane.b32.xlu0 %v7768_v52, %s7396_s18 }
 0x494   : >> { %1772 = vrot.lane.b32.xlu1 %v7728_v40, %s7396_s18  ;;  %1792 = vrot.lane.b32.xlu0 %v7778_v55, %s7396_s18 }
 0x495   : >> { %v1494_v7 = vpop.xlane.xlu0 %1493 }
 0x496   : >> { %7017 = vrcp.f32 %v1494_v7  ;;  %v1492_v58 = vpop.xlane.xlu1 %1491  ;;  %v6774_v7 = vunpack.i.h.bf16 %v6772_v30 }
 0x497   : >> { %7019 = vrcp.f32 %v1492_v58  ;;  %v6773_v58 = vunpack.i.l.bf16 %v6772_v30 }
 0x498   : >> { %1774 = vrot.lane.b32.xlu1 %v7726_v39, %s7396_s18  ;;  %6791 = vrot.lane.b32.xlu0 %v7722_v38, %s7397_s19 }
 0x499   : >> { %v6767_v10 = vpop.permute.xlu0 %6766 }
 0x49a   : >> { %v6769_v57 = vunpack.i.h.bf16 %v6767_v10  ;;  %v6768_v28 = vunpack.i.l.bf16 %v6767_v10 }
 0x49c   : >> { %1778 = vrot.lane.b32.xlu1 %v7734_v42, %s7396_s18  ;;  %6801 = vrot.lane.b32.xlu0 %v7742_v44, %s7397_s19 }
 0x4a0   : >> { %v7018_v12 = vpop.eup %7017  ;;  %1782 = vrot.lane.b32.xlu1 %v7744_v45, %s7396_s18  ;;  %6811 = vrot.lane.b32.xlu0 %v7762_v50, %s7397_s19 }
 0x4a1   : >> { %v7020_v61 = vpop.eup %7019  ;;  %v1540_v17 = vmul.f32 %v7018_v12, %v7941_v21  ;;  %v6758_v21 = vunpack.i.l.bf16 %v7951_v25  ;;  %v6213_v12 = vpack.c.bf16 %v6774_v7, %v6773_v58 }
 0x4a2   : >> { %v1539_v32 = vmul.f32 %v7020_v61, %v7943_v20  ;;  %v6759_v20 = vunpack.i.h.bf16 %v7951_v25  ;;  %v6779_v61 = vunpack.i.h.bf16 %v6777_v62 }
 0x4a4   : >> { %1786 = vrot.lane.b32.xlu1 %v7754_v48, %s7396_s18  ;;  %5584 = vmatprep.mubr.f32.mxu0 %v1539_v32  ;;  %v6195_v23 = vpack.c.bf16 %v6759_v20, %v6758_v21  ;;  %v6219_v32 = vpack.c.bf16 %v6779_v61, %v6778_v0 }
 0x4a5   : >> { %5585 = vmatmul.mubr.f32.vlgmr.msra.gmra.mrb[16].mxu0 %v1540_v17 }
 0x4a6   : >> { %6188 = vmatpush3.bf16.xpose.msk.msra.mxu0 %vm7796_vm6, %v7936_v22  ;;  %v6764_v22 = vunpack.i.h.bf16 %v7953_v2  ;;  %v6207_v2 = vpack.c.bf16 %v6769_v57, %v6768_v28 }
 0x4a7   : >> { %6191 = vmatprep.subr.msk.bf16.mxu0 %vm7796_vm6, %v6189_v29 }
 0x4a8   : >> { %1790 = vrot.lane.b32.xlu1 %v7764_v51, %s7396_s18  ;;  %v6201_v25 = vpack.c.bf16 %v6764_v22, %v6763_v4 }
 0x4ac   : >> { %1794 = vrot.lane.b32.xlu1 %v7776_v54, %s7396_s18 }
 0x4ae   : >> { %6194 = vmatpush3.bf16.xpose.msk.msra.mxu0 %vm7796_vm6, %v6189_v29 }
 0x4af   : >> { %6197 = vmatprep.subr.msk.bf16.mxu0 %vm7796_vm6, %v6195_v23 }
 0x4b0   : >> { %6786 = vrot.lane.b32.xlu1 %v7712_v35, %s7397_s19 }
 0x4b4   : >> { %6796 = vrot.lane.b32.xlu1 %v7732_v41, %s7397_s19 }
 0x4b6   : >> { %6200 = vmatpush3.bf16.xpose.msk.msra.mxu0 %vm7796_vm6, %v6195_v23 }
 0x4b7   : >> { %6203 = vmatprep.subr.msk.bf16.mxu0 %vm7796_vm6, %v6201_v25 }
 0x4b8   : >> { %6806 = vrot.lane.b32.xlu1 %v7752_v47, %s7397_s19 }
 0x4bc   : >> { %6816 = vrot.lane.b32.xlu1 %v7772_v53, %s7397_s19 }
 0x4be   : >> { %6206 = vmatpush3.bf16.xpose.msk.msra.mxu0 %vm7796_vm6, %v6201_v25 }
 0x4bf   : >> { %6209 = vmatprep.subr.msk.bf16.mxu0 %vm7796_vm6, %v6207_v2 }
 0x4c0   : >> { %6821 = vrot.lane.b32.xlu1 %v7782_v56, %s7397_s19 }
 0x4c6   : >> { %6212 = vmatpush3.bf16.xpose.msk.msra.mxu0 %vm7796_vm6, %v6207_v2 }
 0x4c7   : >> { %6215 = vmatprep.subr.msk.bf16.mxu0 %vm7796_vm6, %v6213_v12 }
 0x4cb   : >> { %v1498_v26 = vpop.xlane.xlu1 %1497 }
 0x4cc   : >> { %7021 = vrcp.f32 %v1498_v26 }
 0x4ce   : >> { %6218 = vmatpush3.bf16.xpose.msk.msra.mxu0 %vm7796_vm6, %v6213_v12 }
 0x4cf   : >> { %6221 = vmatprep.subr.msk.bf16.mxu0 %vm7796_vm6, %v6219_v32  ;;  %v1496_v17 = vpop.xlane.xlu0 %1495  ;;  %v6782_v30 = vpop.permute.xlu1 %6781 }
 0x4d0   : >> { %7023 = vrcp.f32 %v1496_v17  ;;  %v6784_v29 = vunpack.i.h.bf16 %v6782_v30  ;;  %v6783_v20 = vunpack.i.l.bf16 %v6782_v30 }
 0x4d2   : >> { %v6225_v23 = vpack.c.bf16 %v6784_v29, %v6783_v20 }
 0x4d3   : >> { %v1502_v21 = vpop.xlane.xlu0 %1501 }
 0x4d4   : >> { %7025 = vrcp.f32 %v1502_v21 }
 0x4d6   : >> { %6224 = vmatpush3.bf16.xpose.msk.msra.mxu0 %vm7796_vm6, %v6219_v32  ;;  %v7022_v22 = vpop.eup %7021 }
 0x4d7   : >> { %6227 = vmatprep.subr.msk.bf16.mxu0 %vm7796_vm6, %v6225_v23  ;;  %v1500_v62 = vpop.xlane.xlu0 %1499  ;;  %v1542_v57 = vmul.f32 %v7022_v22, %v7956_v63 }
 0x4d8   : >> { %7027 = vrcp.f32 %v1500_v62 }
 0x4da   : >> { %v7024_v4 = vpop.eup %7023 }
 0x4db   : >> { %v1506_v25 = vpop.xlane.xlu0 %1505  ;;  %v1541_v10 = vmul.f32 %v7024_v4, %v7960_v3 }
 0x4dc   : >> { %7029 = vrcp.f32 %v1506_v25 }
 0x4dd   : >> { %5587 = vmatprep.mubr.f32.mxu0 %v1541_v10 }
 0x4de   : >> { %6230 = vmatpush3.bf16.xpose.msk.msra.mxu0 %vm7796_vm6, %v6225_v23  ;;  %v7026_v2 = vpop.eup %7025 }
 0x4df   : >> { %5588 = vmatmul.mubr.f32.gmra.mrb[18].mxu0 %v1542_v57  ;;  %v1504_v28 = vpop.xlane.xlu0 %1503  ;;  %v1544_v61 = vmul.f32 %v7026_v2, %v7964_v15 }
 0x4e0   : >> { %7031 = vrcp.f32 %v1504_v28 }
 0x4e2   : >> { %v7028_v7 = vpop.eup %7027 }
 0x4e3   : >> { %v1510_v58 = vpop.xlane.xlu0 %1509  ;;  %v1543_v12 = vmul.f32 %v7028_v7, %v7968_v11 }
 0x4e4   : >> { %7033 = vrcp.f32 %v1510_v58 }
 0x4e5   : >> { %5590 = vmatprep.mubr.f32.mxu0 %v1543_v12 }
 0x4e6   : >> { %5591 = vmatmul.mubr.f32.gmra.mrb[20].mxu0 %v1544_v61  ;;  %v7030_v63 = vpop.eup %7029 }
 0x4e7   : >> { %v1508_v3 = vpop.xlane.xlu0 %1507  ;;  %v1546_v17 = vmul.f32 %v7030_v63, %v7972_v59 }
 0x4e8   : >> { %7035 = vrcp.f32 %v1508_v3 }
 0x4ea   : >> { %v7032_v0 = vpop.eup %7031 }
 0x4eb   : >> { %v1512_v26 = vpop.xlane.xlu0 %1511  ;;  %v1545_v32 = vmul.f32 %v7032_v0, %v7978_v1 }
 0x4ec   : >> { %7037 = vrcp.f32 %v1512_v26 }
 0x4ed   : >> { %5593 = vmatprep.mubr.f32.mxu0 %v1545_v32 }
 0x4ee   : >> { %5594 = vmatmul.mubr.f32.gmra.mrb[22].mxu0 %v1546_v17  ;;  %v7034_v30 = vpop.eup %7033 }
 0x4ef   : >> { %v1548_v15 = vmul.f32 %v7034_v30, %v7982_v24  ;;  %v1518_v20 = vpop.xlane.xlu0 %1517 }
 0x4f2   : >> { %v7036_v29 = vpop.eup %7035 }
 0x4f3   : >> { %v1547_v11 = vmul.f32 %v7036_v29, %v7986_v5  ;;  %v1516_v62 = vpop.xlane.xlu0 %1515 }
 0x4f4   : >> { %7039 = vrcp.f32 %v1516_v62 }
 0x4f5   : >> { %5596 = vmatprep.mubr.f32.mxu0 %v1547_v11 }
 0x4f6   : >> { %v7038_v21 = vpop.eup %7037  ;;  %5597 = vmatmul.mubr.f32.gmra.mrb[24].mxu0 %v1548_v15 }
 0x4f7   : >> { %v1549_v23 = vmul.f32 %v7038_v21, %v7989_v16  ;;  %v1520_v22 = vpop.xlane.xlu0 %1519 }
 0x4f9   : >> { %5599 = vmatprep.mubr.f32.mxu0 %v1549_v23 }
 0x4fb   : >> { %v1765_v25 = vpop.permute.xlu0 %1764 }
 0x4fe   : >> { %v7040_v5 = vpop.eup %7039 }
 0x4ff   : >> { %v1551_v16 = vmul.f32 %v7040_v5, %v7997_v6  ;;  %v1777_v7 = vpop.permute.xlu0 %1776 }
 0x500   : >> { %v1514_v1 = vpop.xlane.xlu1 %1513 }
 0x501   : >> { %7041 = vrcp.f32 %v1514_v1 }
 0x502   : >> { %7043 = vrcp.f32 %v1518_v20 }
 0x503   : >> { %7045 = vrcp.f32 %v1520_v22  ;;  %v1781_v26 = vpop.permute.xlu0 %1780 }
 0x504   : >> { %v1522_v59 = vpop.xlane.xlu1 %1521 }
 0x505   : >> { %7047 = vrcp.f32 %v1522_v59 }
 0x508   : >> { %v1767_v4 = vpop.permute.xlu1 %1766 }
 0x50b   : >> { %v7042_v24 = vpop.eup %7041 }
 0x50c   : >> { %v1769_v10 = vpop.permute.xlu1 %1768  ;;  %v1550_v57 = vmul.f32 %v7042_v24, %v8003_v27  ;;  %v7044_v28 = vpop.eup %7043 }
 0x50d   : >> { %v7046_v2 = vpop.eup %7045  ;;  %v1552_v12 = vmul.f32 %v7044_v28, %v7993_v14  ;;  %v1785_v27 = vpop.permute.xlu0 %1784 }
 0x50e   : >> { %5600 = vmatmul.mubr.f32.gmra.mrb[26].mxu0 %v1550_v57  ;;  %v1553_v3 = vmul.f32 %v7046_v2, %v8000_v31 }
 0x50f   : >> { %5602 = vmatprep.mubr.f32.mxu0 %v1551_v16  ;;  %v7048_v61 = vpop.eup %7047 }
 0x510   : >> { %v1771_v58 = vpop.permute.xlu1 %1770  ;;  %v1554_v0 = vmul.f32 %v7048_v61, %v8006_v19 }
 0x511   : >> { %v1789_v31 = vpop.permute.xlu0 %1788 }
 0x512   : >> { %5603 = vmatmul.mubr.f32.gmra.mrb[28].mxu0 %v1552_v12 }
 0x513   : >> { %5605 = vmatprep.mubr.f32.mxu0 %v1553_v3 }
 0x514   : >> { %v1773_v63 = vpop.permute.xlu1 %1772 }
 0x515   : >> { %v1793_v17 = vpop.permute.xlu0 %1792 }
 0x516   : >> { %5606 = vmatmul.mubr.f32.gmra.mrb[30].mxu0 %v1554_v0 }
 0x517   : >> { %5640 = vmatprep.mubr.msk.f32.mxu0 %vm1185_vm5, %v1765_v25 }
 0x518   : >> { %v1775_v6 = vpop.permute.xlu1 %1774 }
 0x519   : >> { %v6792_v11 = vpop.permute.xlu0 %6791 }
 0x51a   : >> { %5641 = vmatmul.mubr.msk.f32.vlgmr.msra.gmra.mrb[32].mxu0 %vm1185_vm5, %v1767_v4  ;;  %v6794_v20 = vunpack.i.h.bf16 %v6792_v11  ;;  %v6793_v21 = vunpack.i.l.bf16 %v6792_v11 }
 0x51b   : >> { %5643 = vmatprep.mubr.msk.f32.mxu0 %vm1185_vm5, %v1769_v10 }
 0x51c   : >> { %v1779_v32 = vpop.permute.xlu1 %1778  ;;  %v6235_v5 = vpack.c.bf16 %v6794_v20, %v6793_v21 }
 0x51d   : >> { %v6802_v25 = vpop.permute.xlu0 %6801 }
 0x51e   : >> { %5644 = vmatmul.mubr.msk.f32.gmra.mrb[34].mxu0 %vm1185_vm5, %v1771_v58  ;;  %v6804_v24 = vunpack.i.h.bf16 %v6802_v25  ;;  %v6803_v10 = vunpack.i.l.bf16 %v6802_v25 }
 0x51f   : >> { %5646 = vmatprep.mubr.msk.f32.mxu0 %vm1185_vm5, %v1773_v63 }
 0x520   : >> { %v1783_v14 = vpop.permute.xlu1 %1782 }
 0x521   : >> { %v6812_v58 = vpop.permute.xlu0 %6811 }
 0x522   : >> { %5647 = vmatmul.mubr.msk.f32.gmra.mrb[36].mxu0 %vm1185_vm5, %v1775_v6  ;;  %v6814_v61 = vunpack.i.h.bf16 %v6812_v58  ;;  %v6813_v3 = vunpack.i.l.bf16 %v6812_v58 }
 0x523   : >> { %5649 = vmatprep.mubr.msk.f32.mxu0 %vm1185_vm5, %v1777_v7  ;;  %v6243_v7 = vpack.c.bf16 %v6804_v24, %v6803_v10 }
 0x524   : >> { %v1787_v19 = vpop.permute.xlu1 %1786  ;;  %v6251_v6 = vpack.c.bf16 %v6814_v61, %v6813_v3 }
 0x526   : >> { %5650 = vmatmul.mubr.msk.f32.gmra.mrb[38].mxu0 %vm1185_vm5, %v1779_v32 }
 0x527   : >> { %5652 = vmatprep.mubr.msk.f32.mxu0 %vm1185_vm5, %v1781_v26 }
 0x528   : >> { %v1791_v30 = vpop.permute.xlu1 %1790 }
 0x52a   : >> { %5653 = vmatmul.mubr.msk.f32.gmra.mrb[40].mxu0 %vm1185_vm5, %v1783_v14 }
 0x52b   : >> { %5655 = vmatprep.mubr.msk.f32.mxu0 %vm1185_vm5, %v1785_v27 }
 0x52c   : >> { %v1795_v29 = vpop.permute.xlu1 %1794 }
 0x52e   : >> { %5656 = vmatmul.mubr.msk.f32.gmra.mrb[42].mxu0 %vm1185_vm5, %v1787_v19 }
 0x52f   : >> { %5658 = vmatprep.mubr.msk.f32.mxu0 %vm1185_vm5, %v1789_v31 }
 0x530   : >> { %v6787_v15 = vpop.permute.xlu1 %6786 }
 0x531   : >> { %v6789_v23 = vunpack.i.h.bf16 %v6787_v15  ;;  %v6788_v62 = vunpack.i.l.bf16 %v6787_v15 }
 0x532   : >> { %5659 = vmatmul.mubr.msk.f32.gmra.mrb[44].mxu0 %vm1185_vm5, %v1791_v30 }
 0x533   : >> { %5661 = vmatprep.mubr.msk.f32.mxu0 %vm1185_vm5, %v1793_v17  ;;  %v6231_v1 = vpack.c.bf16 %v6789_v23, %v6788_v62 }
 0x534   : >> { %v6797_v22 = vpop.permute.xlu1 %6796 }
 0x535   : >> { %v6799_v59 = vunpack.i.h.bf16 %v6797_v22  ;;  %v6798_v4 = vunpack.i.l.bf16 %v6797_v22  ;;  %6232 = vmatprep.subr.bf16.mxu1 %v6231_v1 }
 0x536   : >> { %5662 = vmatmul.mubr.msk.f32.gmra.mrb[46].mxu0 %vm1185_vm5, %v1795_v29  ;;  %6234 = vmatpush3.bf16.msra.mxu1 %v6231_v1 }
 0x537   : >> { %6236 = vmatprep.subr.bf16.mxu1 %v6235_v5  ;;  %v6239_v57 = vpack.c.bf16 %v6799_v59, %v6798_v4 }
 0x538   : >> { %v6807_v28 = vpop.permute.xlu1 %6806 }
 0x539   : >> { %v6809_v16 = vunpack.i.h.bf16 %v6807_v28  ;;  %v6808_v2 = vunpack.i.l.bf16 %v6807_v28 }
 0x53a   : >> { %6238 = vmatpush3.bf16.msra.mxu1 %v6235_v5 }
 0x53b   : >> { %6240 = vmatprep.subr.bf16.mxu1 %v6239_v57  ;;  %v6247_v63 = vpack.c.bf16 %v6809_v16, %v6808_v2 }
 0x53c   : >> { %v6817_v12 = vpop.permute.xlu1 %6816 }
 0x53d   : >> { %v6819_v0 = vunpack.i.h.bf16 %v6817_v12  ;;  %v6818_v26 = vunpack.i.l.bf16 %v6817_v12 }
 0x53e   : >> { %6242 = vmatpush3.bf16.msra.mxu1 %v6239_v57 }
 0x53f   : >> { %6244 = vmatprep.subr.bf16.mxu1 %v6243_v7  ;;  %v6255_v31 = vpack.c.bf16 %v6819_v0, %v6818_v26 }
 0x540   : >> { %v6822_v27 = vpop.permute.xlu1 %6821 }
 0x541   : >> { %v6824_v32 = vunpack.i.h.bf16 %v6822_v27  ;;  %v6823_v14 = vunpack.i.l.bf16 %v6822_v27 }
 0x542   : >> { %6246 = vmatpush3.bf16.msra.mxu1 %v6243_v7 }
 0x543   : >> { %6248 = vmatprep.subr.bf16.mxu1 %v6247_v63  ;;  %v6259_v19 = vpack.c.bf16 %v6824_v32, %v6823_v14 }
 0x546   : >> { %6250 = vmatpush3.bf16.msra.mxu1 %v6247_v63 }
 0x547   : >> { %6252 = vmatprep.subr.bf16.mxu1 %v6251_v6 }
 0x54a   : >> { %6254 = vmatpush3.bf16.msra.mxu1 %v6251_v6 }
 0x54b   : >> { %6256 = vmatprep.subr.bf16.mxu1 %v6255_v31 }
 0x54e   : >> { %6258 = vmatpush3.bf16.msra.mxu1 %v6255_v31 }
 0x54f   : >> { %6260 = vmatprep.subr.bf16.mxu1 %v6259_v19 }
 0x552   : >> { %6262 = vmatpush3.bf16.msra.mxu1 %v6259_v19 }
 0x578   : >> { %v5586_v17 = vpop.f32.mrb[16].mxu0 }
 0x579   : >> { %1749 = vst.msk [vmem:[#allocation2 + $0x8] sm:$0xff] %vm1185_vm5, %v5586_v17  ;;  %v1669_v30 = vpop.f32.mrb[17].mxu0 }
 0x57a   : >> { %1748 = vst.msk [vmem:[#allocation2] sm:$0xff] %vm1185_vm5, %v1669_v30 }
 0x5b2   : >> { %v5589_v29 = vpop.f32.mrb[18].mxu0 }
 0x5b3   : >> { %1751 = vst.msk [vmem:[#allocation2 + $0x18] sm:$0xff] %vm1185_vm5, %v5589_v29  ;;  %v1679_v11 = vpop.f32.mrb[19].mxu0 }
 0x5b4   : >> { %1750 = vst.msk [vmem:[#allocation2 + $0x10] sm:$0xff] %vm1185_vm5, %v1679_v11 }
 0x5b9   : >> { %v5592_v15 = vpop.f32.mrb[20].mxu0 }
 0x5ba   : >> { %1753 = vst.msk [vmem:[#allocation2 + $0x28] sm:$0xff] %vm1185_vm5, %v5592_v15  ;;  %v1689_v20 = vpop.f32.mrb[21].mxu0 }
 0x5bb   : >> { %1752 = vst.msk [vmem:[#allocation2 + $0x20] sm:$0xff] %vm1185_vm5, %v1689_v20 }
 0x5c1   : >> { %v5595_v21 = vpop.f32.mrb[22].mxu0 }
 0x5c2   : >> { %1755 = vst.msk [vmem:[#allocation2 + $0x38] sm:$0xff] %vm1185_vm5, %v5595_v21  ;;  %v1699_v23 = vpop.f32.mrb[23].mxu0 }
 0x5c3   : >> { %1754 = vst.msk [vmem:[#allocation2 + $0x30] sm:$0xff] %vm1185_vm5, %v1699_v23 }
 0x5c9   : >> { %v5598_v62 = vpop.f32.mrb[24].mxu0 }
 0x5ca   : >> { %1757 = vst.msk [vmem:[#allocation2 + $0x48] sm:$0xff] %vm1185_vm5, %v5598_v62  ;;  %v1709_v1 = vpop.f32.mrb[25].mxu0 }
 0x5cb   : >> { %1756 = vst.msk [vmem:[#allocation2 + $0x40] sm:$0xff] %vm1185_vm5, %v1709_v1 }
 0x5e1   : >> { %v5601_v22 = vpop.f32.mrb[26].mxu0 }
 0x5e2   : >> { %1759 = vst.msk [vmem:[#allocation2 + $0x58] sm:$0xff] %vm1185_vm5, %v5601_v22  ;;  %v1719_v59 = vpop.f32.mrb[27].mxu0 }
 0x5e3   : >> { %1758 = vst.msk [vmem:[#allocation2 + $0x50] sm:$0xff] %vm1185_vm5, %v1719_v59 }
 0x5e5   : >> { %v5604_v4 = vpop.f32.mrb[28].mxu0 }
 0x5e6   : >> { %1761 = vst.msk [vmem:[#allocation2 + $0x68] sm:$0xff] %vm1185_vm5, %v5604_v4  ;;  %v1729_v5 = vpop.f32.mrb[29].mxu0 }
 0x5e7   : >> { %1760 = vst.msk [vmem:[#allocation2 + $0x60] sm:$0xff] %vm1185_vm5, %v1729_v5 }
 0x5e9   : >> { %v5607_v25 = vpop.f32.mrb[30].mxu0 }
 0x5ea   : >> { %1763 = vst.msk [vmem:[#allocation2 + $0x78] sm:$0xff] %vm1185_vm5, %v5607_v25  ;;  %v1739_v24 = vpop.f32.mrb[31].mxu0 }
 0x5eb   : >> { %1762 = vst.msk [vmem:[#allocation2 + $0x70] sm:$0xff] %vm1185_vm5, %v1739_v24 }
 0x5ed   : >> { %v5642_v10 = vpop.f32.mrb[32].mxu0 }
 0x5ee   : >> { %v1958_v57 = vpop.f32.mrb[33].mxu0  ;;  %v2038_v28 = vsel %vm915_vm2, -1e+30, %v5642_v10 }
 0x5ef   : >> { %2055 = vmax.xlane.f32.xlu1 %v2038_v28  ;;  %v2037_v16 = vsel %vm915_vm2, -1e+30, %v1958_v57 }
 0x5f0   : >> { %2053 = vmax.xlane.f32.xlu0 %v2037_v16 }
 0x5f1   : >> { %v5645_v2 = vpop.f32.mrb[34].mxu0 }
 0x5f2   : >> { %v1968_v7 = vpop.f32.mrb[35].mxu0  ;;  %v2040_v19 = vsel %vm915_vm2, -1e+30, %v5645_v2 }
 0x5f3   : >> { %v2039_v17 = vsel %vm915_vm2, -1e+30, %v1968_v7 }
 0x5f5   : >> { %v5648_v58 = vpop.f32.mrb[36].mxu0 }
 0x5f6   : >> { %v1978_v12 = vpop.f32.mrb[37].mxu0  ;;  %v2042_v29 = vsel %vm915_vm2, -1e+30, %v5648_v58 }
 0x5f7   : >> { %v2041_v30 = vsel %vm915_vm2, -1e+30, %v1978_v12 }
 0x5f9   : >> { %v5651_v61 = vpop.f32.mrb[38].mxu0 }
 0x5fa   : >> { %v1988_v3 = vpop.f32.mrb[39].mxu0  ;;  %v8169_v15 = vsel %vm915_vm2, -1e+30, %v5651_v61 }
 0x5fb   : >> { %v8164_v11 = vsel %vm915_vm2, -1e+30, %v1988_v3 }
 0x5fd   : >> { %v5654_v63 = vpop.f32.mrb[40].mxu0 }
 0x5fe   : >> { %v1998_v0 = vpop.f32.mrb[41].mxu0  ;;  %v8179_v21 = vsel %vm915_vm2, -1e+30, %v5654_v63 }
 0x5ff   : >> { %v8174_v20 = vsel %vm915_vm2, -1e+30, %v1998_v0 }
 0x600   : >> { %6831 = vrot.lane.b32.xlu1 %v7722_v38, %s7398_s22 }
 0x601   : >> { %v5657_v26 = vpop.f32.mrb[42].mxu0 }
 0x602   : >> { %v2008_v6 = vpop.f32.mrb[43].mxu0  ;;  %v8189_v62 = vsel %vm915_vm2, -1e+30, %v5657_v26 }
 0x603   : >> { %v8184_v23 = vsel %vm915_vm2, -1e+30, %v2008_v6 }
 0x604   : >> { %6836 = vrot.lane.b32.xlu1 %v7732_v41, %s7398_s22 }
 0x605   : >> { %v5660_v27 = vpop.f32.mrb[44].mxu0 }
 0x606   : >> { %6826 = vrot.lane.b32.xlu0 %v7712_v35, %s7398_s22  ;;  %v2018_v32 = vpop.f32.mrb[45].mxu0  ;;  %v8199_v22 = vsel %vm915_vm2, -1e+30, %v5660_v27 }
 0x607   : >> { %v8194_v1 = vsel %vm915_vm2, -1e+30, %v2018_v32 }
 0x608   : >> { %6841 = vrot.lane.b32.xlu1 %v7742_v44, %s7398_s22 }
 0x609   : >> { %v5663_v14 = vpop.f32.mrb[46].mxu0 }
 0x60a   : >> { %v2028_v31 = vpop.f32.mrb[47].mxu0  ;;  %v8209_v4 = vsel %vm915_vm2, -1e+30, %v5663_v14 }
 0x60b   : >> { %v8204_v59 = vsel %vm915_vm2, -1e+30, %v2028_v31 }
 0x625   : >> { %2059 = vmax.xlane.f32.xlu0 %v2040_v19 }
 0x629   : >> { %2057 = vmax.xlane.f32.xlu0 %v2039_v17 }
 0x62c   : >> { %2061 = vmax.xlane.f32.xlu1 %v2041_v30 }
 0x62d   : >> { %2063 = vmax.xlane.f32.xlu0 %v2042_v29 }
 0x630   : >> { %2065 = vmax.xlane.f32.xlu1 %v8164_v11 }
 0x631   : >> { %2067 = vmax.xlane.f32.xlu0 %v8169_v15 }
 0x634   : >> { %2069 = vmax.xlane.f32.xlu1 %v8174_v20 }
 0x635   : >> { %2071 = vmax.xlane.f32.xlu0 %v8179_v21 }
 0x638   : >> { %2073 = vmax.xlane.f32.xlu1 %v8184_v23 }
 0x639   : >> { %2075 = vmax.xlane.f32.xlu0 %v8189_v62 }
 0x63c   : >> { %2077 = vmax.xlane.f32.xlu1 %v8194_v1 }
 0x63d   : >> { %2079 = vmax.xlane.f32.xlu0 %v8199_v22 }
 0x640   : >> { %2081 = vmax.xlane.f32.xlu1 %v8204_v59 }
 0x641   : >> { %2083 = vmax.xlane.f32.xlu0 %v8209_v4 }
 0x651   : >> { %6851 = vrot.lane.b32.xlu1 %v7762_v50, %s7398_s22 }
 0x655   : >> { %6856 = vrot.lane.b32.xlu1 %v7772_v53, %s7398_s22 }
 0x67c   : >> { %v2056_v5 = vpop.xlane.xlu1 %2055 }
 0x67d   : >> { %v2086_v25 = vsub.f32 %v2038_v28, %v2056_v5  ;;  %v2054_v24 = vpop.xlane.xlu0 %2053 }
 0x67e   : >> { %v2085_v10 = vsub.f32 %v2037_v16, %v2054_v24 }
 0x67f   : >> { %v2103_v57 = vmul.f32 1.442695, %v2086_v25 }
 0x680   : >> { %v2101_v2 = vmul.f32 1.442695, %v2085_v10  ;;  %v8229_v28 = vpop.permute.xlu1 %6831 }
 0x681   : >> { %7049 = vpow2.f32 %v2103_v57  ;;  %v6827_v7 = vpop.permute.xlu0 %6826 }
 0x682   : >> { %7051 = vpow2.f32 %v2101_v2  ;;  %v6829_v58 = vunpack.i.h.bf16 %v6827_v7  ;;  %v6828_v12 = vunpack.i.l.bf16 %v6827_v7 }
 0x684   : >> { %v8216_v61 = vpack.c.bf16 %v6829_v58, %v6828_v12  ;;  %v8231_v16 = vpop.permute.xlu1 %6836 }
 0x686   : >> { %6265 = vmatprep.subr.msk.bf16.mxu1 %vm7796_vm6, %v8216_v61 }
 0x688   : >> { %v8233_v6 = vpop.permute.xlu1 %6841 }
 0x68b   : >> { %v8221_v3 = vpop.eup %7049 }
 0x68c   : >> { %v8223_v63 = vpop.eup %7051  ;;  %2135 = vadd.xlane.f32.xlu0 %v8221_v3 }
 0x68d   : >> { %2133 = vadd.xlane.f32.xlu1 %v8223_v63 }
 0x6a2   : >> { %6846 = vrot.lane.b32.xlu0 %v7752_v47, %s7398_s22 }
 0x6b2   : >> { %v2060_v0 = vpop.xlane.xlu0 %2059 }
 0x6b3   : >> { %v2088_v26 = vsub.f32 %v2040_v19, %v2060_v0 }
 0x6b5   : >> { %v2107_v27 = vmul.f32 1.442695, %v2088_v26 }
 0x6b6   : >> { %v2058_v32 = vpop.xlane.xlu0 %2057 }
 0x6b7   : >> { %7053 = vpow2.f32 %v2107_v27  ;;  %v2087_v14 = vsub.f32 %v2039_v17, %v2058_v32 }
 0x6b9   : >> { %v2105_v31 = vmul.f32 1.442695, %v2087_v14  ;;  %v2062_v5 = vpop.xlane.xlu1 %2061 }
 0x6ba   : >> { %v2064_v25 = vpop.xlane.xlu0 %2063  ;;  %v2089_v24 = vsub.f32 %v2041_v30, %v2062_v5 }
 0x6bb   : >> { %7055 = vpow2.f32 %v2105_v31  ;;  %v2090_v10 = vsub.f32 %v2042_v29, %v2064_v25 }
 0x6bc   : >> { %v2109_v7 = vmul.f32 1.442695, %v2089_v24 }
 0x6bd   : >> { %v2111_v57 = vmul.f32 1.442695, %v2090_v10  ;;  %v2066_v12 = vpop.xlane.xlu1 %2065 }
 0x6be   : >> { %v2068_v2 = vpop.xlane.xlu0 %2067  ;;  %v2091_v17 = vsub.f32 %v8164_v11, %v2066_v12 }
 0x6bf   : >> { %7057 = vpow2.f32 %v2111_v57  ;;  %v2092_v58 = vsub.f32 %v8169_v15, %v2068_v2 }
 0x6c0   : >> { %7059 = vpow2.f32 %v2109_v7  ;;  %v2113_v29 = vmul.f32 1.442695, %v2091_v17 }
 0x6c1   : >> { %v8236_v19 = vpop.eup %7053  ;;  %v2115_v0 = vmul.f32 1.442695, %v2092_v58  ;;  %v2070_v30 = vpop.xlane.xlu1 %2069 }
 0x6c2   : >> { %2139 = vadd.xlane.f32.xlu1 %v8236_v19  ;;  %v2072_v26 = vpop.xlane.xlu0 %2071  ;;  %v2093_v31 = vsub.f32 %v8174_v20, %v2070_v30 }
 0x6c3   : >> { %7061 = vpow2.f32 %v2115_v0  ;;  %v2094_v32 = vsub.f32 %v8179_v21, %v2072_v26 }
 0x6c4   : >> { %7063 = vpow2.f32 %v2113_v29  ;;  %v2117_v24 = vmul.f32 1.442695, %v2093_v31 }
 0x6c5   : >> { %v8240_v27 = vpop.eup %7055  ;;  %v2119_v11 = vmul.f32 1.442695, %v2094_v32  ;;  %v2074_v5 = vpop.xlane.xlu1 %2073 }
 0x6c6   : >> { %2137 = vadd.xlane.f32.xlu0 %v8240_v27  ;;  %v2076_v14 = vpop.xlane.xlu0 %2075  ;;  %v2095_v10 = vsub.f32 %v8184_v23, %v2074_v5 }
 0x6c7   : >> { %7065 = vpow2.f32 %v2119_v11 }
 0x6c8   : >> { %7067 = vpow2.f32 %v2117_v24  ;;  %v2121_v7 = vmul.f32 1.442695, %v2095_v10 }
 0x6c9   : >> { %v8244_v15 = vpop.eup %7057  ;;  %v2078_v2 = vpop.xlane.xlu1 %2077 }
 0x6ca   : >> { %2143 = vadd.xlane.f32.xlu0 %v8244_v15  ;;  %v8248_v25 = vpop.eup %7059  ;;  %v2080_v57 = vpop.xlane.xlu0 %2079  ;;  %7069 = vpow2.f32 %v2121_v7  ;;  %v2097_v23 = vsub.f32 %v8194_v1, %v2078_v2  ;;  %v2096_v1 = vsub.f32 %v8189_v62, %v2076_v14 }
 0x6cb   : >> { %v2098_v20 = vsub.f32 %v8199_v22, %v2080_v57 }
 0x6cc   : >> { %v2125_v26 = vmul.f32 1.442695, %v2097_v23  ;;  %v2123_v5 = vmul.f32 1.442695, %v2096_v1 }
 0x6cd   : >> { %v8252_v21 = vpop.eup %7061  ;;  %v2127_v12 = vmul.f32 1.442695, %v2098_v20  ;;  %v2082_v17 = vpop.xlane.xlu1 %2081 }
 0x6ce   : >> { %2141 = vadd.xlane.f32.xlu0 %v8248_v25  ;;  %v8258_v58 = vpop.eup %7063  ;;  %v2099_v22 = vsub.f32 %v8204_v59, %v2082_v17  ;;  %v2084_v11 = vpop.xlane.xlu0 %2083  ;;  %v6834_v17 = vunpack.i.h.bf16 %v8229_v28 }
 0x6cf   : >> { %7071 = vpow2.f32 %v2127_v12  ;;  %v2100_v59 = vsub.f32 %v8209_v4, %v2084_v11  ;;  %v6843_v11 = vunpack.i.l.bf16 %v8233_v6 }
 0x6d0   : >> { %7073 = vpow2.f32 %v2125_v26  ;;  %v2129_v29 = vmul.f32 1.442695, %v2099_v22  ;;  %v6833_v26 = vunpack.i.l.bf16 %v8229_v28 }
 0x6d1   : >> { %v8262_v0 = vpop.eup %7065  ;;  %v2131_v10 = vmul.f32 1.442695, %v2100_v59  ;;  %v6852_v4 = vpop.permute.xlu1 %6851 }
 0x6d2   : >> { %2147 = vadd.xlane.f32.xlu0 %v8252_v21  ;;  %v8266_v30 = vpop.eup %7067  ;;  %7075 = vpow2.f32 %v2129_v29  ;;  %v6269_v1 = vpack.c.bf16 %v6834_v17, %v6833_v26 }
 0x6d3   : >> { %6861 = vrot.lane.b32.xlu1 %v7782_v56, %s7398_s22  ;;  %7077 = vpow2.f32 %v2123_v5  ;;  %s3901_s22 = scalar_lea.vmem %s9297_s7, %s7666_s24 }
 0x6d4   : >> { %v8269_v32 = vpop.eup %7069  ;;  %7079 = vpow2.f32 %v2131_v10 }
 0x6d5   : >> { %v6857_v2 = vpop.permute.xlu1 %6856 }
 0x6d6   : >> { %2145 = vadd.xlane.f32.xlu0 %v8258_v58  ;;  %v6858_v17 = vunpack.i.l.bf16 %v6857_v2 }
 0x6d9   : >> { %v8273_v31 = vpop.eup %7071 }
 0x6da   : >> { %2151 = vadd.xlane.f32.xlu0 %v8262_v0  ;;  %v8277_v24 = vpop.eup %7073 }
 0x6dc   : >> { %v8280_v57 = vpop.eup %7075 }
 0x6dd   : >> { %v8283_v62 = vpop.eup %7077 }
 0x6de   : >> { %2149 = vadd.xlane.f32.xlu0 %v8266_v30  ;;  %v8286_v14 = vpop.eup %7079 }
 0x6e2   : >> { %2153 = vadd.xlane.f32.xlu0 %v8269_v32 }
 0x6e6   : >> { %2159 = vadd.xlane.f32.xlu0 %v8273_v31 }
 0x6ea   : >> { %2157 = vadd.xlane.f32.xlu0 %v8277_v24 }
 0x6ee   : >> { %2161 = vadd.xlane.f32.xlu0 %v8280_v57 }
 0x6f7   : >> { %2155 = vadd.xlane.f32.xlu1 %v8283_v62 }
 0x6fb   : >> { %2163 = vadd.xlane.f32.xlu1 %v8286_v14 }
 0x704   : >> { %2471 = vrot.lane.b32.xlu0 %v7706_v34, %s7399_s23 }
 0x708   : >> { %2483 = vrot.lane.b32.xlu0 %v7738_v43, %s7399_s23 }
 0x70c   : >> { %2473 = vrot.lane.b32.xlu1 %v7704_v33, %s7399_s23  ;;  %2487 = vrot.lane.b32.xlu0 %v7748_v46, %s7399_s23 }
 0x710   : >> { %2475 = vrot.lane.b32.xlu1 %v7718_v37, %s7399_s23  ;;  %2491 = vrot.lane.b32.xlu0 %v7758_v49, %s7399_s23 }
 0x714   : >> { %2477 = vrot.lane.b32.xlu1 %v7716_v36, %s7399_s23  ;;  %2495 = vrot.lane.b32.xlu0 %v7768_v52, %s7399_s23 }
 0x718   : >> { %2479 = vrot.lane.b32.xlu1 %v7728_v40, %s7399_s23  ;;  %2499 = vrot.lane.b32.xlu0 %v7778_v55, %s7399_s23 }
 0x719   : >> { %v2136_v7 = vpop.xlane.xlu0 %2135 }
 0x71a   : >> { %7081 = vrcp.f32 %v2136_v7  ;;  %v2134_v20 = vpop.xlane.xlu1 %2133  ;;  %v6854_v7 = vunpack.i.h.bf16 %v6852_v4 }
 0x71b   : >> { %7083 = vrcp.f32 %v2134_v20  ;;  %v6853_v20 = vunpack.i.l.bf16 %v6852_v4 }
 0x71c   : >> { %2481 = vrot.lane.b32.xlu1 %v7726_v39, %s7399_s23  ;;  %6871 = vrot.lane.b32.xlu0 %v7722_v38, %s7400_s25 }
 0x71d   : >> { %v6847_v5 = vpop.permute.xlu0 %6846 }
 0x71e   : >> { %v6849_v59 = vunpack.i.h.bf16 %v6847_v5  ;;  %v6848_v10 = vunpack.i.l.bf16 %v6847_v5 }
 0x720   : >> { %2485 = vrot.lane.b32.xlu1 %v7734_v42, %s7399_s23  ;;  %6881 = vrot.lane.b32.xlu0 %v7742_v44, %s7400_s25 }
 0x724   : >> { %v7082_v23 = vpop.eup %7081  ;;  %2489 = vrot.lane.b32.xlu1 %v7744_v45, %s7399_s23  ;;  %6891 = vrot.lane.b32.xlu0 %v7762_v50, %s7400_s25 }
 0x725   : >> { %v7084_v12 = vpop.eup %7083  ;;  %v2182_v29 = vmul.f32 %v7082_v23, %v8221_v3  ;;  %v6838_v3 = vunpack.i.l.bf16 %v8231_v16  ;;  %v6293_v23 = vpack.c.bf16 %v6854_v7, %v6853_v20 }
 0x726   : >> { %v2181_v22 = vmul.f32 %v7084_v12, %v8223_v63  ;;  %v6839_v63 = vunpack.i.h.bf16 %v8231_v16  ;;  %v6859_v12 = vunpack.i.h.bf16 %v6857_v2 }
 0x728   : >> { %2493 = vrot.lane.b32.xlu1 %v7754_v48, %s7399_s23  ;;  %5696 = vmatprep.mubr.f32.mxu1 %v2181_v22  ;;  %v6275_v28 = vpack.c.bf16 %v6839_v63, %v6838_v3  ;;  %v6299_v22 = vpack.c.bf16 %v6859_v12, %v6858_v17 }
 0x729   : >> { %5697 = vmatmul.mubr.f32.vlgmr.msra.gmra.mrb[16].mxu1 %v2182_v29 }
 0x72a   : >> { %6268 = vmatpush3.bf16.xpose.msk.msra.mxu1 %vm7796_vm6, %v8216_v61  ;;  %v6844_v61 = vunpack.i.h.bf16 %v8233_v6  ;;  %v6287_v6 = vpack.c.bf16 %v6849_v59, %v6848_v10 }
 0x72b   : >> { %6271 = vmatprep.subr.msk.bf16.mxu1 %vm7796_vm6, %v6269_v1 }
 0x72c   : >> { %2497 = vrot.lane.b32.xlu1 %v7764_v51, %s7399_s23  ;;  %v6281_v16 = vpack.c.bf16 %v6844_v61, %v6843_v11 }
 0x730   : >> { %2501 = vrot.lane.b32.xlu1 %v7776_v54, %s7399_s23  ;;  %s7406_s23 = smov 24  }
 0x732   : >> { %6274 = vmatpush3.bf16.xpose.msk.msra.mxu1 %vm7796_vm6, %v6269_v1 }
 0x733   : >> { %6277 = vmatprep.subr.msk.bf16.mxu1 %vm7796_vm6, %v6275_v28 }
 0x734   : >> { %6866 = vrot.lane.b32.xlu1 %v7712_v35, %s7400_s25 }
 0x738   : >> { %6876 = vrot.lane.b32.xlu1 %v7732_v41, %s7400_s25 }
 0x73a   : >> { %6280 = vmatpush3.bf16.xpose.msk.msra.mxu1 %vm7796_vm6, %v6275_v28 }
 0x73b   : >> { %6283 = vmatprep.subr.msk.bf16.mxu1 %vm7796_vm6, %v6281_v16 }
 0x73c   : >> { %6886 = vrot.lane.b32.xlu1 %v7752_v47, %s7400_s25 }
 0x740   : >> { %6896 = vrot.lane.b32.xlu1 %v7772_v53, %s7400_s25 }
 0x742   : >> { %6286 = vmatpush3.bf16.xpose.msk.msra.mxu1 %vm7796_vm6, %v6281_v16 }
 0x743   : >> { %6289 = vmatprep.subr.msk.bf16.mxu1 %vm7796_vm6, %v6287_v6 }
 0x744   : >> { %6901 = vrot.lane.b32.xlu1 %v7782_v56, %s7400_s25 }
 0x74a   : >> { %6292 = vmatpush3.bf16.xpose.msk.msra.mxu1 %vm7796_vm6, %v6287_v6 }
 0x74b   : >> { %6295 = vmatprep.subr.msk.bf16.mxu1 %vm7796_vm6, %v6293_v23 }
 0x74f   : >> { %v2140_v26 = vpop.xlane.xlu1 %2139 }
 0x750   : >> { %7085 = vrcp.f32 %v2140_v26 }
 0x752   : >> { %6298 = vmatpush3.bf16.xpose.msk.msra.mxu1 %vm7796_vm6, %v6293_v23 }
 0x753   : >> { %6301 = vmatprep.subr.msk.bf16.mxu1 %vm7796_vm6, %v6299_v22  ;;  %v2138_v29 = vpop.xlane.xlu0 %2137  ;;  %v6862_v4 = vpop.permute.xlu1 %6861 }
 0x754   : >> { %7087 = vrcp.f32 %v2138_v29  ;;  %v6864_v1 = vunpack.i.h.bf16 %v6862_v4  ;;  %v6863_v63 = vunpack.i.l.bf16 %v6862_v4 }
 0x756   : >> { %v6305_v28 = vpack.c.bf16 %v6864_v1, %v6863_v63 }
 0x757   : >> { %v2144_v3 = vpop.xlane.xlu0 %2143 }
 0x758   : >> { %7089 = vrcp.f32 %v2144_v3 }
 0x75a   : >> { %6304 = vmatpush3.bf16.xpose.msk.msra.mxu1 %vm7796_vm6, %v6299_v22  ;;  %v7086_v61 = vpop.eup %7085 }
 0x75b   : >> { %6307 = vmatprep.subr.msk.bf16.mxu1 %vm7796_vm6, %v6305_v28  ;;  %v2142_v2 = vpop.xlane.xlu0 %2141  ;;  %v2184_v59 = vmul.f32 %v7086_v61, %v8236_v19 }
 0x75c   : >> { %7091 = vrcp.f32 %v2142_v2 }
 0x75e   : >> { %v7088_v11 = vpop.eup %7087 }
 0x75f   : >> { %v2148_v16 = vpop.xlane.xlu0 %2147  ;;  %v2183_v5 = vmul.f32 %v7088_v11, %v8240_v27 }
 0x760   : >> { %7093 = vrcp.f32 %v2148_v16 }
 0x761   : >> { %5699 = vmatprep.mubr.f32.mxu1 %v2183_v5 }
 0x762   : >> { %6310 = vmatpush3.bf16.xpose.msk.msra.mxu1 %vm7796_vm6, %v6305_v28  ;;  %v7090_v6 = vpop.eup %7089 }
 0x763   : >> { %5700 = vmatmul.mubr.f32.gmra.mrb[18].mxu1 %v2184_v59  ;;  %v2146_v10 = vpop.xlane.xlu0 %2145  ;;  %v2186_v12 = vmul.f32 %v7090_v6, %v8244_v15 }
 0x764   : >> { %7095 = vrcp.f32 %v2146_v10 }
 0x766   : >> { %v7092_v7 = vpop.eup %7091 }
 0x767   : >> { %v2152_v20 = vpop.xlane.xlu0 %2151  ;;  %v2185_v23 = vmul.f32 %v7092_v7, %v8248_v25 }
 0x768   : >> { %7097 = vrcp.f32 %v2152_v20 }
 0x769   : >> { %5702 = vmatprep.mubr.f32.mxu1 %v2185_v23 }
 0x76a   : >> { %5703 = vmatmul.mubr.f32.gmra.mrb[20].mxu1 %v2186_v12  ;;  %v7094_v19 = vpop.eup %7093 }
 0x76b   : >> { %v2150_v27 = vpop.xlane.xlu0 %2149  ;;  %v2188_v29 = vmul.f32 %v7094_v19, %v8252_v21 }
 0x76c   : >> { %7099 = vrcp.f32 %v2150_v27 }
 0x76e   : >> { %v7096_v17 = vpop.eup %7095 }
 0x76f   : >> { %v2154_v26 = vpop.xlane.xlu0 %2153  ;;  %v2187_v22 = vmul.f32 %v7096_v17, %v8258_v58 }
 0x770   : >> { %7101 = vrcp.f32 %v2154_v26 }
 0x771   : >> { %5705 = vmatprep.mubr.f32.mxu1 %v2187_v22 }
 0x772   : >> { %5706 = vmatmul.mubr.f32.gmra.mrb[22].mxu1 %v2188_v29  ;;  %v7098_v4 = vpop.eup %7097 }
 0x773   : >> { %v2190_v15 = vmul.f32 %v7098_v4, %v8262_v0  ;;  %v2160_v63 = vpop.xlane.xlu0 %2159 }
 0x776   : >> { %v7100_v1 = vpop.eup %7099 }
 0x777   : >> { %v2189_v25 = vmul.f32 %v7100_v1, %v8266_v30  ;;  %v2158_v2 = vpop.xlane.xlu0 %2157 }
 0x778   : >> { %7103 = vrcp.f32 %v2158_v2 }
 0x779   : >> { %5708 = vmatprep.mubr.f32.mxu1 %v2189_v25 }
 0x77a   : >> { %v7102_v3 = vpop.eup %7101  ;;  %5709 = vmatmul.mubr.f32.gmra.mrb[24].mxu1 %v2190_v15 }
 0x77b   : >> { %v2191_v28 = vmul.f32 %v7102_v3, %v8269_v32  ;;  %v2162_v61 = vpop.xlane.xlu0 %2161 }
 0x77d   : >> { %5711 = vmatprep.mubr.f32.mxu1 %v2191_v28 }
 0x77f   : >> { %v2472_v16 = vpop.permute.xlu0 %2471 }
 0x782   : >> { %v7104_v30 = vpop.eup %7103 }
 0x783   : >> { %v2193_v32 = vmul.f32 %v7104_v30, %v8277_v24  ;;  %v2484_v7 = vpop.permute.xlu0 %2483 }
 0x784   : >> { %v2156_v58 = vpop.xlane.xlu1 %2155 }
 0x785   : >> { %7105 = vrcp.f32 %v2156_v58 }
 0x786   : >> { %7107 = vrcp.f32 %v2160_v63 }
 0x787   : >> { %7109 = vrcp.f32 %v2162_v61  ;;  %v2488_v26 = vpop.permute.xlu0 %2487 }
 0x788   : >> { %v2164_v21 = vpop.xlane.xlu1 %2163 }
 0x789   : >> { %7111 = vrcp.f32 %v2164_v21 }
 0x78c   : >> { %v2474_v11 = vpop.permute.xlu1 %2473 }
 0x78f   : >> { %v7106_v0 = vpop.eup %7105 }
 0x790   : >> { %v2476_v5 = vpop.permute.xlu1 %2475  ;;  %v2192_v59 = vmul.f32 %v7106_v0, %v8283_v62  ;;  %v7108_v10 = vpop.eup %7107 }
 0x791   : >> { %v7110_v6 = vpop.eup %7109  ;;  %v2194_v23 = vmul.f32 %v7108_v10, %v8273_v31  ;;  %v2492_v62 = vpop.permute.xlu0 %2491 }
 0x792   : >> { %5712 = vmatmul.mubr.f32.gmra.mrb[26].mxu1 %v2192_v59  ;;  %v2195_v27 = vmul.f32 %v7110_v6, %v8280_v57 }
 0x793   : >> { %5714 = vmatprep.mubr.f32.mxu1 %v2193_v32  ;;  %v7112_v12 = vpop.eup %7111 }
 0x794   : >> { %v2478_v20 = vpop.permute.xlu1 %2477  ;;  %v2196_v17 = vmul.f32 %v7112_v12, %v8286_v14 }
 0x795   : >> { %v2496_v57 = vpop.permute.xlu0 %2495 }
 0x796   : >> { %5715 = vmatmul.mubr.f32.gmra.mrb[28].mxu1 %v2194_v23 }
 0x797   : >> { %5717 = vmatprep.mubr.f32.mxu1 %v2195_v27 }
 0x798   : >> { %v2480_v19 = vpop.permute.xlu1 %2479 }
 0x799   : >> { %v2500_v29 = vpop.permute.xlu0 %2499 }
 0x79a   : >> { %5718 = vmatmul.mubr.f32.gmra.mrb[30].mxu1 %v2196_v17 }
 0x79b   : >> { %5752 = vmatprep.mubr.msk.f32.mxu1 %vm1185_vm5, %v2472_v16 }
 0x79c   : >> { %v2482_v24 = vpop.permute.xlu1 %2481 }
 0x79d   : >> { %v6872_v25 = vpop.permute.xlu0 %6871 }
 0x79e   : >> { %5753 = vmatmul.mubr.msk.f32.vlgmr.msra.gmra.mrb[32].mxu1 %vm1185_vm5, %v2474_v11  ;;  %v6874_v63 = vunpack.i.h.bf16 %v6872_v25  ;;  %v6873_v3 = vunpack.i.l.bf16 %v6872_v25 }
 0x79f   : >> { %5755 = vmatprep.mubr.msk.f32.mxu1 %vm1185_vm5, %v2476_v5 }
 0x7a0   : >> { %v2486_v22 = vpop.permute.xlu1 %2485  ;;  %v6315_v30 = vpack.c.bf16 %v6874_v63, %v6873_v3 }
 0x7a1   : >> { %v6882_v16 = vpop.permute.xlu0 %6881 }
 0x7a2   : >> { %5756 = vmatmul.mubr.msk.f32.gmra.mrb[34].mxu1 %vm1185_vm5, %v2478_v20  ;;  %v6884_v0 = vunpack.i.h.bf16 %v6882_v16  ;;  %v6883_v5 = vunpack.i.l.bf16 %v6882_v16 }
 0x7a3   : >> { %5758 = vmatprep.mubr.msk.f32.mxu1 %vm1185_vm5, %v2480_v19 }
 0x7a4   : >> { %v2490_v31 = vpop.permute.xlu1 %2489 }
 0x7a5   : >> { %v6892_v20 = vpop.permute.xlu0 %6891 }
 0x7a6   : >> { %5759 = vmatmul.mubr.msk.f32.gmra.mrb[36].mxu1 %vm1185_vm5, %v2482_v24  ;;  %v6894_v12 = vunpack.i.h.bf16 %v6892_v20  ;;  %v6893_v27 = vunpack.i.l.bf16 %v6892_v20 }
 0x7a7   : >> { %5761 = vmatprep.mubr.msk.f32.mxu1 %vm1185_vm5, %v2484_v7  ;;  %v6323_v7 = vpack.c.bf16 %v6884_v0, %v6883_v5 }
 0x7a8   : >> { %v2494_v14 = vpop.permute.xlu1 %2493  ;;  %v6331_v24 = vpack.c.bf16 %v6894_v12, %v6893_v27 }
 0x7aa   : >> { %5762 = vmatmul.mubr.msk.f32.gmra.mrb[38].mxu1 %vm1185_vm5, %v2486_v22 }
 0x7ab   : >> { %5764 = vmatprep.mubr.msk.f32.mxu1 %vm1185_vm5, %v2488_v26 }
 0x7ac   : >> { %v2498_v4 = vpop.permute.xlu1 %2497 }
 0x7ae   : >> { %5765 = vmatmul.mubr.msk.f32.gmra.mrb[40].mxu1 %vm1185_vm5, %v2490_v31 }
 0x7af   : >> { %5767 = vmatprep.mubr.msk.f32.mxu1 %vm1185_vm5, %v2492_v62 }
 0x7b0   : >> { %v2502_v1 = vpop.permute.xlu1 %2501 }
 0x7b2   : >> { %5768 = vmatmul.mubr.msk.f32.gmra.mrb[42].mxu1 %vm1185_vm5, %v2494_v14 }
 0x7b3   : >> { %5770 = vmatprep.mubr.msk.f32.mxu1 %vm1185_vm5, %v2496_v57 }
 0x7b4   : >> { %v6867_v15 = vpop.permute.xlu1 %6866 }
 0x7b5   : >> { %v6869_v28 = vunpack.i.h.bf16 %v6867_v15  ;;  %v6868_v2 = vunpack.i.l.bf16 %v6867_v15 }
 0x7b6   : >> { %5771 = vmatmul.mubr.msk.f32.gmra.mrb[44].mxu1 %vm1185_vm5, %v2498_v4 }
 0x7b7   : >> { %5773 = vmatprep.mubr.msk.f32.mxu1 %vm1185_vm5, %v2500_v29  ;;  %v6311_v58 = vpack.c.bf16 %v6869_v28, %v6868_v2 }
 0x7b8   : >> { %v6877_v61 = vpop.permute.xlu1 %6876 }
 0x7b9   : >> { %v6879_v21 = vunpack.i.h.bf16 %v6877_v61  ;;  %v6878_v11 = vunpack.i.l.bf16 %v6877_v61  ;;  %6312 = vmatprep.subr.bf16.mxu0 %v6311_v58 }
 0x7ba   : >> { %5774 = vmatmul.mubr.msk.f32.gmra.mrb[46].mxu1 %vm1185_vm5, %v2502_v1  ;;  %6314 = vmatpush3.bf16.msra.mxu0 %v6311_v58 }
 0x7bb   : >> { %6316 = vmatprep.subr.bf16.mxu0 %v6315_v30  ;;  %v6319_v59 = vpack.c.bf16 %v6879_v21, %v6878_v11 }
 0x7bc   : >> { %v6887_v10 = vpop.permute.xlu1 %6886 }
 0x7bd   : >> { %v6889_v32 = vunpack.i.h.bf16 %v6887_v10  ;;  %v6888_v6 = vunpack.i.l.bf16 %v6887_v10 }
 0x7be   : >> { %6318 = vmatpush3.bf16.msra.mxu0 %v6315_v30 }
 0x7bf   : >> { %6320 = vmatprep.subr.bf16.mxu0 %v6319_v59  ;;  %v6327_v19 = vpack.c.bf16 %v6889_v32, %v6888_v6 }
 0x7c0   : >> { %v6897_v23 = vpop.permute.xlu1 %6896 }
 0x7c1   : >> { %v6899_v17 = vunpack.i.h.bf16 %v6897_v23  ;;  %v6898_v26 = vunpack.i.l.bf16 %v6897_v23 }
 0x7c2   : >> { %6322 = vmatpush3.bf16.msra.mxu0 %v6319_v59 }
 0x7c3   : >> { %6324 = vmatprep.subr.bf16.mxu0 %v6323_v7  ;;  %v6335_v57 = vpack.c.bf16 %v6899_v17, %v6898_v26 }
 0x7c4   : >> { %v6902_v62 = vpop.permute.xlu1 %6901 }
 0x7c5   : >> { %v6904_v22 = vunpack.i.h.bf16 %v6902_v62  ;;  %v6903_v31 = vunpack.i.l.bf16 %v6902_v62 }
 0x7c6   : >> { %6326 = vmatpush3.bf16.msra.mxu0 %v6323_v7 }
 0x7c7   : >> { %6328 = vmatprep.subr.bf16.mxu0 %v6327_v19  ;;  %v6339_v14 = vpack.c.bf16 %v6904_v22, %v6903_v31 }
 0x7ca   : >> { %6330 = vmatpush3.bf16.msra.mxu0 %v6327_v19 }
 0x7cb   : >> { %6332 = vmatprep.subr.bf16.mxu0 %v6331_v24 }
 0x7ce   : >> { %6334 = vmatpush3.bf16.msra.mxu0 %v6331_v24 }
 0x7cf   : >> { %6336 = vmatprep.subr.bf16.mxu0 %v6335_v57 }
 0x7d2   : >> { %6338 = vmatpush3.bf16.msra.mxu0 %v6335_v57 }
 0x7d3   : >> { %6340 = vmatprep.subr.bf16.mxu0 %v6339_v14 }
 0x7d6   : >> { %6342 = vmatpush3.bf16.msra.mxu0 %v6339_v14 }
 0x7fc   : >> { %v8406_v29 = vpop.f32.mrb[16].mxu1 }
 0x7fd   : >> { %v8408_v4 = vpop.f32.mrb[17].mxu1 }
 0x836   : >> { %v8410_v1 = vpop.f32.mrb[18].mxu1 }
 0x837   : >> { %9345 = vst [vmem:[#allocation21_spill] sm:$0xff] %v8410_v1  ;;  %v8412_v25 = vpop.f32.mrb[19].mxu1 }
 0x83d   : >> { %v8414_v15 = vpop.f32.mrb[20].mxu1 }
 0x83e   : >> { %9346 = vst [vmem:[#allocation22_spill] sm:$0xff] %v8414_v15  ;;  %v8416_v63 = vpop.f32.mrb[21].mxu1 }
 0x83f   : >> { %9347 = vst [vmem:[#allocation23_spill] sm:$0xff] %v8416_v63 }
 0x845   : >> { %v8418_v3 = vpop.f32.mrb[22].mxu1 }
 0x846   : >> { %9348 = vst [vmem:[#allocation24_spill] sm:$0xff] %v8418_v3  ;;  %v8420_v28 = vpop.f32.mrb[23].mxu1 }
 0x847   : >> { %9349 = vst [vmem:[#allocation25_spill] sm:$0xff] %v8420_v28 }
 0x84d   : >> { %v8422_v2 = vpop.f32.mrb[24].mxu1 }
 0x84e   : >> { %9350 = vst [vmem:[#allocation26_spill] sm:$0xff] %v8422_v2  ;;  %v8424_v58 = vpop.f32.mrb[25].mxu1 }
 0x84f   : >> { %9351 = vst [vmem:[#allocation27_spill] sm:$0xff] %v8424_v58 }
 0x865   : >> { %v8426_v61 = vpop.f32.mrb[26].mxu1 }
 0x866   : >> { %9352 = vst [vmem:[#allocation28_spill] sm:$0xff] %v8426_v61  ;;  %v8428_v21 = vpop.f32.mrb[27].mxu1 }
 0x867   : >> { %9353 = vst [vmem:[#allocation29_spill] sm:$0xff] %v8428_v21 }
 0x869   : >> { %v8430_v11 = vpop.f32.mrb[28].mxu1 }
 0x86a   : >> { %9354 = vst [vmem:[#allocation30_spill] sm:$0xff] %v8430_v11  ;;  %v8432_v30 = vpop.f32.mrb[29].mxu1 }
 0x86b   : >> { %9355 = vst [vmem:[#allocation31_spill] sm:$0xff] %v8432_v30 }
 0x86d   : >> { %v8434_v16 = vpop.f32.mrb[30].mxu1 }
 0x86e   : >> { %9356 = vst [vmem:[#allocation32_spill] sm:$0xff] %v8434_v16  ;;  %v8436_v0 = vpop.f32.mrb[31].mxu1 }
 0x86f   : >> { %9357 = vst [vmem:[#allocation33_spill] sm:$0xff] %v8436_v0 }
 0x871   : >> { %v5754_v5 = vpop.f32.mrb[32].mxu1 }
 0x872   : >> { %v2745_v59 = vsel %vm915_vm2, -1e+30, %v5754_v5  ;;  %v2665_v10 = vpop.f32.mrb[33].mxu1 }
 0x873   : >> { %v2744_v32 = vsel %vm915_vm2, -1e+30, %v2665_v10  ;;  %2762 = vmax.xlane.f32.xlu1 %v2745_v59 }
 0x874   : >> { %2760 = vmax.xlane.f32.xlu0 %v2744_v32 }
 0x875   : >> { %v5757_v6 = vpop.f32.mrb[34].mxu1 }
 0x876   : >> { %v2675_v7 = vpop.f32.mrb[35].mxu1  ;;  %v2747_v14 = vsel %vm915_vm2, -1e+30, %v5757_v6 }
 0x877   : >> { %v2746_v5 = vsel %vm915_vm2, -1e+30, %v2675_v7 }
 0x879   : >> { %v5760_v20 = vpop.f32.mrb[36].mxu1 }
 0x87a   : >> { %v2685_v23 = vpop.f32.mrb[37].mxu1  ;;  %v2749_v9 = vsel %vm915_vm2, -1e+30, %v5760_v20 }
 0x87b   : >> { %v2748_v10 = vsel %vm915_vm2, -1e+30, %v2685_v23 }
 0x87d   : >> { %v5763_v12 = vpop.f32.mrb[38].mxu1 }
 0x87e   : >> { %v2695_v27 = vpop.f32.mrb[39].mxu1  ;;  %v8464_v6 = vsel %vm915_vm2, -1e+30, %v5763_v12 }
 0x87f   : >> { %v8460_v8 = vsel %vm915_vm2, -1e+30, %v2695_v27 }
 0x881   : >> { %v5766_v19 = vpop.f32.mrb[40].mxu1 }
 0x882   : >> { %v2705_v17 = vpop.f32.mrb[41].mxu1  ;;  %v8474_v20 = vsel %vm915_vm2, -1e+30, %v5766_v19 }
 0x883   : >> { %v8470_v7 = vsel %vm915_vm2, -1e+30, %v2705_v17 }
 0x884   : >> { %6911 = vrot.lane.b32.xlu1 %v7722_v38, %s7401_s27 }
 0x885   : >> { %v5769_v26 = vpop.f32.mrb[42].mxu1 }
 0x886   : >> { %v2715_v24 = vpop.f32.mrb[43].mxu1  ;;  %v8484_v12 = vsel %vm915_vm2, -1e+30, %v5769_v26 }
 0x887   : >> { %v8480_v23 = vsel %vm915_vm2, -1e+30, %v2715_v24 }
 0x888   : >> { %6916 = vrot.lane.b32.xlu1 %v7732_v41, %s7401_s27 }
 0x889   : >> { %v5772_v62 = vpop.f32.mrb[44].mxu1 }
 0x88a   : >> { %6906 = vrot.lane.b32.xlu0 %v7712_v35, %s7401_s27  ;;  %v2725_v22 = vpop.f32.mrb[45].mxu1  ;;  %v8494_v19 = vsel %vm915_vm2, -1e+30, %v5772_v62 }
 0x88b   : >> { %v8490_v27 = vsel %vm915_vm2, -1e+30, %v2725_v22 }
 0x88c   : >> { %6921 = vrot.lane.b32.xlu1 %v7742_v44, %s7401_s27 }
 0x88d   : >> { %v5775_v31 = vpop.f32.mrb[46].mxu1 }
 0x88e   : >> { %v2735_v57 = vpop.f32.mrb[47].mxu1  ;;  %v8504_v26 = vsel %vm915_vm2, -1e+30, %v5775_v31 }
 0x88f   : >> { %v8500_v17 = vsel %vm915_vm2, -1e+30, %v2735_v57 }
 0x8a9   : >> { %2766 = vmax.xlane.f32.xlu0 %v2747_v14 }
 0x8ad   : >> { %2764 = vmax.xlane.f32.xlu0 %v2746_v5 }
 0x8b0   : >> { %2768 = vmax.xlane.f32.xlu1 %v2748_v10 }
 0x8b1   : >> { %2770 = vmax.xlane.f32.xlu0 %v2749_v9 }
 0x8b4   : >> { %2772 = vmax.xlane.f32.xlu1 %v8460_v8 }
 0x8b5   : >> { %2774 = vmax.xlane.f32.xlu0 %v8464_v6 }
 0x8b8   : >> { %2776 = vmax.xlane.f32.xlu1 %v8470_v7 }
 0x8b9   : >> { %2778 = vmax.xlane.f32.xlu0 %v8474_v20 }
 0x8bc   : >> { %2780 = vmax.xlane.f32.xlu1 %v8480_v23 }
 0x8bd   : >> { %2782 = vmax.xlane.f32.xlu0 %v8484_v12 }
 0x8c0   : >> { %2784 = vmax.xlane.f32.xlu1 %v8490_v27 }
 0x8c1   : >> { %2786 = vmax.xlane.f32.xlu0 %v8494_v19 }
 0x8c4   : >> { %2788 = vmax.xlane.f32.xlu1 %v8500_v17 }
 0x8c5   : >> { %2790 = vmax.xlane.f32.xlu0 %v8504_v26 }
 0x8d5   : >> { %6931 = vrot.lane.b32.xlu1 %v7762_v50, %s7401_s27 }
 0x8d9   : >> { %6936 = vrot.lane.b32.xlu1 %v7772_v53, %s7401_s27 }
 0x900   : >> { %v2763_v24 = vpop.xlane.xlu1 %2762 }
 0x901   : >> { %v2793_v62 = vsub.f32 %v2745_v59, %v2763_v24  ;;  %v2761_v22 = vpop.xlane.xlu0 %2760 }
 0x902   : >> { %v2792_v13 = vsub.f32 %v2744_v32, %v2761_v22 }
 0x903   : >> { %v2810_v57 = vmul.f32 1.442695, %v2793_v62 }
 0x904   : >> { %v2808_v0 = vmul.f32 1.442695, %v2792_v13  ;;  %v8525_v13 = vpop.permute.xlu1 %6911 }
 0x905   : >> { %7113 = vpow2.f32 %v2810_v57  ;;  %v6907_v30 = vpop.permute.xlu0 %6906 }
 0x906   : >> { %7115 = vpow2.f32 %v2808_v0  ;;  %v6909_v31 = vunpack.i.h.bf16 %v6907_v30  ;;  %v6908_v16 = vunpack.i.l.bf16 %v6907_v30 }
 0x908   : >> { %v8512_v21 = vpack.c.bf16 %v6909_v31, %v6908_v16  ;;  %v8527_v30 = vpop.permute.xlu1 %6916 }
 0x90a   : >> { %6345 = vmatprep.subr.msk.bf16.mxu0 %vm7796_vm6, %v8512_v21 }
 0x90c   : >> { %v8529_v59 = vpop.permute.xlu1 %6921 }
 0x90f   : >> { %v8517_v11 = vpop.eup %7113 }
 0x910   : >> { %v8519_v58 = vpop.eup %7115  ;;  %2842 = vadd.xlane.f32.xlu0 %v8517_v11 }
 0x911   : >> { %2840 = vadd.xlane.f32.xlu1 %v8519_v58 }
 0x926   : >> { %6926 = vrot.lane.b32.xlu0 %v7752_v47, %s7401_s27 }
 0x936   : >> { %v2767_v16 = vpop.xlane.xlu0 %2766 }
 0x937   : >> { %v2795_v0 = vsub.f32 %v2747_v14, %v2767_v16 }
 0x939   : >> { %v2814_v32 = vmul.f32 1.442695, %v2795_v0 }
 0x93a   : >> { %v2765_v24 = vpop.xlane.xlu0 %2764 }
 0x93b   : >> { %7117 = vpow2.f32 %v2814_v32  ;;  %v2794_v62 = vsub.f32 %v2746_v5, %v2765_v24 }
 0x93d   : >> { %v2812_v22 = vmul.f32 1.442695, %v2794_v62  ;;  %v2769_v57 = vpop.xlane.xlu1 %2768 }
 0x93e   : >> { %v2771_v31 = vpop.xlane.xlu0 %2770  ;;  %v2796_v61 = vsub.f32 %v2748_v10, %v2769_v57 }
 0x93f   : >> { %7119 = vpow2.f32 %v2812_v22  ;;  %v2797_v28 = vsub.f32 %v2749_v9, %v2771_v31 }
 0x940   : >> { %v2816_v3 = vmul.f32 1.442695, %v2796_v61 }
 0x941   : >> { %v2818_v2 = vmul.f32 1.442695, %v2797_v28  ;;  %v2773_v1 = vpop.xlane.xlu1 %2772 }
 0x942   : >> { %v2775_v63 = vpop.xlane.xlu0 %2774  ;;  %v2798_v5 = vsub.f32 %v8460_v8, %v2773_v1 }
 0x943   : >> { %7121 = vpow2.f32 %v2818_v2  ;;  %v2799_v15 = vsub.f32 %v8464_v6, %v2775_v63 }
 0x944   : >> { %7123 = vpow2.f32 %v2816_v3  ;;  %v2820_v9 = vmul.f32 1.442695, %v2798_v5 }
 0x945   : >> { %v8532_v14 = vpop.eup %7117  ;;  %v2822_v16 = vmul.f32 1.442695, %v2799_v15  ;;  %v2777_v10 = vpop.xlane.xlu1 %2776 }
 0x946   : >> { %2846 = vadd.xlane.f32.xlu1 %v8532_v14  ;;  %v2779_v0 = vpop.xlane.xlu0 %2778  ;;  %v2800_v3 = vsub.f32 %v8470_v7, %v2777_v10 }
 0x947   : >> { %7125 = vpow2.f32 %v2822_v16  ;;  %v2801_v28 = vsub.f32 %v8474_v20, %v2779_v0 }
 0x948   : >> { %7127 = vpow2.f32 %v2820_v9  ;;  %v2824_v61 = vmul.f32 1.442695, %v2800_v3 }
 0x949   : >> { %v8536_v32 = vpop.eup %7119  ;;  %v2826_v8 = vmul.f32 1.442695, %v2801_v28  ;;  %v2781_v1 = vpop.xlane.xlu1 %2780 }
 0x94a   : >> { %2844 = vadd.xlane.f32.xlu0 %v8536_v32  ;;  %v2783_v2 = vpop.xlane.xlu0 %2782  ;;  %v2802_v6 = vsub.f32 %v8480_v23, %v2781_v1 }
 0x94b   : >> { %7129 = vpow2.f32 %v2826_v8 }
 0x94c   : >> { %7131 = vpow2.f32 %v2824_v61  ;;  %v2828_v22 = vmul.f32 1.442695, %v2802_v6 }
 0x94d   : >> { %v8540_v63 = vpop.eup %7121  ;;  %v2785_v62 = vpop.xlane.xlu1 %2784 }
 0x94e   : >> { %2850 = vadd.xlane.f32.xlu0 %v8540_v63  ;;  %v8544_v15 = vpop.eup %7123  ;;  %v2787_v24 = vpop.xlane.xlu0 %2786  ;;  %7133 = vpow2.f32 %v2828_v22  ;;  %v2804_v23 = vsub.f32 %v8490_v27, %v2785_v62  ;;  %v2803_v27 = vsub.f32 %v8484_v12, %v2783_v2 }
 0x94f   : >> { %v2805_v7 = vsub.f32 %v8494_v19, %v2787_v24 }
 0x950   : >> { %v2832_v0 = vmul.f32 1.442695, %v2804_v23  ;;  %v2830_v1 = vmul.f32 1.442695, %v2803_v27 }
 0x951   : >> { %v8548_v20 = vpop.eup %7125  ;;  %v2834_v31 = vmul.f32 1.442695, %v2805_v7  ;;  %v2789_v5 = vpop.xlane.xlu1 %2788 }
 0x952   : >> { %2848 = vadd.xlane.f32.xlu0 %v8544_v15  ;;  %v8554_v57 = vpop.eup %7127  ;;  %v2806_v19 = vsub.f32 %v8500_v17, %v2789_v5  ;;  %v2791_v8 = vpop.xlane.xlu0 %2790 }
 0x953   : >> { %7135 = vpow2.f32 %v2834_v31  ;;  %v2807_v17 = vsub.f32 %v8504_v26, %v2791_v8 }
 0x954   : >> { %7137 = vpow2.f32 %v2832_v0  ;;  %v2836_v9 = vmul.f32 1.442695, %v2806_v19 }
 0x955   : >> { %v8558_v16 = vpop.eup %7129  ;;  %v2838_v6 = vmul.f32 1.442695, %v2807_v17  ;;  %v6932_v26 = vpop.permute.xlu1 %6931 }
 0x956   : >> { %2854 = vadd.xlane.f32.xlu0 %v8548_v20  ;;  %v8562_v10 = vpop.eup %7131  ;;  %7139 = vpow2.f32 %v2836_v9 }
 0x957   : >> { %6941 = vrot.lane.b32.xlu1 %v7782_v56, %s7401_s27  ;;  %7141 = vpow2.f32 %v2830_v1  ;;  %s4128_s27 = scalar_lea.vmem %s9300_s10, %s7388_s14 }
 0x958   : >> { %v8565_v28 = vpop.eup %7133  ;;  %7143 = vpow2.f32 %v2838_v6 }
 0x95a   : >> { %2852 = vadd.xlane.f32.xlu0 %v8554_v57 }
 0x95d   : >> { %v8569_v3 = vpop.eup %7135 }
 0x95e   : >> { %2858 = vadd.xlane.f32.xlu0 %v8558_v16  ;;  %v8573_v61 = vpop.eup %7137 }
 0x960   : >> { %v8576_v24 = vpop.eup %7139 }
 0x961   : >> { %v8579_v12 = vpop.eup %7141 }
 0x962   : >> { %2856 = vadd.xlane.f32.xlu0 %v8562_v10  ;;  %v8582_v2 = vpop.eup %7143 }
 0x966   : >> { %2860 = vadd.xlane.f32.xlu0 %v8565_v28 }
 0x96a   : >> { %2866 = vadd.xlane.f32.xlu0 %v8569_v3 }
 0x96e   : >> { %2864 = vadd.xlane.f32.xlu0 %v8573_v61 }
 0x972   : >> { %2868 = vadd.xlane.f32.xlu0 %v8576_v24 }
 0x97b   : >> { %2862 = vadd.xlane.f32.xlu1 %v8579_v12 }
 0x97f   : >> { %2870 = vadd.xlane.f32.xlu1 %v8582_v2 }
 0x988   : >> { %3178 = vrot.lane.b32.xlu0 %v7706_v34, %s7402_s28  ;;  %v6937_v34 = vpop.permute.xlu1 %6936 }
 0x98c   : >> { %3190 = vrot.lane.b32.xlu0 %v7738_v43, %s7402_s28 }
 0x990   : >> { %3180 = vrot.lane.b32.xlu1 %v7704_v33, %s7402_s28  ;;  %3194 = vrot.lane.b32.xlu0 %v7748_v46, %s7402_s28  ;;  %v6913_v46 = vunpack.i.l.bf16 %v8525_v13 }
 0x994   : >> { %3182 = vrot.lane.b32.xlu1 %v7718_v37, %s7402_s28  ;;  %3198 = vrot.lane.b32.xlu0 %v7758_v49, %s7402_s28 }
 0x998   : >> { %3184 = vrot.lane.b32.xlu1 %v7716_v36, %s7402_s28  ;;  %3202 = vrot.lane.b32.xlu0 %v7768_v52, %s7402_s28 }
 0x99c   : >> { %3186 = vrot.lane.b32.xlu1 %v7728_v40, %s7402_s28  ;;  %3206 = vrot.lane.b32.xlu0 %v7778_v55, %s7402_s28  ;;  %v6914_v40 = vunpack.i.h.bf16 %v8525_v13  ;;  %v6939_v13 = vunpack.i.h.bf16 %v6937_v34 }
 0x99d   : >> { %v2843_v33 = vpop.xlane.xlu0 %2842 }
 0x99e   : >> { %7145 = vrcp.f32 %v2843_v33  ;;  %v2841_v43 = vpop.xlane.xlu1 %2840 }
 0x99f   : >> { %7147 = vrcp.f32 %v2841_v43 }
 0x9a0   : >> { %3188 = vrot.lane.b32.xlu1 %v7726_v39, %s7402_s28  ;;  %6951 = vrot.lane.b32.xlu0 %v7722_v38, %s7403_s29  ;;  %v6349_v38 = vpack.c.bf16 %v6914_v40, %v6913_v46 }
 0x9a1   : >> { %v6927_v55 = vpop.permute.xlu0 %6926 }
 0x9a4   : >> { %3192 = vrot.lane.b32.xlu1 %v7734_v42, %s7402_s28  ;;  %6961 = vrot.lane.b32.xlu0 %v7742_v44, %s7403_s29  ;;  %v6919_v42 = vunpack.i.h.bf16 %v8527_v30  ;;  %v6918_v44 = vunpack.i.l.bf16 %v8527_v30 }
 0x9a8   : >> { %v7146_v36 = vpop.eup %7145  ;;  %3196 = vrot.lane.b32.xlu1 %v7744_v45, %s7402_s28  ;;  %v6355_v45 = vpack.c.bf16 %v6919_v42, %v6918_v44 }
 0x9a9   : >> { %v7148_v37 = vpop.eup %7147  ;;  %v2889_v49 = vmul.f32 %v7146_v36, %v8517_v11 }
 0x9aa   : >> { %v2888_v39 = vmul.f32 %v7148_v37, %v8519_v58 }
 0x9ac   : >> { %3200 = vrot.lane.b32.xlu1 %v7754_v48, %s7402_s28  ;;  %5808 = vmatprep.mubr.f32.mxu0 %v2888_v39  ;;  %v6924_v48 = vunpack.i.h.bf16 %v8529_v59 }
 0x9ad   : >> { %5809 = vmatmul.mubr.f32.vlgmr.msra.gmra.mrb[48].mxu0 %v2889_v49 }
 0x9ae   : >> { %6348 = vmatpush3.bf16.xpose.msk.msra.mxu0 %vm7796_vm6, %v8512_v21  ;;  %v6933_v21 = vunpack.i.l.bf16 %v6932_v26 }
 0x9af   : >> { %6351 = vmatprep.subr.msk.bf16.mxu0 %vm7796_vm6, %v6349_v38 }
 0x9b0   : >> { %3204 = vrot.lane.b32.xlu1 %v7764_v51, %s7402_s28  ;;  %v6923_v51 = vunpack.i.l.bf16 %v8529_v59 }
 0x9b2   : >> { %v6361_v52 = vpack.c.bf16 %v6924_v48, %v6923_v51 }
 0x9b4   : >> { %3208 = vrot.lane.b32.xlu1 %v7776_v54, %s7402_s28  ;;  %v6929_v54 = vunpack.i.h.bf16 %v6927_v55  ;;  %s8986_s28 = scalar_lea.vmem %s9299_s9, %s7666_s24  ;;  %s5037_s24 = sshll.u32 %s7388_s14, 6 }
 0x9b6   : >> { %6354 = vmatpush3.bf16.xpose.msk.msra.mxu0 %vm7796_vm6, %v6349_v38 }
 0x9b7   : >> { %6357 = vmatprep.subr.msk.bf16.mxu0 %vm7796_vm6, %v6355_v45 }
 0x9b8   : >> { %6946 = vrot.lane.b32.xlu1 %v7712_v35, %s7403_s29  ;;  %v6928_v35 = vunpack.i.l.bf16 %v6927_v55 }
 0x9ba   : >> { %v6367_v58 = vpack.c.bf16 %v6929_v54, %v6928_v35 }
 0x9bc   : >> { %6956 = vrot.lane.b32.xlu1 %v7732_v41, %s7403_s29  ;;  %v6934_v41 = vunpack.i.h.bf16 %v6932_v26 }
 0x9be   : >> { %6360 = vmatpush3.bf16.xpose.msk.msra.mxu0 %vm7796_vm6, %v6355_v45  ;;  %v6373_v11 = vpack.c.bf16 %v6934_v41, %v6933_v21 }
 0x9bf   : >> { %6363 = vmatprep.subr.msk.bf16.mxu0 %vm7796_vm6, %v6361_v52 }
 0x9c0   : >> { %6966 = vrot.lane.b32.xlu1 %v7752_v47, %s7403_s29  ;;  %v6938_v47 = vunpack.i.l.bf16 %v6937_v34 }
 0x9c2   : >> { %v6379_v59 = vpack.c.bf16 %v6939_v13, %v6938_v47 }
 0x9c6   : >> { %6366 = vmatpush3.bf16.xpose.msk.msra.mxu0 %vm7796_vm6, %v6361_v52 }
 0x9c7   : >> { %6369 = vmatprep.subr.msk.bf16.mxu0 %vm7796_vm6, %v6367_v58 }
 0x9ce   : >> { %6372 = vmatpush3.bf16.xpose.msk.msra.mxu0 %vm7796_vm6, %v6367_v58 }
 0x9cf   : >> { %6375 = vmatprep.subr.msk.bf16.mxu0 %vm7796_vm6, %v6373_v11 }
 0x9d3   : >> { %v2847_v30 = vpop.xlane.xlu1 %2846 }
 0x9d4   : >> { %7149 = vrcp.f32 %v2847_v30 }
 0x9d6   : >> { %6378 = vmatpush3.bf16.xpose.msk.msra.mxu0 %vm7796_vm6, %v6373_v11 }
 0x9d7   : >> { %6381 = vmatprep.subr.msk.bf16.mxu0 %vm7796_vm6, %v6379_v59  ;;  %v2845_v62 = vpop.xlane.xlu0 %2844  ;;  %v6942_v22 = vpop.permute.xlu1 %6941 }
 0x9d8   : >> { %7151 = vrcp.f32 %v2845_v62  ;;  %v6944_v7 = vunpack.i.h.bf16 %v6942_v22  ;;  %v6943_v23 = vunpack.i.l.bf16 %v6942_v22 }
 0x9da   : >> { %v6385_v5 = vpack.c.bf16 %v6944_v7, %v6943_v23 }
 0x9db   : >> { %v2851_v31 = vpop.xlane.xlu0 %2850 }
 0x9dc   : >> { %7153 = vrcp.f32 %v2851_v31 }
 0x9de   : >> { %6384 = vmatpush3.bf16.xpose.msk.msra.mxu0 %vm7796_vm6, %v6379_v59  ;;  %v7150_v19 = vpop.eup %7149 }
 0x9df   : >> { %6387 = vmatprep.subr.msk.bf16.mxu0 %vm7796_vm6, %v6385_v5  ;;  %v2849_v0 = vpop.xlane.xlu0 %2848  ;;  %v2891_v1 = vmul.f32 %v7150_v19, %v8532_v14 }
 0x9e0   : >> { %7155 = vrcp.f32 %v2849_v0 }
 0x9e2   : >> { %v7152_v9 = vpop.eup %7151 }
 0x9e3   : >> { %v2855_v27 = vpop.xlane.xlu0 %2854  ;;  %v2890_v8 = vmul.f32 %v7152_v9, %v8536_v32 }
 0x9e4   : >> { %7157 = vrcp.f32 %v2855_v27 }
 0x9e5   : >> { %5811 = vmatprep.mubr.f32.mxu0 %v2890_v8 }
 0x9e6   : >> { %6390 = vmatpush3.bf16.xpose.msk.msra.mxu0 %vm7796_vm6, %v6385_v5  ;;  %v7154_v6 = vpop.eup %7153 }
 0x9e7   : >> { %5812 = vmatmul.mubr.f32.gmra.mrb[50].mxu0 %v2891_v1  ;;  %v2853_v17 = vpop.xlane.xlu0 %2852  ;;  %v2893_v43 = vmul.f32 %v7154_v6, %v8540_v63 }
 0x9e8   : >> { %7159 = vrcp.f32 %v2853_v17 }
 0x9ea   : >> { %v7156_v26 = vpop.eup %7155 }
 0x9eb   : >> { %v2859_v34 = vpop.xlane.xlu0 %2858  ;;  %v2892_v33 = vmul.f32 %v7156_v26, %v8544_v15 }
 0x9ec   : >> { %7161 = vrcp.f32 %v2859_v34 }
 0x9ed   : >> { %5814 = vmatprep.mubr.f32.mxu0 %v2892_v33 }
 0x9ee   : >> { %5815 = vmatmul.mubr.f32.gmra.mrb[52].mxu0 %v2893_v43  ;;  %v7158_v14 = vpop.eup %7157 }
 0x9ef   : >> { %v2857_v32 = vpop.xlane.xlu0 %2856  ;;  %v2895_v40 = vmul.f32 %v7158_v14, %v8548_v20 }
 0x9f0   : >> { %7163 = vrcp.f32 %v2857_v32 }
 0x9f2   : >> { %v7160_v36 = vpop.eup %7159 }
 0x9f3   : >> { %v2861_v60 = vpop.xlane.xlu0 %2860  ;;  %v2894_v37 = vmul.f32 %v7160_v36, %v8554_v57 }
 0x9f4   : >> { %7165 = vrcp.f32 %v2861_v60 }
 0x9f5   : >> { %5817 = vmatprep.mubr.f32.mxu0 %v2894_v37 }
 0x9f6   : >> { %5818 = vmatmul.mubr.f32.gmra.mrb[54].mxu0 %v2895_v40  ;;  %v7162_v46 = vpop.eup %7161 }
 0x9f7   : >> { %v2897_v63 = vmul.f32 %v7162_v46, %v8558_v16  ;;  %v2867_v49 = vpop.xlane.xlu0 %2866 }
 0x9fa   : >> { %v7164_v39 = vpop.eup %7163 }
 0x9fb   : >> { %v2896_v15 = vmul.f32 %v7164_v39, %v8562_v10  ;;  %v2865_v44 = vpop.xlane.xlu0 %2864 }
 0x9fc   : >> { %7167 = vrcp.f32 %v2865_v44 }
 0x9fd   : >> { %5820 = vmatprep.mubr.f32.mxu0 %v2896_v15 }
 0x9fe   : >> { %v7166_v38 = vpop.eup %7165  ;;  %5821 = vmatmul.mubr.f32.gmra.mrb[56].mxu0 %v2897_v63 }
 0x9ff   : >> { %v2898_v42 = vmul.f32 %v7166_v38, %v8565_v28  ;;  %v2869_v45 = vpop.xlane.xlu0 %2868 }
 0xa01   : >> { %5823 = vmatprep.mubr.f32.mxu0 %v2898_v42 }
 0xa03   : >> { %v3179_v51 = vpop.permute.xlu0 %3178 }
 0xa06   : >> { %v7168_v10 = vpop.eup %7167 }
 0xa07   : >> { %v2900_v28 = vmul.f32 %v7168_v10, %v8573_v61  ;;  %v3191_v58 = vpop.permute.xlu0 %3190 }
 0xa08   : >> { %v2863_v57 = vpop.xlane.xlu1 %2862 }
 0xa09   : >> { %7169 = vrcp.f32 %v2863_v57 }
 0xa0a   : >> { %7171 = vrcp.f32 %v2867_v49 }
 0xa0b   : >> { %7173 = vrcp.f32 %v2869_v45  ;;  %v3195_v59 = vpop.permute.xlu0 %3194 }
 0xa0c   : >> { %v2871_v20 = vpop.xlane.xlu1 %2870 }
 0xa0d   : >> { %7175 = vrcp.f32 %v2871_v20 }
 0xa10   : >> { %v3181_v48 = vpop.permute.xlu1 %3180 }
 0xa13   : >> { %v7170_v16 = vpop.eup %7169 }
 0xa14   : >> { %v3183_v52 = vpop.permute.xlu1 %3182  ;;  %v2899_v55 = vmul.f32 %v7170_v16, %v8579_v12  ;;  %v7172_v54 = vpop.eup %7171 }
 0xa15   : >> { %v7174_v35 = vpop.eup %7173  ;;  %v2901_v21 = vmul.f32 %v7172_v54, %v8569_v3  ;;  %v3199_v12 = vpop.permute.xlu0 %3198 }
 0xa16   : >> { %5824 = vmatmul.mubr.f32.gmra.mrb[58].mxu0 %v2899_v55  ;;  %v2902_v13 = vmul.f32 %v7174_v35, %v8576_v24 }
 0xa17   : >> { %5826 = vmatprep.mubr.f32.mxu0 %v2900_v28  ;;  %v7176_v11 = vpop.eup %7175 }
 0xa18   : >> { %v3185_v41 = vpop.permute.xlu1 %3184  ;;  %v2903_v30 = vmul.f32 %v7176_v11, %v8582_v2 }
 0xa19   : >> { %v3203_v24 = vpop.permute.xlu0 %3202 }
 0xa1a   : >> { %5827 = vmatmul.mubr.f32.gmra.mrb[60].mxu0 %v2901_v21 }
 0xa1b   : >> { %5829 = vmatprep.mubr.f32.mxu0 %v2902_v13 }
 0xa1c   : >> { %v3187_v47 = vpop.permute.xlu1 %3186 }
 0xa1d   : >> { %v3207_v22 = vpop.permute.xlu0 %3206 }
 0xa1e   : >> { %5830 = vmatmul.mubr.f32.gmra.mrb[62].mxu0 %v2903_v30 }
 0xa1f   : >> { %5864 = vmatprep.mubr.msk.f32.mxu0 %vm1185_vm5, %v3179_v51 }
 0xa20   : >> { %v3189_v61 = vpop.permute.xlu1 %3188 }
 0xa21   : >> { %v6952_v31 = vpop.permute.xlu0 %6951 }
 0xa22   : >> { %5865 = vmatmul.mubr.msk.f32.vlgmr.msra.gmra.mrb[64].mxu0 %vm1185_vm5, %v3181_v48  ;;  %v6954_v0 = vunpack.i.h.bf16 %v6952_v31  ;;  %v6953_v19 = vunpack.i.l.bf16 %v6952_v31 }
 0xa23   : >> { %5867 = vmatprep.mubr.msk.f32.mxu0 %vm1185_vm5, %v3183_v52 }
 0xa24   : >> { %v3193_v62 = vpop.permute.xlu1 %3192  ;;  %v6395_v17 = vpack.c.bf16 %v6954_v0, %v6953_v19 }
 0xa25   : >> { %v6962_v34 = vpop.permute.xlu0 %6961 }
 0xa26   : >> { %5868 = vmatmul.mubr.msk.f32.gmra.mrb[66].mxu0 %vm1185_vm5, %v3185_v41  ;;  %v6964_v33 = vunpack.i.h.bf16 %v6962_v34  ;;  %v6963_v43 = vunpack.i.l.bf16 %v6962_v34 }
 0xa27   : >> { %5870 = vmatprep.mubr.msk.f32.mxu0 %vm1185_vm5, %v3187_v47 }
 0xa28   : >> { %v3197_v3 = vpop.permute.xlu1 %3196  ;;  %v6403_v36 = vpack.c.bf16 %v6964_v33, %v6963_v43 }
 0xa2a   : >> { %5871 = vmatmul.mubr.msk.f32.gmra.mrb[68].mxu0 %vm1185_vm5, %v3189_v61 }
 0xa2b   : >> { %5873 = vmatprep.mubr.msk.f32.mxu0 %vm1185_vm5, %v3191_v58 }
 0xa2c   : >> { %v3201_v2 = vpop.permute.xlu1 %3200 }
 0xa2e   : >> { %5874 = vmatmul.mubr.msk.f32.gmra.mrb[70].mxu0 %vm1185_vm5, %v3193_v62 }
 0xa2f   : >> { %5876 = vmatprep.mubr.msk.f32.mxu0 %vm1185_vm5, %v3195_v59 }
 0xa30   : >> { %v3205_v7 = vpop.permute.xlu1 %3204 }
 0xa32   : >> { %5877 = vmatmul.mubr.msk.f32.gmra.mrb[72].mxu0 %vm1185_vm5, %v3197_v3 }
 0xa33   : >> { %5879 = vmatprep.mubr.msk.f32.mxu0 %vm1185_vm5, %v3199_v12 }
 0xa34   : >> { %v3209_v23 = vpop.permute.xlu1 %3208 }
 0xa36   : >> { %5880 = vmatmul.mubr.msk.f32.gmra.mrb[74].mxu0 %vm1185_vm5, %v3201_v2 }
 0xa37   : >> { %5882 = vmatprep.mubr.msk.f32.mxu0 %vm1185_vm5, %v3203_v24 }
 0xa38   : >> { %v6947_v5 = vpop.permute.xlu1 %6946 }
 0xa39   : >> { %v6949_v9 = vunpack.i.h.bf16 %v6947_v5  ;;  %v6948_v27 = vunpack.i.l.bf16 %v6947_v5 }
 0xa3a   : >> { %5883 = vmatmul.mubr.msk.f32.gmra.mrb[76].mxu0 %vm1185_vm5, %v3205_v7 }
 0xa3b   : >> { %v6391_v8 = vpack.c.bf16 %v6949_v9, %v6948_v27  ;;  %5885 = vmatprep.mubr.msk.f32.mxu0 %vm1185_vm5, %v3207_v22 }
 0xa3c   : >> { %v6957_v1 = vpop.permute.xlu1 %6956 }
 0xa3d   : >> { %v6959_v6 = vunpack.i.h.bf16 %v6957_v1  ;;  %v6958_v26 = vunpack.i.l.bf16 %v6957_v1  ;;  %6392 = vmatprep.subr.bf16.mxu0 %v6391_v8  ;;  %6487 = vmatprep.subr.bf16.mxu1 %v6391_v8 }
 0xa3e   : >> { %5886 = vmatmul.mubr.msk.f32.gmra.mrb[78].mxu0 %vm1185_vm5, %v3209_v23  ;;  %6495 = vmatpush3.bf16.msra.mxu1 %v6391_v8 }
 0xa3f   : >> { %6394 = vmatpush3.bf16.msra.mxu0 %v6391_v8  ;;  %6488 = vmatprep.subr.bf16.mxu1 %v6395_v17  ;;  %v6399_v32 = vpack.c.bf16 %v6959_v6, %v6958_v26 }
 0xa40   : >> { %6396 = vmatprep.subr.bf16.mxu0 %v6395_v17  ;;  %v6967_v14 = vpop.permute.xlu1 %6966 }
 0xa41   : >> { %v6969_v60 = vunpack.i.h.bf16 %v6967_v14  ;;  %v6968_v37 = vunpack.i.l.bf16 %v6967_v14 }
 0xa42   : >> { %6496 = vmatpush3.bf16.msra.mxu1 %v6395_v17 }
 0xa43   : >> { %6398 = vmatpush3.bf16.msra.mxu0 %v6395_v17  ;;  %6489 = vmatprep.subr.bf16.mxu1 %v6399_v32  ;;  %v6407_v40 = vpack.c.bf16 %v6969_v60, %v6968_v37 }
 0xa44   : >> { %6400 = vmatprep.subr.bf16.mxu0 %v6399_v32 }
 0xa46   : >> { %6497 = vmatpush3.bf16.msra.mxu1 %v6399_v32 }
 0xa47   : >> { %6402 = vmatpush3.bf16.msra.mxu0 %v6399_v32  ;;  %6490 = vmatprep.subr.bf16.mxu1 %v6403_v36 }
 0xa48   : >> { %6404 = vmatprep.subr.bf16.mxu0 %v6403_v36 }
 0xa4a   : >> { %6498 = vmatpush3.bf16.msra.mxu1 %v6403_v36 }
 0xa4b   : >> { %6406 = vmatpush3.bf16.msra.mxu0 %v6403_v36  ;;  %6491 = vmatprep.subr.bf16.mxu1 %v6407_v40 }
 0xa4c   : >> { %6408 = vmatprep.subr.bf16.mxu0 %v6407_v40 }
 0xa4e   : >> { %6499 = vmatpush3.bf16.msra.mxu1 %v6407_v40 }
 0xa4f   : >> { %6410 = vmatpush3.bf16.msra.mxu0 %v6407_v40 }
 0xa80   : >> { %v8696_v46 = vpop.f32.mrb[48].mxu0 }
 0xa81   : >> { %v8698_v39 = vpop.f32.mrb[49].mxu0 }
 0xaba   : >> { %v8700_v15 = vpop.f32.mrb[50].mxu0 }
 0xabb   : >> { %v8702_v63 = vpop.f32.mrb[51].mxu0 }
 0xac1   : >> { %v8704_v49 = vpop.f32.mrb[52].mxu0 }
 0xac2   : >> { %v8706_v38 = vpop.f32.mrb[53].mxu0 }
 0xac9   : >> { %v8708_v42 = vpop.f32.mrb[54].mxu0 }
 0xaca   : >> { %v8710_v44 = vpop.f32.mrb[55].mxu0 }
 0xad1   : >> { %v8712_v57 = vpop.f32.mrb[56].mxu0 }
 0xad2   : >> { %v8714_v45 = vpop.f32.mrb[57].mxu0 }
 0xae9   : >> { %v8716_v20 = vpop.f32.mrb[58].mxu0 }
 0xaea   : >> { %v8718_v48 = vpop.f32.mrb[59].mxu0 }
 0xaed   : >> { %v8720_v10 = vpop.f32.mrb[60].mxu0 }
 0xaee   : >> { %v8722_v51 = vpop.f32.mrb[61].mxu0 }
 0xaf1   : >> { %v8724_v16 = vpop.f32.mrb[62].mxu0 }
 0xaf2   : >> { %v8726_v52 = vpop.f32.mrb[63].mxu0 }
 0xaf5   : >> { %v5866_v55 = vpop.f32.mrb[64].mxu0 }
 0xaf6   : >> { %v3452_v54 = vsel %vm915_vm2, -1e+30, %v5866_v55  ;;  %v3372_v28 = vpop.f32.mrb[65].mxu0 }
 0xaf7   : >> { %v3451_v35 = vsel %vm915_vm2, -1e+30, %v3372_v28  ;;  %3469 = vmax.xlane.f32.xlu1 %v3452_v54 }
 0xaf8   : >> { %3467 = vmax.xlane.f32.xlu0 %v3451_v35 }
 0xaf9   : >> { %v5869_v58 = vpop.f32.mrb[66].mxu0 }
 0xafa   : >> { %v3454_v41 = vsel %vm915_vm2, -1e+30, %v5869_v58  ;;  %v3382_v21 = vpop.f32.mrb[67].mxu0 }
 0xafb   : >> { %v3453_v47 = vsel %vm915_vm2, -1e+30, %v3382_v21 }
 0xafc   : >> { %3473 = vmax.xlane.f32.xlu0 %v3454_v41 }
 0xafd   : >> { %v5872_v11 = vpop.f32.mrb[68].mxu0 }
 0xafe   : >> { %v3392_v13 = vpop.f32.mrb[69].mxu0  ;;  %v3456_v12 = vsel %vm915_vm2, -1e+30, %v5872_v11 }
 0xaff   : >> { %v3455_v30 = vsel %vm915_vm2, -1e+30, %v3392_v13 }
 0xb00   : >> { %3471 = vmax.xlane.f32.xlu0 %v3453_v47  ;;  %3475 = vmax.xlane.f32.xlu1 %v3455_v30 }
 0xb01   : >> { %v5875_v59 = vpop.f32.mrb[70].mxu0 }
 0xb02   : >> { %v3402_v61 = vpop.f32.mrb[71].mxu0  ;;  %v3458_v2 = vsel %vm915_vm2, -1e+30, %v5875_v59 }
 0xb03   : >> { %v8742_v62 = vsel %vm915_vm2, -1e+30, %v3402_v61 }
 0xb04   : >> { %3477 = vmax.xlane.f32.xlu0 %v3456_v12  ;;  %3479 = vmax.xlane.f32.xlu1 %v8742_v62 }
 0xb05   : >> { %v5878_v3 = vpop.f32.mrb[72].mxu0 }
 0xb06   : >> { %v3412_v24 = vpop.f32.mrb[73].mxu0  ;;  %v8754_v31 = vsel %vm915_vm2, -1e+30, %v5878_v3 }
 0xb07   : >> { %v8749_v22 = vsel %vm915_vm2, -1e+30, %v3412_v24 }
 0xb08   : >> { %3481 = vmax.xlane.f32.xlu0 %v3458_v2  ;;  %3483 = vmax.xlane.f32.xlu1 %v8749_v22 }
 0xb09   : >> { %v5881_v7 = vpop.f32.mrb[74].mxu0 }
 0xb0a   : >> { %v3422_v23 = vpop.f32.mrb[75].mxu0  ;;  %v8764_v9 = vsel %vm915_vm2, -1e+30, %v5881_v7 }
 0xb0b   : >> { %v8758_v5 = vsel %vm915_vm2, -1e+30, %v3422_v23 }
 0xb0c   : >> { %3485 = vmax.xlane.f32.xlu0 %v8754_v31  ;;  %3487 = vmax.xlane.f32.xlu1 %v8758_v5 }
 0xb0d   : >> { %v5884_v0 = vpop.f32.mrb[76].mxu0 }
 0xb0e   : >> { %v3432_v19 = vpop.f32.mrb[77].mxu0  ;;  %v8774_v17 = vsel %vm915_vm2, -1e+30, %v5884_v0 }
 0xb0f   : >> { %v8768_v27 = vsel %vm915_vm2, -1e+30, %v3432_v19 }
 0xb10   : >> { %3489 = vmax.xlane.f32.xlu0 %v8764_v9  ;;  %3491 = vmax.xlane.f32.xlu1 %v8768_v27 }
 0xb11   : >> { %v5887_v8 = vpop.f32.mrb[78].mxu0 }
 0xb12   : >> { %v3442_v1 = vpop.f32.mrb[79].mxu0  ;;  %v8784_v26 = vsel %vm915_vm2, -1e+30, %v5887_v8 }
 0xb13   : >> { %v8778_v6 = vsel %vm915_vm2, -1e+30, %v3442_v1 }
 0xb14   : >> { %3493 = vmax.xlane.f32.xlu0 %v8774_v17  ;;  %3495 = vmax.xlane.f32.xlu1 %v8778_v6 }
 0xb18   : >> { %3497 = vmax.xlane.f32.xlu0 %v8784_v26 }
 0xb25   : >> { %6971 = vrot.lane.b32.xlu1 %v7762_v50, %s7403_s29 }
 0xb2e   : >> { %6976 = vrot.lane.b32.xlu0 %v7772_v53, %s7403_s29 }
 0xb84   : >> { %v3470_v34 = vpop.xlane.xlu1 %3469 }
 0xb85   : >> { %v3500_v33 = vsub.f32 %v3452_v54, %v3470_v34  ;;  %v3468_v43 = vpop.xlane.xlu0 %3467 }
 0xb86   : >> { %v3499_v32 = vsub.f32 %v3451_v35, %v3468_v43 }
 0xb87   : >> { %v3517_v14 = vmul.f32 1.442695, %v3500_v33 }
 0xb88   : >> { %v3515_v36 = vmul.f32 1.442695, %v3499_v32 }
 0xb89   : >> { %7177 = vpow2.f32 %v3517_v14  ;;  %v3474_v60 = vpop.xlane.xlu0 %3473 }
 0xb8a   : >> { %7179 = vpow2.f32 %v3515_v36  ;;  %v3502_v37 = vsub.f32 %v3454_v41, %v3474_v60 }
 0xb8c   : >> { %v3521_v40 = vmul.f32 1.442695, %v3502_v37 }
 0xb8d   : >> { %v3472_v55 = vpop.xlane.xlu0 %3471  ;;  %v3476_v28 = vpop.xlane.xlu1 %3475 }
 0xb8e   : >> { %7181 = vpow2.f32 %v3521_v40  ;;  %v3501_v58 = vsub.f32 %v3453_v47, %v3472_v55  ;;  %v3503_v21 = vsub.f32 %v3455_v30, %v3476_v28 }
 0xb90   : >> { %v3519_v50 = vmul.f32 1.442695, %v3501_v58  ;;  %v3523_v11 = vmul.f32 1.442695, %v3503_v21 }
 0xb91   : >> { %v3478_v13 = vpop.xlane.xlu0 %3477  ;;  %v3480_v53 = vpop.xlane.xlu1 %3479 }
 0xb92   : >> { %7183 = vpow2.f32 %v3519_v50  ;;  %v3504_v54 = vsub.f32 %v3456_v12, %v3478_v13  ;;  %v3505_v47 = vsub.f32 %v8742_v62, %v3480_v53 }
 0xb93   : >> { %v8791_v59 = vpop.eup %7177  ;;  %7185 = vpow2.f32 %v3523_v11 }
 0xb94   : >> { %v8793_v35 = vpop.eup %7179  ;;  %v3525_v61 = vmul.f32 1.442695, %v3504_v54  ;;  %3549 = vadd.xlane.f32.xlu0 %v8791_v59  ;;  %v3527_v0 = vmul.f32 1.442695, %v3505_v47 }
 0xb95   : >> { %v3482_v41 = vpop.xlane.xlu0 %3481  ;;  %v3484_v3 = vpop.xlane.xlu1 %3483  ;;  %3547 = vadd.xlane.f32.xlu1 %v8793_v35 }
 0xb96   : >> { %7187 = vpow2.f32 %v3525_v61  ;;  %v3506_v30 = vsub.f32 %v3458_v2, %v3482_v41  ;;  %v3507_v19 = vsub.f32 %v8749_v22, %v3484_v3 }
 0xb98   : >> { %v8798_v24 = vpop.eup %7181  ;;  %v3529_v7 = vmul.f32 1.442695, %v3506_v30  ;;  %v3531_v62 = vmul.f32 1.442695, %v3507_v19 }
 0xb99   : >> { %v8800_v12 = vpop.xlane.xlu0 %3485  ;;  %v3488_v23 = vpop.xlane.xlu1 %3487  ;;  %3553 = vadd.xlane.f32.xlu0 %v8798_v24 }
 0xb9a   : >> { %7189 = vpow2.f32 %v3529_v7  ;;  %v3509_v2 = vsub.f32 %v8758_v5, %v3488_v23 }
 0xb9b   : >> { %7191 = vpow2.f32 %v3527_v0 }
 0xb9c   : >> { %v8804_v8 = vpop.eup %7183  ;;  %7193 = vpow2.f32 %v3531_v62  ;;  %v3535_v36 = vmul.f32 1.442695, %v3509_v2 }
 0xb9d   : >> { %v8806_v1 = vpop.eup %7185  ;;  %v3490_v34 = vpop.xlane.xlu0 %3489  ;;  %3551 = vadd.xlane.f32.xlu0 %v8804_v8 }
 0xb9e   : >> { %v3492_v33 = vpop.xlane.xlu1 %3491  ;;  %3555 = vadd.xlane.f32.xlu1 %v8806_v1  ;;  %7195 = vpow2.f32 %v3535_v36  ;;  %v3510_v23 = vsub.f32 %v8764_v9, %v3490_v34  ;;  %v9359_v9 = vld [vmem:[#allocation22_spill] sm:$0xff] }
 0xb9f   : >> { %v3511_v32 = vsub.f32 %v8768_v27, %v3492_v33 }
 0xba0   : >> { %v8811_v43 = vpop.eup %7187  ;;  %v3537_v0 = vmul.f32 1.442695, %v3510_v23 }
 0xba1   : >> { %v3494_v14 = vpop.xlane.xlu0 %3493  ;;  %3557 = vadd.xlane.f32.xlu0 %v8811_v43  ;;  %v3539_v37 = vmul.f32 1.442695, %v3511_v32 }
 0xba2   : >> { %v3496_v22 = vpop.xlane.xlu1 %3495  ;;  %v3512_v19 = vsub.f32 %v8774_v17, %v3494_v14 }
 0xba3   : >> { %v3513_v5 = vsub.f32 %v8778_v6, %v3496_v22  ;;  %7197 = vpow2.f32 %v3539_v37 }
 0xba4   : >> { %v8815_v60 = vpop.eup %7189  ;;  %v3541_v33 = vmul.f32 1.442695, %v3512_v19 }
 0xba5   : >> { %3561 = vadd.xlane.f32.xlu0 %v8815_v60  ;;  %v3498_v40 = vpop.xlane.xlu0 %3497  ;;  %v8819_v21 = vpop.eup %7191  ;;  %v3543_v11 = vmul.f32 1.442695, %v3513_v5 }
 0xba6   : >> { %v6972_v55 = vpop.permute.xlu1 %6971  ;;  %v3514_v13 = vsub.f32 %v8784_v26, %v3498_v40  ;;  %v8823_v61 = vpop.eup %7193 }
 0xba7   : >> { %v6974_v28 = vunpack.i.h.bf16 %v6972_v55  ;;  %v6973_v58 = vunpack.i.l.bf16 %v6972_v55  ;;  %7199 = vpow2.f32 %v3543_v11 }
 0xba8   : >> { %v3545_v41 = vmul.f32 1.442695, %v3514_v13  ;;  %v8828_v26 = vpop.eup %7195 }
 0xba9   : >> { %v6411_v27 = vpack.c.bf16 %v6974_v28, %v6973_v58  ;;  %3559 = vadd.xlane.f32.xlu0 %v8819_v21  ;;  %v6977_v50 = vpop.permute.xlu0 %6976 }
 0xbaa   : >> { %v6979_v53 = vunpack.i.h.bf16 %v6977_v50  ;;  %v6978_v54 = vunpack.i.l.bf16 %v6977_v50  ;;  %7201 = vpow2.f32 %v3545_v41 }
 0xbab   : >> { %6412 = vmatprep.subr.bf16.mxu0 %v6411_v27  ;;  %6492 = vmatprep.subr.bf16.mxu1 %v6411_v27 }
 0xbac   : >> { %6414 = vmatpush3.bf16.msra.mxu0 %v6411_v27  ;;  %6500 = vmatpush3.bf16.msra.mxu1 %v6411_v27  ;;  %v6415_v6 = vpack.c.bf16 %v6979_v53, %v6978_v54 }
 0xbad   : >> { %3563 = vadd.xlane.f32.xlu0 %v8823_v61  ;;  %v8831_v3 = vpop.eup %7197 }
 0xbae   : >> { %6416 = vmatprep.subr.bf16.mxu0 %v6415_v6  ;;  %6493 = vmatprep.subr.bf16.mxu1 %v6415_v6 }
 0xbaf   : >> { %6981 = vrot.lane.b32.xlu1 %v7782_v56, %s7403_s29  ;;  %v3508_v56 = vsub.f32 %v8754_v31, %v8800_v12  ;;  %s4355_s29 = scalar_lea.vmem %s9302_s12, %s7388_s14 }
 0xbb0   : >> { %6418 = vmatpush3.bf16.msra.mxu0 %v6415_v6  ;;  %6501 = vmatpush3.bf16.msra.mxu1 %v6415_v6 }
 0xbb1   : >> { %3567 = vadd.xlane.f32.xlu0 %v8828_v26  ;;  %v8834_v47 = vpop.eup %7199  ;;  %v3533_v7 = vmul.f32 1.442695, %v3508_v56 }
 0xbb3   : >> { %7203 = vpow2.f32 %v3533_v7 }
 0xbb4   : >> { %v8837_v30 = vpop.eup %7201  ;;  %7205 = vpow2.f32 %v3537_v0 }
 0xbb5   : >> { %3571 = vadd.xlane.f32.xlu0 %v8831_v3  ;;  %7207 = vpow2.f32 %v3541_v33 }
 0xbb9   : >> { %3575 = vadd.xlane.f32.xlu0 %v8834_v47 }
 0xbbd   : >> { %3577 = vadd.xlane.f32.xlu0 %v8837_v30  ;;  %v8844_v62 = vpop.eup %7203 }
 0xbbe   : >> { %v8849_v2 = vpop.eup %7205 }
 0xbbf   : >> { %v8854_v31 = vpop.eup %7207 }
 0xbd3   : >> { %3565 = vadd.xlane.f32.xlu1 %v8844_v62  ;;  %2406 = vrot.lane.b32.xlu0 %v8408_v4, %s7404_s30  ;;  %v9358_v4 = vld [vmem:[#allocation21_spill] sm:$0xff] }
 0xbd7   : >> { %3569 = vadd.xlane.f32.xlu1 %v8849_v2  ;;  %2408 = vrot.lane.b32.xlu0 %v8406_v29, %s7404_s30  ;;  %v9360_v29 = vld [vmem:[#allocation24_spill] sm:$0xff] }
 0xbdb   : >> { %3573 = vadd.xlane.f32.xlu1 %v8854_v31  ;;  %3113 = vrot.lane.b32.xlu0 %v8698_v39, %s7405_s16  ;;  %v9363_v39 = vld [vmem:[#allocation25_spill] sm:$0xff] }
 0xbdf   : >> { %2410 = vrot.lane.b32.xlu0 %v8412_v25, %s7404_s30  ;;  %v9361_v25 = vld [vmem:[#allocation23_spill] sm:$0xff] }
 0xbe3   : >> { %2412 = vrot.lane.b32.xlu0 %v9358_v4, %s7404_s30 }
 0xbe7   : >> { %3119 = vrot.lane.b32.xlu0 %v8700_v15, %s7405_s16  ;;  %v9364_v15 = vld [vmem:[#allocation28_spill] sm:$0xff] }
 0xbeb   : >> { %2416 = vrot.lane.b32.xlu0 %v9359_v9, %s7404_s30 }
 0xbec   : >> { %3115 = vrot.lane.b32.xlu1 %v8696_v46, %s7405_s16  ;;  %v9362_v46 = vld [vmem:[#allocation26_spill] sm:$0xff] }
 0xbef   : >> { %3123 = vrot.lane.b32.xlu0 %v8704_v49, %s7405_s16  ;;  %v9366_v49 = vld [vmem:[#allocation30_spill] sm:$0xff] }
 0xbf0   : >> { %3117 = vrot.lane.b32.xlu1 %v8702_v63, %s7405_s16  ;;  %v9365_v63 = vld [vmem:[#allocation27_spill] sm:$0xff] }
 0xbf3   : >> { %2420 = vrot.lane.b32.xlu0 %v9360_v29, %s7404_s30 }
 0xbf4   : >> { %2414 = vrot.lane.b32.xlu1 %v9361_v25, %s7404_s30 }
 0xbf7   : >> { %3127 = vrot.lane.b32.xlu0 %v8708_v42, %s7405_s16  ;;  %v9368_v42 = vld [vmem:[#allocation32_spill] sm:$0xff] }
 0xbf8   : >> { %3121 = vrot.lane.b32.xlu1 %v8706_v38, %s7405_s16  ;;  %v9367_v38 = vld [vmem:[#allocation29_spill] sm:$0xff] }
 0xbfb   : >> { %2424 = vrot.lane.b32.xlu0 %v9362_v46, %s7404_s30 }
 0xbfc   : >> { %2418 = vrot.lane.b32.xlu1 %v9363_v39, %s7404_s30 }
 0xbff   : >> { %3131 = vrot.lane.b32.xlu0 %v8712_v57, %s7405_s16  ;;  %v9370_v57 = vld [vmem:[#allocation33_spill] sm:$0xff] }
 0xc00   : >> { %3125 = vrot.lane.b32.xlu1 %v8710_v44, %s7405_s16  ;;  %v9369_v44 = vld [vmem:[#allocation31_spill] sm:$0xff] }
 0xc03   : >> { %2428 = vrot.lane.b32.xlu0 %v9364_v15, %s7404_s30 }
 0xc04   : >> { %2422 = vrot.lane.b32.xlu1 %v9365_v63, %s7404_s30 }
 0xc07   : >> { %3135 = vrot.lane.b32.xlu0 %v8716_v20, %s7405_s16 }
 0xc08   : >> { %3129 = vrot.lane.b32.xlu1 %v8714_v45, %s7405_s16 }
 0xc0b   : >> { %2432 = vrot.lane.b32.xlu0 %v9366_v49, %s7404_s30 }
 0xc0c   : >> { %2426 = vrot.lane.b32.xlu1 %v9367_v38, %s7404_s30 }
 0xc0f   : >> { %3139 = vrot.lane.b32.xlu0 %v8720_v10, %s7405_s16 }
 0xc10   : >> { %3133 = vrot.lane.b32.xlu1 %v8718_v48, %s7405_s16 }
 0xc13   : >> { %2436 = vrot.lane.b32.xlu0 %v9368_v42, %s7404_s30 }
 0xc14   : >> { %2430 = vrot.lane.b32.xlu1 %v9369_v44, %s7404_s30 }
 0xc18   : >> { %3137 = vrot.lane.b32.xlu1 %v8722_v51, %s7405_s16 }
 0xc1c   : >> { %2434 = vrot.lane.b32.xlu1 %v9370_v57, %s7404_s30 }
 0xc20   : >> { %3141 = vrot.lane.b32.xlu1 %v8726_v52, %s7405_s16 }
 0xc21   : >> { %v3550_v45 = vpop.xlane.xlu0 %3549 }
 0xc22   : >> { %v3548_v20 = vpop.xlane.xlu1 %3547 }
 0xc23   : >> { %7209 = vrcp.f32 %v3548_v20 }
 0xc24   : >> { %7211 = vrcp.f32 %v3550_v45 }
 0xc26   : >> { %v3554_v10 = vpop.xlane.xlu0 %3553 }
 0xc2a   : >> { %v3552_v48 = vpop.xlane.xlu0 %3551 }
 0xc2b   : >> { %7213 = vrcp.f32 %v3552_v48  ;;  %v3556_v17 = vpop.xlane.xlu1 %3555 }
 0xc2c   : >> { %7215 = vrcp.f32 %v3554_v10 }
 0xc2d   : >> { %v7210_v12 = vpop.eup %7209  ;;  %7217 = vrcp.f32 %v3556_v17 }
 0xc2e   : >> { %v3558_v34 = vpop.xlane.xlu0 %3557  ;;  %v3595_v51 = vmul.f32 %v7210_v12, %v8793_v35  ;;  %v7212_v37 = vpop.eup %7211 }
 0xc2f   : >> { %v6982_v32 = vpop.permute.xlu1 %6981  ;;  %7219 = vrcp.f32 %v3558_v34  ;;  %v3596_v55 = vmul.f32 %v7212_v37, %v8791_v59 }
 0xc30   : >> { %v6984_v14 = vunpack.i.h.bf16 %v6982_v32  ;;  %v6983_v22 = vunpack.i.l.bf16 %v6982_v32  ;;  %5920 = vmatprep.mubr.f32.mxu0 %v3595_v51 }
 0xc32   : >> { %v6419_v52 = vpack.c.bf16 %v6984_v14, %v6983_v22  ;;  %v3562_v36 = vpop.xlane.xlu0 %3561 }
 0xc33   : >> { %7221 = vrcp.f32 %v3562_v36 }
 0xc34   : >> { %6420 = vmatprep.subr.bf16.mxu0 %v6419_v52  ;;  %6494 = vmatprep.subr.bf16.mxu1 %v6419_v52 }
 0xc35   : >> { %v7214_v40 = vpop.eup %7213  ;;  %6422 = vmatpush3.bf16.msra.mxu0 %v6419_v52  ;;  %6502 = vmatpush3.bf16.msra.mxu1 %v6419_v52 }
 0xc36   : >> { %v3560_v5 = vpop.xlane.xlu0 %3559  ;;  %v3597_v28 = vmul.f32 %v7214_v40, %v8804_v8  ;;  %v7216_v35 = vpop.eup %7215 }
 0xc37   : >> { %7223 = vrcp.f32 %v3560_v5  ;;  %v7218_v58 = vpop.eup %7217  ;;  %v3598_v50 = vmul.f32 %v7216_v35, %v8798_v24 }
 0xc38   : >> { %5921 = vmatmul.mubr.f32.vlgmr.msra.gmra.mrb[80].mxu0 %v3596_v55  ;;  %v3599_v13 = vmul.f32 %v7218_v58, %v8806_v1 }
 0xc39   : >> { %5923 = vmatprep.mubr.f32.mxu0 %v3597_v28  ;;  %v7220_v11 = vpop.eup %7219 }
 0xc3a   : >> { %v3564_v27 = vpop.xlane.xlu0 %3563  ;;  %v3600_v59 = vmul.f32 %v7220_v11, %v8811_v43  ;;  %v3903_v11 = vld [vmem:[%s3901_s22 + $0x8] sm:$0xff] }
 0xc3b   : >> { %7225 = vrcp.f32 %v3564_v27 }
 0xc3c   : >> { %5924 = vmatmul.mubr.f32.gmra.mrb[82].mxu0 %v3598_v50  ;;  %v3902_v50 = vld [vmem:[%s3901_s22] sm:$0xff] }
 0xc3d   : >> { %5926 = vmatprep.mubr.f32.mxu0 %v3599_v13  ;;  %v7222_v54 = vpop.eup %7221  ;;  %v6423_v13 = vpack.c.bf16 %v3903_v11, %v3902_v50 }
 0xc3e   : >> { %v3568_v53 = vpop.xlane.xlu0 %3567  ;;  %v3602_v56 = vmul.f32 %v7222_v54, %v8815_v60 }
 0xc3f   : >> { %7227 = vrcp.f32 %v3568_v53  ;;  %6424 = vmatprep.subr.bf16.mxu1 %v6423_v13  ;;  %v3904_v53 = vld [vmem:[%s3901_s22 + $0x10] sm:$0xff] }
 0xc40   : >> { %5927 = vmatmul.mubr.f32.gmra.mrb[84].mxu0 %v3600_v59  ;;  %v3905_v59 = vld [vmem:[%s3901_s22 + $0x18] sm:$0xff]  ;;  %s3906_s22 = scalar_lea.vmem %s9298_s8, %s7388_s14  ;;  %s921_s14 = sadd.s32 1, %s7388_s14  }
 0xc41   : >> { %v7224_v8 = vpop.eup %7223  ;;  %v6427_v54 = vpack.c.bf16 %v3905_v59, %v3904_v53  ;;  %p9182_p4 = scmp.ge.s32.totalorder %s921_s14, 2  }
 0xc42   : >> { %v3572_v6 = vpop.xlane.xlu0 %3571  ;;  %v3601_v41 = vmul.f32 %v7224_v8, %v8819_v21  ;;  %vm9235_vm11 = vmpackc.low (%p9182_p4), %vm528_vm1, %vm528_vm1  ;;  %vm4707_vm12 = vcmp.eq.s32.totalorder (%p9182_p4), %v7550_v18, 0  ;;  %vm4708_vm13 = vcmp.ge.s32.totalorder (%p9182_p4), %v7550_v18, 7  ;;  %vm4711_vm15 = vcmask (%p9182_p4), 1040384  }
 0xc43   : > { %vm4709_vm14 = vmor (%p9182_p4), %vm4707_vm12, %vm4708_vm13 }
 0xc44   : >> { %5929 = vmatprep.mubr.f32.mxu1 %v3601_v41 }
 0xc45   : >> { %v7226_v7 = vpop.eup %7225  ;;  %5930 = vmatmul.mubr.f32.vlgmr.msra.gmra.mrb[48].mxu1 %v3602_v56 }
 0xc46   : >> { %v3576_v24 = vpop.xlane.xlu0 %3575  ;;  %v3603_v23 = vmul.f32 %v7226_v7, %v8823_v61  ;;  %6426 = vmatpush3.bf16.msra.mxu1 %v6423_v13 }
 0xc47   : >> { %6428 = vmatprep.subr.bf16.mxu1 %v6427_v54 }
 0xc48   : >> { %5932 = vmatprep.mubr.f32.mxu1 %v3603_v23 }
 0xc49   : >> { %v7228_v25 = vpop.eup %7227 }
 0xc4a   : >> { %v3578_v1 = vpop.xlane.xlu0 %3577  ;;  %v3605_v49 = vmul.f32 %v7228_v25, %v8828_v26  ;;  %6430 = vmatpush3.bf16.msra.mxu1 %v6427_v54 }
 0xc4e   : >> { %v2407_v0 = vpop.permute.xlu0 %2406 }
 0xc4f   : >> { %2455 = vst.msk [vmem:[#allocation2] sm:$0xff] %vm2454_vm7, %v2407_v0 }
 0xc52   : >> { %v2409_v43 = vpop.permute.xlu0 %2408 }
 0xc53   : >> { %2456 = vst.msk [vmem:[#allocation2 + $0x8] sm:$0xff] %vm2454_vm7, %v2409_v43 }
 0xc56   : >> { %v3114_v19 = vpop.permute.xlu0 %3113 }
 0xc57   : >> { %3162 = vst.msk [vmem:[#allocation2] sm:$0xff] %vm3161_vm8, %v3114_v19 }
 0xc5a   : >> { %v2411_v60 = vpop.permute.xlu0 %2410 }
 0xc5b   : >> { %2457 = vst.msk [vmem:[#allocation2 + $0x10] sm:$0xff] %vm2454_vm7, %v2411_v60 }
 0xc5e   : >> { %v2413_v21 = vpop.permute.xlu0 %2412 }
 0xc5f   : >> { %2458 = vst.msk [vmem:[#allocation2 + $0x18] sm:$0xff] %vm2454_vm7, %v2413_v21 }
 0xc60   : >> { %v3566_v61 = vpop.xlane.xlu1 %3565 }
 0xc61   : >> { %7229 = vrcp.f32 %v3566_v61  ;;  %v4124_v61 = vld [vmem:[%s8986_s28] sm:$0xff] }
 0xc62   : >> { %v3120_v33 = vpop.permute.xlu0 %3119  ;;  %7231 = vrcp.f32 %v3572_v6 }
 0xc63   : >> { %3165 = vst.msk [vmem:[#allocation2 + $0x18] sm:$0xff] %vm3161_vm8, %v3120_v33  ;;  %v4125_v33 = vld [vmem:[%s8986_s28 + $0x8] sm:$0xff] }
 0xc64   : >> { %v3570_v4 = vpop.xlane.xlu1 %3569 }
 0xc65   : >> { %7233 = vrcp.f32 %v3570_v4 }
 0xc66   : >> { %v2417_v9 = vpop.permute.xlu0 %2416  ;;  %7235 = vrcp.f32 %v3576_v24 }
 0xc67   : >> { %2460 = vst.msk [vmem:[#allocation2 + $0x28] sm:$0xff] %vm2454_vm7, %v2417_v9  ;;  %v6431_v9 = vpack.c.bf16 %v4125_v33, %v4124_v61  ;;  %v9373_v61 = vld [vmem:[#allocation18_spill] sm:$0xff] }
 0xc68   : >> { %v3574_v29 = vpop.xlane.xlu1 %3573 }
 0xc69   : >> { %7237 = vrcp.f32 %v3574_v29  ;;  %6432 = vmatprep.subr.bf16.mxu0 %v6431_v9 }
 0xc6a   : >> { %v3124_v46 = vpop.permute.xlu0 %3123  ;;  %7239 = vrcp.f32 %v3578_v1  ;;  %6434 = vmatpush3.bf16.msra.mxu0 %v6431_v9  ;;  %v9374_v9 = vld [vmem:[#allocation17_spill] sm:$0xff] }
 0xc6b   : >> { %v7230_v39 = vpop.eup %7229  ;;  %3167 = vst.msk [vmem:[#allocation2 + $0x28] sm:$0xff] %vm3161_vm8, %v3124_v46 }
 0xc6c   : >> { %v3116_v15 = vpop.permute.xlu1 %3115  ;;  %v3604_v63 = vmul.f32 %v7230_v39, %v8844_v62  ;;  %v7232_v38 = vpop.eup %7231 }
 0xc6d   : >> { %3163 = vst.msk [vmem:[#allocation2 + $0x8] sm:$0xff] %vm3161_vm8, %v3116_v15  ;;  %v3607_v20 = vmul.f32 %v7232_v38, %v8831_v3 }
 0xc6e   : >> { %5933 = vmatmul.mubr.f32.gmra.mrb[50].mxu1 %v3604_v63  ;;  %v2421_v42 = vpop.permute.xlu0 %2420 }
 0xc6f   : >> { %v7234_v44 = vpop.eup %7233  ;;  %2462 = vst.msk [vmem:[#allocation2 + $0x38] sm:$0xff] %vm2454_vm7, %v2421_v42  ;;  %5935 = vmatprep.mubr.f32.mxu1 %v3605_v49 }
 0xc70   : >> { %v3118_v57 = vpop.permute.xlu1 %3117  ;;  %v3606_v45 = vmul.f32 %v7234_v44, %v8849_v2  ;;  %v7236_v10 = vpop.eup %7235 }
 0xc71   : >> { %3164 = vst.msk [vmem:[#allocation2 + $0x10] sm:$0xff] %vm3161_vm8, %v3118_v57  ;;  %v3609_v34 = vmul.f32 %v7236_v10, %v8834_v47 }
 0xc72   : >> { %5936 = vmatmul.mubr.f32.gmra.mrb[52].mxu1 %v3606_v45  ;;  %v3128_v62 = vpop.permute.xlu0 %3127 }
 0xc73   : >> { %v7238_v48 = vpop.eup %7237  ;;  %3169 = vst.msk [vmem:[#allocation2 + $0x38] sm:$0xff] %vm3161_vm8, %v3128_v62  ;;  %5938 = vmatprep.mubr.f32.mxu1 %v3607_v20 }
 0xc74   : >> { %v2415_v26 = vpop.permute.xlu1 %2414  ;;  %v3608_v17 = vmul.f32 %v7238_v48, %v8854_v31  ;;  %v7240_v12 = vpop.eup %7239 }
 0xc75   : >> { %2459 = vst.msk [vmem:[#allocation2 + $0x20] sm:$0xff] %vm2454_vm7, %v2415_v26  ;;  %v3610_v51 = vmul.f32 %v7240_v12, %v8837_v30 }
 0xc76   : >> { %5939 = vmatmul.mubr.f32.gmra.mrb[54].mxu1 %v3608_v17  ;;  %v2425_v2 = vpop.permute.xlu0 %2424 }
 0xc77   : >> { %2464 = vst.msk [vmem:[#allocation2 + $0x48] sm:$0xff] %vm2454_vm7, %v2425_v2  ;;  %5941 = vmatprep.mubr.f32.mxu1 %v3609_v34 }
 0xc78   : >> { %v3122_v3 = vpop.permute.xlu1 %3121 }
 0xc79   : >> { %3166 = vst.msk [vmem:[#allocation2 + $0x20] sm:$0xff] %vm3161_vm8, %v3122_v3 }
 0xc7a   : >> { %5942 = vmatmul.mubr.f32.gmra.mrb[56].mxu1 %v3610_v51  ;;  %v3132_v32 = vpop.permute.xlu0 %3131 }
 0xc7b   : >> { %3171 = vst.msk [vmem:[#allocation2 + $0x48] sm:$0xff] %vm3161_vm8, %v3132_v32 }
 0xc7c   : >> { %v2419_v31 = vpop.permute.xlu1 %2418 }
 0xc7d   : >> { %2461 = vst.msk [vmem:[#allocation2 + $0x30] sm:$0xff] %vm2454_vm7, %v2419_v31 }
 0xc7e   : >> { %v2429_v14 = vpop.permute.xlu0 %2428 }
 0xc7f   : >> { %2466 = vst.msk [vmem:[#allocation2 + $0x58] sm:$0xff] %vm2454_vm7, %v2429_v14 }
 0xc80   : >> { %v3126_v47 = vpop.permute.xlu1 %3125 }
 0xc81   : >> { %3168 = vst.msk [vmem:[#allocation2 + $0x30] sm:$0xff] %vm3161_vm8, %v3126_v47 }
 0xc82   : >> { %v3136_v22 = vpop.permute.xlu0 %3135 }
 0xc83   : >> { %3173 = vst.msk [vmem:[#allocation2 + $0x58] sm:$0xff] %vm3161_vm8, %v3136_v22 }
 0xc84   : >> { %v2423_v52 = vpop.permute.xlu1 %2422 }
 0xc85   : >> { %2463 = vst.msk [vmem:[#allocation2 + $0x40] sm:$0xff] %vm2454_vm7, %v2423_v52 }
 0xc86   : >> { %v2433_v30 = vpop.permute.xlu0 %2432 }
 0xc87   : >> { %2468 = vst.msk [vmem:[#allocation2 + $0x68] sm:$0xff] %vm2454_vm7, %v2433_v30 }
 0xc88   : >> { %v3130_v36 = vpop.permute.xlu1 %3129 }
 0xc89   : >> { %3170 = vst.msk [vmem:[#allocation2 + $0x40] sm:$0xff] %vm3161_vm8, %v3130_v36 }
 0xc8a   : >> { %v3140_v37 = vpop.permute.xlu0 %3139 }
 0xc8b   : >> { %3175 = vst.msk [vmem:[#allocation2 + $0x68] sm:$0xff] %vm3161_vm8, %v3140_v37 }
 0xc8c   : >> { %v2427_v40 = vpop.permute.xlu1 %2426 }
 0xc8d   : >> { %2465 = vst.msk [vmem:[#allocation2 + $0x50] sm:$0xff] %vm2454_vm7, %v2427_v40 }
 0xc8e   : >> { %v2437_v55 = vpop.permute.xlu0 %2436 }
 0xc8f   : >> { %2470 = vst.msk [vmem:[#allocation2 + $0x78] sm:$0xff] %vm2454_vm7, %v2437_v55 }
 0xc90   : >> { %v3134_v5 = vpop.permute.xlu1 %3133 }
 0xc91   : >> { %3172 = vst.msk [vmem:[#allocation2 + $0x50] sm:$0xff] %vm3161_vm8, %v3134_v5  ;;  %v4126_v5 = vld [vmem:[%s8986_s28 + $0x10] sm:$0xff] }
 0xc94   : >> { %v2431_v28 = vpop.permute.xlu1 %2430 }
 0xc95   : >> { %2467 = vst.msk [vmem:[#allocation2 + $0x60] sm:$0xff] %vm2454_vm7, %v2431_v28  ;;  %v4127_v28 = vld [vmem:[%s8986_s28 + $0x18] sm:$0xff] }
 0xc98   : >> { %v3138_v35 = vpop.permute.xlu1 %3137 }
 0xc99   : >> { %3174 = vst.msk [vmem:[#allocation2 + $0x60] sm:$0xff] %vm3161_vm8, %v3138_v35  ;;  %v6435_v35 = vpack.c.bf16 %v4127_v28, %v4126_v5 }
 0xc9b   : >> { %6436 = vmatprep.subr.bf16.mxu0 %v6435_v35 }
 0xc9c   : >> { %v2435_v58 = vpop.permute.xlu1 %2434  ;;  %6438 = vmatpush3.bf16.msra.mxu0 %v6435_v35  ;;  %v9383_v35 = vld [vmem:[#allocation8_spill] sm:$0xff] }
 0xc9d   : >> { %2469 = vst.msk [vmem:[#allocation2 + $0x70] sm:$0xff] %vm2454_vm7, %v2435_v58 }
 0xca0   : >> { %v3142_v27 = vpop.permute.xlu1 %3141 }
 0xca1   : >> { %3176 = vst.msk [vmem:[#allocation2 + $0x70] sm:$0xff] %vm3161_vm8, %v3142_v27 }
 0xd0b   : >> { %v5922_v8 = vpop.f32.mrb[80].mxu0 }
 0xd0c   : >> { %3822 = vrot.lane.b32.xlu0 %v5922_v8, %s7406_s23  ;;  %v3725_v6 = vpop.f32.mrb[81].mxu0 }
 0xd0f   : >> { %v5925_v41 = vpop.f32.mrb[82].mxu0 }
 0xd10   : >> { %3820 = vrot.lane.b32.xlu0 %v3725_v6, %s7406_s23  ;;  %v3735_v56 = vpop.f32.mrb[83].mxu0  ;;  %v5003_v6 = vld [vmem:[%s3906_s22] ss:$0 sm:$0xff] }
 0xd11   : >> { %3824 = vrot.lane.b32.xlu1 %v3735_v56, %s7406_s23 }
 0xd13   : >> { %v5928_v7 = vpop.f32.mrb[84].mxu0 }
 0xd14   : >> { %3143 = vrot.lane.b32.xlu0 %v8724_v16, %s7405_s16  ;;  %v3745_v24 = vpop.f32.mrb[85].mxu0  ;;  %s9031_s16 = scalar_lea.vmem %s9301_s11, %s5037_s24 }
 0xd15   : >> { %3828 = vrot.lane.b32.xlu1 %v3745_v24, %s7406_s23  ;;  %v4347_v58 = vld [vmem:[%s9031_s16] sm:$0xff]  ;;  %v4348_v27 = vld [vmem:[%s9031_s16 + $0x8] sm:$0xff]  ;;  %v4349_v50 = vld [vmem:[%s9031_s16 + $0x10] sm:$0xff] }
 0xd16   : >> { %v6439_v11 = vpack.c.bf16 %v4348_v27, %v4347_v58  ;;  %v4350_v13 = vld [vmem:[%s9031_s16 + $0x18] sm:$0xff]  ;;  %v4351_v59 = vld [vmem:[%s9031_s16 + $0x20] sm:$0xff]  ;;  %v4352_v54 = vld [vmem:[%s9031_s16 + $0x28] sm:$0xff] }
 0xd17   : >> { %v6443_v53 = vpack.c.bf16 %v4350_v13, %v4349_v50  ;;  %v6447_v8 = vpack.c.bf16 %v4352_v54, %v4351_v59  ;;  %v9384_v50 = vld [vmem:[#allocation7_spill] sm:$0xff]  ;;  %v9385_v54 = vld [vmem:[#allocation6_spill] sm:$0xff] }
 0xd18   : >> { %3826 = vrot.lane.b32.xlu0 %v5925_v41, %s7406_s23  ;;  %v5931_v23 = vpop.f32.mrb[48].mxu1  ;;  %6440 = vmatprep.subr.bf16.mxu1 %v6439_v11 }
 0xd19   : >> { %v3755_v1 = vpop.f32.mrb[49].mxu1 }
 0xd1a   : >> { %3832 = vrot.lane.b32.xlu1 %v3755_v1, %s7406_s23 }
 0xd1c   : >> { %3830 = vrot.lane.b32.xlu0 %v5928_v7, %s7406_s23 }
 0xd20   : >> { %3834 = vrot.lane.b32.xlu0 %v5931_v23, %s7406_s23  ;;  %v9371_v23 = vld [vmem:[#allocation20_spill] sm:$0xff] }
 0xd41   : >> { %v5934_v0 = vpop.f32.mrb[50].mxu1 }
 0xd42   : >> { %v3765_v43 = vpop.f32.mrb[51].mxu1  ;;  %3838 = vrot.lane.b32.xlu0 %v5934_v0, %s7406_s23  ;;  %v9372_v0 = vld [vmem:[#allocation19_spill] sm:$0xff] }
 0xd43   : >> { %3836 = vrot.lane.b32.xlu1 %v3765_v43, %s7406_s23 }
 0xd45   : >> { %v5937_v16 = vpop.f32.mrb[52].mxu1 }
 0xd46   : >> { %v3775_v19 = vpop.f32.mrb[53].mxu1  ;;  %3842 = vrot.lane.b32.xlu0 %v5937_v16, %s7406_s23 }
 0xd47   : >> { %3840 = vrot.lane.b32.xlu1 %v3775_v19, %s7406_s23 }
 0xd49   : >> { %v5940_v60 = vpop.f32.mrb[54].mxu1 }
 0xd4a   : >> { %v3785_v21 = vpop.f32.mrb[55].mxu1  ;;  %3846 = vrot.lane.b32.xlu0 %v5940_v60, %s7406_s23 }
 0xd4b   : >> { %3844 = vrot.lane.b32.xlu1 %v3785_v21, %s7406_s23 }
 0xd4d   : >> { %v5943_v4 = vpop.f32.mrb[56].mxu1 }
 0xd4e   : >> { %v3795_v29 = vpop.f32.mrb[57].mxu1  ;;  %3850 = vrot.lane.b32.xlu0 %v5943_v4, %s7406_s23 }
 0xd4f   : >> { %3848 = vrot.lane.b32.xlu1 %v3795_v29, %s7406_s23 }
 0xd7e   : >> { %v3823_v25 = vpop.permute.xlu0 %3822 }
 0xd7f   : >> { %3870 = vst.msk [vmem:[#allocation2 + $0x8] sm:$0xff] %vm3868_vm9, %v3823_v25 }
 0xd82   : >> { %v3821_v46 = vpop.permute.xlu0 %3820 }
 0xd83   : >> { %3869 = vst.msk [vmem:[#allocation2] sm:$0xff] %vm3868_vm9, %v3821_v46  ;;  %v3825_v39 = vpop.permute.xlu1 %3824 }
 0xd84   : >> { %3871 = vst.msk [vmem:[#allocation2 + $0x10] sm:$0xff] %vm3868_vm9, %v3825_v39 }
 0xd86   : >> { %v3144_v15 = vpop.permute.xlu0 %3143  ;;  %v3886_v42 = vld [vmem:[#allocation2 + $0x8] sm:$0xff] }
 0xd87   : >> { %3177 = vst.msk [vmem:[#allocation2 + $0x78] sm:$0xff] %vm3161_vm8, %v3144_v15  ;;  %v3829_v63 = vpop.permute.xlu1 %3828  ;;  %v9375_v15 = vld [vmem:[#allocation16_spill] sm:$0xff] }
 0xd88   : >> { %3873 = vst.msk [vmem:[#allocation2 + $0x20] sm:$0xff] %vm3868_vm9, %v3829_v63 }
 0xd8a   : >> { %v3827_v49 = vpop.permute.xlu0 %3826  ;;  %v3885_v38 = vld [vmem:[#allocation2] sm:$0xff] }
 0xd8b   : >> { %3872 = vst.msk [vmem:[#allocation2 + $0x18] sm:$0xff] %vm3868_vm9, %v3827_v49  ;;  %5952 = vmatprep.mubr.msk.f32.mxu1 %vm528_vm1, %v3885_v38  ;;  %v3887_v44 = vld [vmem:[#allocation2 + $0x10] sm:$0xff]  ;;  %v9376_v38 = vld [vmem:[#allocation15_spill] sm:$0xff] }
 0xd8c   : >> { %5953 = vmatmul.mubr.msk.f32.vlgmr.msra.gmra.mrb[58].mxu1 %vm528_vm1, %v3886_v42  ;;  %v3833_v57 = vpop.permute.xlu1 %3832 }
 0xd8d   : >> { %5955 = vmatprep.mubr.msk.f32.mxu1 %vm528_vm1, %v3887_v44  ;;  %3875 = vst.msk [vmem:[#allocation2 + $0x30] sm:$0xff] %vm3868_vm9, %v3833_v57  ;;  %6442 = vmatpush3.bf16.msra.mxu1 %v6439_v11 }
 0xd8e   : >> { %v3831_v45 = vpop.permute.xlu0 %3830  ;;  %6444 = vmatprep.subr.bf16.mxu1 %v6443_v53 }
 0xd8f   : >> { %3874 = vst.msk [vmem:[#allocation2 + $0x28] sm:$0xff] %vm3868_vm9, %v3831_v45  ;;  %v3889_v62 = vld [vmem:[#allocation2 + $0x20] sm:$0xff] }
 0xd91   : >> { %6446 = vmatpush3.bf16.msra.mxu1 %v6443_v53 }
 0xd92   : >> { %v3835_v20 = vpop.permute.xlu0 %3834  ;;  %v3888_v10 = vld [vmem:[#allocation2 + $0x18] sm:$0xff]  ;;  %6448 = vmatprep.subr.bf16.mxu1 %v6447_v8 }
 0xd93   : >> { %3876 = vst.msk [vmem:[#allocation2 + $0x38] sm:$0xff] %vm3868_vm9, %v3835_v20  ;;  %5956 = vmatmul.mubr.msk.f32.gmra.mrb[60].mxu1 %vm528_vm1, %v3888_v10  ;;  %v9377_v20 = vld [vmem:[#allocation14_spill] sm:$0xff] }
 0xd94   : >> { %5958 = vmatprep.mubr.msk.f32.mxu1 %vm528_vm1, %v3889_v62  ;;  %v3891_v26 = vld [vmem:[#allocation2 + $0x30] sm:$0xff] }
 0xd95   : >> { %6450 = vmatpush3.bf16.msra.mxu1 %v6447_v8  ;;  %v9378_v62 = vld [vmem:[#allocation13_spill] sm:$0xff] }
 0xd96   : >> { %v3890_v48 = vld [vmem:[#allocation2 + $0x28] sm:$0xff] }
 0xd97   : >> { %5959 = vmatmul.mubr.msk.f32.gmra.mrb[62].mxu1 %vm528_vm1, %v3890_v48 }
 0xd98   : >> { %5961 = vmatprep.mubr.msk.f32.mxu1 %vm528_vm1, %v3891_v26 }
 0xd9a   : >> { %v3892_v17 = vld [vmem:[#allocation2 + $0x38] sm:$0xff] }
 0xd9b   : >> { %5962 = vmatmul.mubr.msk.f32.gmra.mrb[64].mxu1 %vm528_vm1, %v3892_v17 }
 0xdb4   : >> { %v3839_v12 = vpop.permute.xlu0 %3838 }
 0xdb5   : >> { %3878 = vst.msk [vmem:[#allocation2 + $0x48] sm:$0xff] %vm3868_vm9, %v3839_v12  ;;  %v3837_v34 = vpop.permute.xlu1 %3836 }
 0xdb6   : >> { %3877 = vst.msk [vmem:[#allocation2 + $0x40] sm:$0xff] %vm3868_vm9, %v3837_v34 }
 0xdb8   : >> { %v3843_v2 = vpop.permute.xlu0 %3842 }
 0xdb9   : >> { %3880 = vst.msk [vmem:[#allocation2 + $0x58] sm:$0xff] %vm3868_vm9, %v3843_v2  ;;  %v3841_v3 = vpop.permute.xlu1 %3840  ;;  %v9379_v2 = vld [vmem:[#allocation12_spill] sm:$0xff] }
 0xdba   : >> { %3879 = vst.msk [vmem:[#allocation2 + $0x50] sm:$0xff] %vm3868_vm9, %v3841_v3 }
 0xdbc   : >> { %v3847_v51 = vpop.permute.xlu0 %3846  ;;  %v3894_v14 = vld [vmem:[#allocation2 + $0x48] sm:$0xff] }
 0xdbd   : >> { %3882 = vst.msk [vmem:[#allocation2 + $0x68] sm:$0xff] %vm3868_vm9, %v3847_v51  ;;  %v3845_v32 = vpop.permute.xlu1 %3844  ;;  %v3893_v31 = vld [vmem:[#allocation2 + $0x40] sm:$0xff] }
 0xdbe   : >> { %3881 = vst.msk [vmem:[#allocation2 + $0x60] sm:$0xff] %vm3868_vm9, %v3845_v32  ;;  %5964 = vmatprep.mubr.msk.f32.mxu1 %vm528_vm1, %v3893_v31  ;;  %v9380_v32 = vld [vmem:[#allocation11_spill] sm:$0xff] }
 0xdbf   : >> { %5965 = vmatmul.mubr.msk.f32.gmra.mrb[66].mxu1 %vm528_vm1, %v3894_v14 }
 0xdc0   : >> { %v3851_v47 = vpop.permute.xlu0 %3850  ;;  %v3896_v30 = vld [vmem:[#allocation2 + $0x58] sm:$0xff] }
 0xdc1   : >> { %3884 = vst.msk [vmem:[#allocation2 + $0x78] sm:$0xff] %vm3868_vm9, %v3851_v47  ;;  %v3849_v22 = vpop.permute.xlu1 %3848  ;;  %v3895_v52 = vld [vmem:[#allocation2 + $0x50] sm:$0xff] }
 0xdc2   : >> { %3883 = vst.msk [vmem:[#allocation2 + $0x70] sm:$0xff] %vm3868_vm9, %v3849_v22  ;;  %5967 = vmatprep.mubr.msk.f32.mxu1 %vm528_vm1, %v3895_v52  ;;  %v9381_v52 = vld [vmem:[#allocation10_spill] sm:$0xff] }
 0xdc3   : >> { %5968 = vmatmul.mubr.msk.f32.gmra.mrb[68].mxu1 %vm528_vm1, %v3896_v30 }
 0xdc4   : >> { %v3898_v37 = vld [vmem:[#allocation2 + $0x68] sm:$0xff] }
 0xdc5   : >> { %v3897_v36 = vld [vmem:[#allocation2 + $0x60] sm:$0xff] }
 0xdc6   : >> { %5970 = vmatprep.mubr.msk.f32.mxu1 %vm528_vm1, %v3897_v36 }
 0xdc7   : >> { %5971 = vmatmul.mubr.msk.f32.gmra.mrb[70].mxu1 %vm528_vm1, %v3898_v37  ;;  %v9382_v37 = vld [vmem:[#allocation9_spill] sm:$0xff] }
 0xdc8   : >> { %v3900_v55 = vld [vmem:[#allocation2 + $0x78] sm:$0xff] }
 0xdc9   : >> { %v3899_v40 = vld [vmem:[#allocation2 + $0x70] sm:$0xff] }
 0xdca   : >> { %5973 = vmatprep.mubr.msk.f32.mxu1 %vm528_vm1, %v3899_v40 }
 0xdcb   : >> { %5974 = vmatmul.mubr.msk.f32.gmra.mrb[72].mxu1 %vm528_vm1, %v3900_v55 }
 0xe5f   : >> { %v5954_v41 = vpop.f32.mrb[58].mxu1 }
 0xe60   : >> { %v4034_v56 = vadd.f32 %v5954_v41, %v5003_v6  ;;  %v4028_v7 = vpop.f32.mrb[59].mxu1  ;;  %v9386_v41 = vld [vmem:[#allocation5_spill] sm:$0xff] }
 0xe61   : >> { %v4029_v24 = vadd.f32 %v5003_v6, %v4028_v7  ;;  %v4353_v7 = vld [vmem:[%s9031_s16 + $0x30] sm:$0xff] }
 0xe62   : >> { %v9047_v43 = vadd.f32 %v9372_v0, %v4034_v56 }
 0xe63   : >> { %v9044_v1 = vadd.f32 %v9371_v23, %v4029_v24  ;;  %v5020_v23 = vld [vmem:[%s4128_s27] ss:$0 sm:$0xff] }
 0xe65   : >> { %5984 = vmatprep.mubr.msk.f32.mxu0 %vm528_vm1, %v9044_v1 }
 0xe66   : >> { %v5957_v16 = vpop.f32.mrb[60].mxu1  ;;  %5985 = vmatmul.mubr.msk.f32.vlgmr.msra.gmra.mrb[86].mxu0 %vm528_vm1, %v9047_v43 }
 0xe67   : >> { %v4044_v19 = vadd.f32 %v5957_v16, %v5003_v6  ;;  %v4038_v60 = vpop.f32.mrb[61].mxu1 }
 0xe68   : >> { %v4039_v21 = vadd.f32 %v5003_v6, %v4038_v60 }
 0xe69   : >> { %v9057_v29 = vadd.f32 %v9374_v9, %v4044_v19 }
 0xe6a   : >> { %v9054_v33 = vadd.f32 %v9373_v61, %v4039_v21  ;;  %v5960_v4 = vpop.f32.mrb[62].mxu1 }
 0xe6b   : >> { %v4054_v25 = vadd.f32 %v5960_v4, %v5003_v6  ;;  %v4048_v46 = vpop.f32.mrb[63].mxu1 }
 0xe6c   : >> { %v4049_v39 = vadd.f32 %v5003_v6, %v4048_v46  ;;  %5987 = vmatprep.mubr.msk.f32.mxu0 %vm528_vm1, %v9054_v33 }
 0xe6d   : >> { %5988 = vmatmul.mubr.msk.f32.gmra.mrb[88].mxu0 %vm528_vm1, %v9057_v29  ;;  %v9067_v42 = vadd.f32 %v9376_v38, %v4054_v25 }
 0xe6e   : >> { %v9064_v63 = vadd.f32 %v9375_v15, %v4049_v39  ;;  %v5963_v49 = vpop.f32.mrb[64].mxu1 }
 0xe6f   : >> { %v4064_v44 = vadd.f32 %v5963_v49, %v5003_v6  ;;  %v4058_v57 = vpop.f32.mrb[65].mxu1 }
 0xe70   : >> { %v4059_v45 = vadd.f32 %v5003_v6, %v4058_v57  ;;  %5990 = vmatprep.mubr.msk.f32.mxu0 %vm528_vm1, %v9064_v63 }
 0xe71   : >> { %5991 = vmatmul.mubr.msk.f32.gmra.mrb[90].mxu0 %vm528_vm1, %v9067_v42  ;;  %v9077_v48 = vadd.f32 %v9378_v62, %v4064_v44 }
 0xe72   : >> { %v9074_v10 = vadd.f32 %v9377_v20, %v4059_v45 }
 0xe74   : >> { %5993 = vmatprep.mubr.msk.f32.mxu0 %vm528_vm1, %v9074_v10 }
 0xe75   : >> { %5994 = vmatmul.mubr.msk.f32.gmra.mrb[92].mxu0 %vm528_vm1, %v9077_v48 }
 0xe92   : >> { %v5966_v26 = vpop.f32.mrb[66].mxu1 }
 0xe93   : >> { %v4074_v17 = vadd.f32 %v5966_v26, %v5003_v6  ;;  %v4068_v12 = vpop.f32.mrb[67].mxu1 }
 0xe94   : >> { %v4069_v34 = vadd.f32 %v5003_v6, %v4068_v12 }
 0xe95   : >> { %v9087_v31 = vadd.f32 %v9380_v32, %v4074_v17 }
 0xe96   : >> { %v9084_v3 = vadd.f32 %v9379_v2, %v4069_v34  ;;  %v5969_v51 = vpop.f32.mrb[68].mxu1 }
 0xe97   : >> { %v4084_v14 = vadd.f32 %v5969_v51, %v5003_v6  ;;  %v4078_v47 = vpop.f32.mrb[69].mxu1 }
 0xe98   : >> { %v4079_v22 = vadd.f32 %v5003_v6, %v4078_v47  ;;  %5996 = vmatprep.mubr.msk.f32.mxu0 %vm528_vm1, %v9084_v3 }
 0xe99   : >> { %5997 = vmatmul.mubr.msk.f32.gmra.mrb[94].mxu0 %vm528_vm1, %v9087_v31  ;;  %v9097_v40 = vadd.f32 %v9382_v37, %v4084_v14 }
 0xe9a   : >> { %v9094_v30 = vadd.f32 %v9381_v52, %v4079_v22  ;;  %v5972_v36 = vpop.f32.mrb[70].mxu1 }
 0xe9b   : >> { %v4094_v55 = vadd.f32 %v5972_v36, %v5003_v6  ;;  %v4088_v5 = vpop.f32.mrb[71].mxu1 }
 0xe9c   : >> { %v4089_v28 = vadd.f32 %v5003_v6, %v4088_v5  ;;  %5999 = vmatprep.mubr.msk.f32.mxu0 %vm528_vm1, %v9094_v30 }
 0xe9d   : >> { %6000 = vmatmul.mubr.msk.f32.gmra.mrb[96].mxu0 %vm528_vm1, %v9097_v40  ;;  %v9107_v11 = vadd.f32 %v9384_v50, %v4094_v55 }
 0xe9e   : >> { %v9104_v58 = vadd.f32 %v9383_v35, %v4089_v28  ;;  %v5975_v27 = vpop.f32.mrb[72].mxu1 }
 0xe9f   : >> { %v4104_v13 = vadd.f32 %v5975_v27, %v5003_v6  ;;  %v4098_v53 = vpop.f32.mrb[73].mxu1 }
 0xea0   : >> { %v4099_v59 = vadd.f32 %v5003_v6, %v4098_v53  ;;  %6002 = vmatprep.mubr.msk.f32.mxu0 %vm528_vm1, %v9104_v58  ;;  %v4354_v6 = vld [vmem:[%s9031_s16 + $0x38] sm:$0xff] }
 0xea1   : >> { %6003 = vmatmul.mubr.msk.f32.gmra.mrb[98].mxu0 %vm528_vm1, %v9107_v11  ;;  %v9117_v56 = vadd.f32 %v9386_v41, %v4104_v13  ;;  %v6451_v24 = vpack.c.bf16 %v4354_v6, %v4353_v7 }
 0xea2   : >> { %v9114_v8 = vadd.f32 %v9385_v54, %v4099_v59 }
 0xea3   : >> { %6452 = vmatprep.subr.bf16.mxu1 %v6451_v24 }
 0xea4   : >> { %6005 = vmatprep.mubr.msk.f32.mxu0 %vm528_vm1, %v9114_v8  ;;  %6454 = vmatpush3.bf16.msra.mxu1 %v6451_v24 }
 0xea5   : >> { %6006 = vmatmul.mubr.msk.f32.gmra.mrb[100].mxu0 %vm528_vm1, %v9117_v56 }
 0xf39   : >> { %v5986_v0 = vpop.f32.mrb[86].mxu0 }
 0xf3a   : >> { %v4256_v16 = vadd.f32 %v5986_v0, %v5020_v23  ;;  %v4250_v19 = vpop.f32.mrb[87].mxu0 }
 0xf3b   : >> { %v4251_v60 = vadd.f32 %v5020_v23, %v4250_v19  ;;  %v5038_v19 = vld [vmem:[%s4355_s29] ss:$0 sm:$0xff] }
 0xf3c   : >> { %v4330_v61 = vmax.f32 %v4256_v16, 0.0 }
 0xf3d   : >> { %v4329_v21 = vmax.f32 %v4251_v60, 0.0 }
 0xf3f   : >> { %6024 = vmatprep.mubr.msk.f32.mxu1 %vm4363_vm10, %v4329_v21 }
 0xf40   : >> { %v5989_v4 = vpop.f32.mrb[88].mxu0  ;;  %6025 = vmatmul.mubr.msk.f32.vlgmr.msra.gmra.mrb[74].mxu1 %vm4363_vm10, %v4330_v61 }
 0xf41   : >> { %v4266_v9 = vadd.f32 %v5989_v4, %v5020_v23  ;;  %v4260_v25 = vpop.f32.mrb[89].mxu0 }
 0xf42   : >> { %v4261_v46 = vadd.f32 %v5020_v23, %v4260_v25 }
 0xf43   : >> { %v4332_v49 = vmax.f32 %v4266_v9, 0.0 }
 0xf44   : >> { %v4331_v39 = vmax.f32 %v4261_v46, 0.0  ;;  %v5992_v15 = vpop.f32.mrb[90].mxu0 }
 0xf45   : >> { %v4276_v38 = vadd.f32 %v5992_v15, %v5020_v23  ;;  %v4270_v44 = vpop.f32.mrb[91].mxu0 }
 0xf46   : >> { %v4271_v57 = vadd.f32 %v5020_v23, %v4270_v44  ;;  %6027 = vmatprep.mubr.msk.f32.mxu1 %vm4363_vm10, %v4331_v39 }
 0xf47   : >> { %6028 = vmatmul.mubr.msk.f32.gmra.mrb[76].mxu1 %vm4363_vm10, %v4332_v49  ;;  %v4334_v62 = vmax.f32 %v4276_v38, 0.0 }
 0xf48   : >> { %v4333_v45 = vmax.f32 %v4271_v57, 0.0  ;;  %v5995_v20 = vpop.f32.mrb[92].mxu0 }
 0xf49   : >> { %v4286_v26 = vadd.f32 %v5995_v20, %v5020_v23  ;;  %v4280_v17 = vpop.f32.mrb[93].mxu0 }
 0xf4a   : >> { %v4281_v12 = vadd.f32 %v5020_v23, %v4280_v17  ;;  %6030 = vmatprep.mubr.msk.f32.mxu1 %vm4363_vm10, %v4333_v45 }
 0xf4b   : >> { %6031 = vmatmul.mubr.msk.f32.gmra.mrb[78].mxu1 %vm4363_vm10, %v4334_v62  ;;  %v4336_v2 = vmax.f32 %v4286_v26, 0.0 }
 0xf4c   : >> { %v4335_v34 = vmax.f32 %v4281_v12, 0.0 }
 0xf4e   : >> { %6033 = vmatprep.mubr.msk.f32.mxu1 %vm4363_vm10, %v4335_v34 }
 0xf4f   : >> { %6034 = vmatmul.mubr.msk.f32.gmra.mrb[80].mxu1 %vm4363_vm10, %v4336_v2 }
 0xf6c   : >> { %v5998_v51 = vpop.f32.mrb[94].mxu0 }
 0xf6d   : >> { %v4296_v32 = vadd.f32 %v5998_v51, %v5020_v23  ;;  %v4290_v14 = vpop.f32.mrb[95].mxu0 }
 0xf6e   : >> { %v4291_v47 = vadd.f32 %v5020_v23, %v4290_v14 }
 0xf6f   : >> { %v4338_v36 = vmax.f32 %v4296_v32, 0.0 }
 0xf70   : >> { %v4337_v22 = vmax.f32 %v4291_v47, 0.0  ;;  %v6001_v52 = vpop.f32.mrb[96].mxu0 }
 0xf71   : >> { %v4306_v37 = vadd.f32 %v6001_v52, %v5020_v23  ;;  %v4300_v55 = vpop.f32.mrb[97].mxu0 }
 0xf72   : >> { %v4301_v5 = vadd.f32 %v5020_v23, %v4300_v55  ;;  %6036 = vmatprep.mubr.msk.f32.mxu1 %vm4363_vm10, %v4337_v22 }
 0xf73   : >> { %6037 = vmatmul.mubr.msk.f32.gmra.mrb[82].mxu1 %vm4363_vm10, %v4338_v36  ;;  %v4340_v27 = vmax.f32 %v4306_v37, 0.0 }
 0xf74   : >> { %v4339_v28 = vmax.f32 %v4301_v5, 0.0  ;;  %v6004_v35 = vpop.f32.mrb[98].mxu0 }
 0xf75   : >> { %v4316_v50 = vadd.f32 %v6004_v35, %v5020_v23  ;;  %v4310_v13 = vpop.f32.mrb[99].mxu0 }
 0xf76   : >> { %v4311_v53 = vadd.f32 %v5020_v23, %v4310_v13  ;;  %6039 = vmatprep.mubr.msk.f32.mxu1 %vm4363_vm10, %v4339_v28 }
 0xf77   : >> { %6040 = vmatmul.mubr.msk.f32.gmra.mrb[84].mxu1 %vm4363_vm10, %v4340_v27  ;;  %v4342_v41 = vmax.f32 %v4316_v50, 0.0 }
 0xf78   : >> { %v4341_v59 = vmax.f32 %v4311_v53, 0.0  ;;  %v6007_v54 = vpop.f32.mrb[100].mxu0 }
 0xf79   : >> { %v4326_v7 = vadd.f32 %v6007_v54, %v5020_v23  ;;  %v4320_v6 = vpop.f32.mrb[101].mxu0 }
 0xf7a   : >> { %v4321_v24 = vadd.f32 %v5020_v23, %v4320_v6  ;;  %6042 = vmatprep.mubr.msk.f32.mxu1 %vm4363_vm10, %v4341_v59 }
 0xf7b   : >> { %6043 = vmatmul.mubr.msk.f32.gmra.mrb[86].mxu1 %vm4363_vm10, %v4342_v41  ;;  %v4344_v16 = vmax.f32 %v4326_v7, 0.0 }
 0xf7c   : >> { %v4343_v0 = vmax.f32 %v4321_v24, 0.0 }
 0xf7e   : >> { %6045 = vmatprep.mubr.msk.f32.mxu1 %vm4363_vm10, %v4343_v0 }
 0xf7f   : >> { %6046 = vmatmul.mubr.msk.f32.gmra.mrb[88].mxu1 %vm4363_vm10, %v4344_v16 }
0x1013   : >> { %v6026_v60 = vpop.f32.mrb[74].mxu1 }
0x1014   : >> { %v4484_v21 = vadd.f32 %v6026_v60, %v5038_v19  ;;  %v4478_v61 = vpop.f32.mrb[75].mxu1  ;;  %v9413_v60 = vld [vmem:[#allocation4_spill] sm:$0xff] (%p9182_p4) }
0x1015   : >> { %v4479_v4 = vadd.f32 %v5038_v19, %v4478_v61 }
0x1016   : >> { %v9150_v23 = vadd.f32 %v4484_v21, %v9047_v43  }
0x1017   : >> { %v9153_v13 = vadd.f32 %v4479_v4, %v9044_v1   ;;  %v4705_v4 = vld [vmem:[%s503_s26] sm:$0x1] (%p9182_p4) }
0x1019   : >> { %v9387_v46 = vmov %v9153_v13 }
0x101a   : >> { %v6029_v9 = vpop.f32.mrb[76].mxu1  ;;  %v9408_v13 = vmov %v9387_v46 }
0x101b   : >> { %v4494_v25 = vadd.f32 %v6029_v9, %v5038_v19  ;;  %v4488_v39 = vpop.f32.mrb[77].mxu1  ;;  %v4574_v13 = vld [vmem:[#allocation3] sm:$0x1] (%p9182_p4) }
0x101c   : >> { %v4489_v15 = vadd.f32 %v5038_v19, %v4488_v39 }
0x101d   : >> { %v9156_v49 = vadd.f32 %v4494_v25, %v9057_v29  }
0x101e   : >> { %v9159_v9 = vadd.f32 %v4489_v15, %v9054_v33   ;;  %v6032_v44 = vpop.f32.mrb[78].mxu1 }
0x101f   : >> { %v4504_v57 = vadd.f32 %v6032_v44, %v5038_v19  ;;  %v4498_v45 = vpop.f32.mrb[79].mxu1 }
0x1020   : >> { %v9388_v38 = vmov %v9159_v9  ;;  %v4499_v20 = vadd.f32 %v5038_v19, %v4498_v45 }
0x1021   : >> { %v9162_v14 = vadd.f32 %v4504_v57, %v9067_v42   ;;  %v9406_v9 = vmov %v9388_v38 }
0x1022   : >> { %v9165_v1 = vadd.f32 %v4499_v20, %v9064_v63   ;;  %v6035_v62 = vpop.f32.mrb[80].mxu1 }
0x1023   : >> { %v9389_v43 = vmov %v9162_v14  ;;  %v4514_v26 = vadd.f32 %v6035_v62, %v5038_v19  ;;  %v4508_v17 = vpop.f32.mrb[81].mxu1 }
0x1024   : >> { %v4509_v12 = vadd.f32 %v5038_v19, %v4508_v17  ;;  %v6464_v54 = vpack.c.bf16 (%p9182_p4), %v9389_v43, %v9165_v1 }
0x1025   : >> { %v9168_v16 = vadd.f32 %v4514_v26, %v9077_v48  }
0x1026   : >> { %v9171_v15 = vadd.f32 %v4509_v12, %v9074_v10  }
0x1027   : >> { %v9390_v29 = vmov %v9168_v16 }
0x1028   : >> { %v9391_v33 = vmov %v9171_v15  ;;  %v9401_v16 = vmov %v9390_v29 }
0x1029   : >> { %v9402_v15 = vmov %v9391_v33  ;;  %v6468_v41 = vpack.c.bf16 (%p9182_p4), %v9390_v29, %v9391_v33  ;;  %v4573_v16 = vld [vmem:[%s9303_s13] sm:$0x1] (%p9182_p4) }
0x1046   : >> { %v6038_v34 = vpop.f32.mrb[82].mxu1 }
0x1047   : >> { %v4524_v2 = vadd.f32 %v6038_v34, %v5038_v19  ;;  %v4518_v51 = vpop.f32.mrb[83].mxu1 }
0x1048   : >> { %v4519_v32 = vadd.f32 %v5038_v19, %v4518_v51 }
0x1049   : >> { %v4566_v42 = vadd.f32 %v4524_v2, %v9087_v31  }
0x104a   : >> { %v4565_v47 = vadd.f32 %v4519_v32, %v9084_v3   ;;  %v6041_v63 = vpop.f32.mrb[84].mxu1 }
0x104b   : >> { %v4534_v14 = vadd.f32 %v6041_v63, %v5038_v19  ;;  %v4528_v22 = vpop.f32.mrb[85].mxu1 }
0x104c   : >> { %v4529_v52 = vadd.f32 %v5038_v19, %v4528_v22  ;;  %v9400_v17 = vmov %v4565_v47  ;;  %v6472_v7 = vpack.c.bf16 (%p9182_p4), %v4566_v42, %v4565_v47 }
0x104d   : >> { %v4568_v36 = vadd.f32 %v4534_v14, %v9097_v40   ;;  %v9403_v14 = vmov %v9389_v43  ;;  %v6456_v40 = vpack.c.bf16 (%p9182_p4), %v9150_v23, %v9387_v46 }
0x104e   : >> { %v4567_v48 = vadd.f32 %v4529_v52, %v9094_v30   ;;  %v6044_v37 = vpop.f32.mrb[86].mxu1  ;;  %v9409_v30 = vmov (%p9182_p4), 0.0|0.0  }
0x104f   : >> { %v4544_v55 = vadd.f32 %v6044_v37, %v5038_v19  ;;  %v4538_v10 = vpop.f32.mrb[87].mxu1  ;;  %v9397_v21 = vmov %v4568_v36  ;;  %6455 = vmatprep.subr.bf16.mxu0 (%p9182_p4), %v9409_v30 }
0x1050   : >> { %v4539_v5 = vadd.f32 %v5038_v19, %v4538_v10  ;;  %v9398_v20 = vmov %v4567_v48  ;;  %v9405_v10 = vmov %v9156_v49  ;;  %6458 = vmatpush3.bf16.xpose.msk.msra.mxu0 (%p9182_p4), %vm9235_vm11, %v6456_v40  ;;  %v6476_v6 = vpack.c.bf16 (%p9182_p4), %v4568_v36, %v4567_v48 }
0x1051   : >> { %v4570_v28 = vadd.f32 %v4544_v55, %v9107_v11   ;;  %v9404_v11 = vmov %v9165_v1  ;;  %6459 = vmatprep.subr.bf16.mxu0 (%p9182_p4), %v9409_v30 }
0x1052   : >> { %v4569_v35 = vadd.f32 %v4539_v5, %v9104_v58   ;;  %v6047_v27 = vpop.f32.mrb[88].mxu1  ;;  %920 = sbr.rel (!%p9182_p4) target bundleno = 251 (0xfb), region = 127  ;;  %v7407_v11 = vmov (%p9182_p4), 0  }
0x1053   : >> { %v4554_v31 = vadd.f32 %v6047_v27, %v5038_v19  ;;  %v4548_v50 = vpop.f32.mrb[89].mxu1  ;;  %v9395_v24 = vmov %v4570_v28  ;;  %7241 = vset.pattern.permute.xlu0 (%p9182_p4), %v7407_v11 }
0x1054   : >> { %v4549_v3 = vadd.f32 %v5038_v19, %v4548_v50  ;;  %v9396_v22 = vmov %v4569_v35  ;;  %v9399_v19 = vmov %v4566_v42  ;;  %4577 = vperm.xlu0 (%p9182_p4), %7241, %v4574_v13   ;;  %v6480_v24 = vpack.c.bf16 (%p9182_p4), %v4570_v28, %v4569_v35 }
0x1055   : >> { %v4572_v53 = vadd.f32 %v4554_v31, %v9117_v56   ;;  %v9412_v56 = vmov (%p9182_p4), 0.0  }
0x1056   : >> { %v4571_v59 = vadd.f32 %v4549_v3, %v9114_v8   ;;  %v9407_v8 = vmov %v9150_v23  ;;  %6080 = vmatprep.mubr.msk.f32.mxu0 (%p9182_p4), %vm7391_vm0, %v9412_v56 }
0x1057   : >> { %v9393_v26 = vmov %v4572_v53  ;;  %v6460_v8 = vpack.c.bf16 (%p9182_p4), %v9156_v49, %v9388_v38 }
0x1058   : >> { %v9394_v25 = vmov %v4571_v59  ;;  %v6484_v0 = vpack.c.bf16 (%p9182_p4), %v4572_v53, %v4571_v59 }
0x1059   : > { %6462 = vmatpush3.bf16.xpose.msk.msra.mxu0 %vm9235_vm11, %v6460_v8 }
0x105a   : > { %6463 = vmatprep.subr.bf16.mxu0 %v9409_v30 }
0x1061   : > { %6466 = vmatpush3.bf16.xpose.msk.msra.mxu0 %vm9235_vm11, %v6464_v54 }
0x1062   : > { %6467 = vmatprep.subr.bf16.mxu0 %v9409_v30 }
0x1069   : > { %6470 = vmatpush3.bf16.xpose.msk.msra.mxu0 %vm9235_vm11, %v6468_v41 }
0x106a   : > { %6471 = vmatprep.subr.bf16.mxu0 %v9409_v30 }
0x1071   : > { %6474 = vmatpush3.bf16.xpose.msk.msra.mxu0 %vm9235_vm11, %v6472_v7 }
0x1072   : > { %6475 = vmatprep.subr.bf16.mxu0 %v9409_v30 }
0x1079   : > { %6478 = vmatpush3.bf16.xpose.msk.msra.mxu0 %vm9235_vm11, %v6476_v6 }
0x107a   : > { %6479 = vmatprep.subr.bf16.mxu0 %v9409_v30 }
0x1081   : > { %6482 = vmatpush3.bf16.xpose.msk.msra.mxu0 %vm9235_vm11, %v6480_v24 }
0x1082   : > { %6483 = vmatprep.subr.bf16.mxu0 %v9409_v30 }
0x1089   : > { %6486 = vmatpush3.bf16.xpose.msk.msra.mxu0 %vm9235_vm11, %v6484_v0 }
0x1090   : > { %6081 = vmatmul.mubr.msk.f32.vlgmr.msra.gmra.mrb[0].mxu0 %vm528_vm1, %v4573_v16 }
0x10d3   : > { %v4578_v19 = vpop.permute.xlu0 %4577 }
0x10d4   : > { %v4583_v21 = vrot.slane %v4578_v19, %v9413_v60 }
0x1163   : > { %v4701_v61 = vpop.f32.mrb[0].mxu0 }
0x1164   : > { %v4702_v23 = vadd.f32 %v4701_v61, %v4583_v21  ;;  %v6082_v46 = vpop.f32.mrb[1].mxu0 }
0x1166   : > { %v4706_v9 = vadd.f32 %v4705_v4, %v4702_v23 }
0x1168   : > { %v4710_v25 = vsel %vm4709_vm14, -inf, %v4706_v9 }
0x1169   : > { %v4712_v39 = vsel %vm4711_vm15, %v4710_v25, -inf }
0x116a   : > { %4713 = vmax.xlane.f32.xlu0 %v4712_v39 }
0x11f7   : > { %v4714_v15 = vpop.xlane.xlu0 %4713 }
0x11f8   : > { %v4715_v49 = vsub.f32 %v4710_v25, %v4714_v15 }
0x11fa   : > { %v4716_v38 = vmul.f32 1.442695, %v4715_v49 }
0x11fc   : > { %7242 = vpow2.f32 %v4716_v38 }
0x1206   : > { %v7243_v18 = vpop.eup %7242 }
0x1207   : > { %v4718_v44 = vsel %vm4711_vm15, %v7243_v18, 0.0 }
0x1208   : > { %4719 = vadd.xlane.f32.xlu1 %v4718_v44 }
0x1295   : > { %v4720_v57 = vpop.xlane.xlu1 %4719 }
0x1296   : > { %7244 = vrcp.f32 %v4720_v57 }
0x12a0   : > { %v7245_v45 = vpop.eup %7244 }
0x12a1   : > { %v4722_v20 = vmul.f32 %v7245_v45, %v7243_v18 }
0x12a3   : > { %vm4723_vm0 = vcmp.le.f32.partialorder %v4722_v20, 1e-05  ;;  %v4724_v43 = vadd.f32 1e-07, %v4722_v20 }
0x12a5   : > { %v4725_v1 = vsel %vm4723_vm0, %v4724_v43, %v4722_v20 }
0x12a6   : > { %4726 = vst [vmem:[%s506_s17] sm:$0x1] %v4725_v1 }
0x12a7 PF: > { %s27_s20 = sadd.s32 1, %s7320_s20  }
0x12a8   : > { %p24_p5 = scmp.ge.s32.totalorder %s27_s20, 4  }
0x12aa   :  { %26 = sbr.rel (!%p24_p5) target bundleno = 3 (0x3), region = 138 }

</bundles_post_ra>
